<compile_context>
chip_gen: v7x
topology: tpu7x:2x2x1
jax: 0.10.0
libtpu: 0.0.40
codegen_flags: <defaults>
</compile_context>

<pallas_src>
import functools
import math

import jax
import jax.numpy as jnp
from jax import lax
from jax.experimental import pallas as pl
from jax.experimental.pallas import tpu as pltpu

_EPS = 1e-5                       # torch.nn.GroupNorm default eps
_VMEM_LIMIT = 48 * 1024 * 1024    # explicit scoped-VMEM limit (safe on v5e/v6e/v7x)


# ---------------------------------------------------------------------------
# In-kernel GroupNorm statistics (gmat = precomputed block-diag group matrix)
# ---------------------------------------------------------------------------
def _group_stats(x2, gmat, inv_n):
    s1 = jnp.sum(x2, axis=0, keepdims=True)                    # (1, C)
    s2 = jnp.sum(x2 * x2, axis=0, keepdims=True)               # (1, C)
    mean_c = jnp.dot(s1, gmat, preferred_element_type=jnp.float32) * inv_n
    ms_c = jnp.dot(s2, gmat, preferred_element_type=jnp.float32) * inv_n
    var_c = ms_c - mean_c * mean_c
    return mean_c, var_c


# ---------------------------------------------------------------------------
# Kernel 1/2: GroupNorm + Swish + Conv3x3 (+ noise bias) (+ 1x1 res conv + add)
# ---------------------------------------------------------------------------
def _fused_block_kernel(*refs, H, W, inv_n, has_extra, has_res):
    i = 0
    x_ref = refs[i]; i += 1          # (1, HW, Cin)   f32 or bf16
    g_ref = refs[i]; i += 1          # (1, Cin)       f32
    b_ref = refs[i]; i += 1          # (1, Cin)       f32
    gmat_ref = refs[i]; i += 1       # (Cin, Cin)     f32
    w_ref = refs[i]; i += 1          # (9, Cin, Cout) bf16
    bias_ref = refs[i]; i += 1       # (1, Cout)      f32
    ml_ref = refs[i]; i += 1         # (HW, 1)        bf16  (0 where w == 0)
    mr_ref = refs[i]; i += 1         # (HW, 1)        bf16  (0 where w == W-1)
    if has_extra:
        extra_ref = refs[i]; i += 1  # (1, 1, Cout)   f32   per-batch noise bias
    if has_res:
        xr_ref = refs[i]; i += 1     # (1, HW, Cr)    f32
        wr_ref = refs[i]; i += 1     # (Cr, Cout)     bf16
        br_ref = refs[i]; i += 1     # (1, Cout)      f32
    o_ref = refs[i]; i += 1          # (1, HW, Cout)  bf16
    slab_ref = refs[i]               # (3, (H+2)*W, Cin) bf16 scratch

    HW = H * W
    cout = o_ref.shape[-1]

    # Zero the halo rows once per pallas_call; the interior rows [W, W+HW) are
    # fully overwritten every grid step.
    @pl.when(pl.program_id(0) == 0)
    def _():
        slab_ref[...] = jnp.zeros_like(slab_ref)

    # --- GroupNorm + Swish in f32, single bf16 cast ------------------------
    x2 = x_ref[0].astype(jnp.float32)                           # (HW, Cin)
    mean_c, var_c = _group_stats(x2, gmat_ref[...], inv_n)
    y = (x2 - mean_c) * lax.rsqrt(var_c + _EPS) * g_ref[...] + b_ref[...]
    y = y * jax.nn.sigmoid(y)                                   # Swish
    yb = y.astype(jnp.bfloat16)

    # --- write centre plane, derive +/-1 column-shift planes from it -------
    slab_ref[0, pl.ds(W, HW), :] = yb
    yl = slab_ref[0, pl.ds(W - 1, HW), :] * ml_ref[...]         # x[h, w-1]
    yr = slab_ref[0, pl.ds(W + 1, HW), :] * mr_ref[...]         # x[h, w+1]
    slab_ref[1, pl.ds(W, HW), :] = yl
    slab_ref[2, pl.ds(W, HW), :] = yr

    # --- 3x3 conv = 9 contiguous-slice MXU matmuls, f32 accumulation -------
    # TODO(synk): stack the 3 column taps along K when Cin < 256 (v6e/v7x MXU).
    variant = (1, 0, 2)                                         # kj -> plane
    acc = jnp.zeros((HW, cout), jnp.float32)
    for ki in range(3):
        for kj in range(3):
            a = slab_ref[variant[kj], pl.ds(ki * W, HW), :]     # bf16, no cast
            acc = acc + jnp.dot(a, w_ref[ki * 3 + kj],
                                preferred_element_type=jnp.float32)
    acc = acc + bias_ref[...]
    if has_extra:
        acc = acc + extra_ref[0]                                # (1, Cout) bcast
    if has_res:
        xr = xr_ref[0].astype(jnp.bfloat16)                     # (HW, Cr)
        acc = acc + jnp.dot(xr, wr_ref[...],
                            preferred_element_type=jnp.float32) + br_ref[...]
    o_ref[0] = acc.astype(o_ref.dtype)


def _fused_gn_swish_conv3x3(x, gamma, beta, gmat, w9, bias, mask_l, mask_r, *,
                            inv_n, H, W, extra=None, residual=None):
    B, HW, cin = x.shape
    cout = w9.shape[-1]
    has_extra = extra is not None
    has_res = residual is not None

    in_specs = [
        pl.BlockSpec((1, HW, cin), lambda b: (b, 0, 0)),
        pl.BlockSpec((1, cin), lambda b: (0, 0)),
        pl.BlockSpec((1, cin), lambda b: (0, 0)),
        pl.BlockSpec((cin, cin), lambda b: (0, 0)),
        pl.BlockSpec((9, cin, cout), lambda b: (0, 0, 0)),
        pl.BlockSpec((1, cout), lambda b: (0, 0)),
        pl.BlockSpec((HW, 1), lambda b: (0, 0)),
        pl.BlockSpec((HW, 1), lambda b: (0, 0)),
    ]
    args = [x, gamma, beta, gmat, w9, bias, mask_l, mask_r]
    if has_extra:
        in_specs.append(pl.BlockSpec((1, 1, cout), lambda b: (b, 0, 0)))
        args.append(extra.reshape(B, 1, cout))
    if has_res:
        xr, wr, br = residual
        cr = xr.shape[-1]
        in_specs += [
            pl.BlockSpec((1, HW, cr), lambda b: (b, 0, 0)),
            pl.BlockSpec((cr, cout), lambda b: (0, 0)),
            pl.BlockSpec((1, cout), lambda b: (0, 0)),
        ]
        args += [xr, wr, br]

    kernel = functools.partial(_fused_block_kernel, H=H, W=W, inv_n=inv_n,
                               has_extra=has_extra, has_res=has_res)
    return pl.pallas_call(
        kernel,
        out_shape=jax.ShapeDtypeStruct((B, HW, cout), jnp.bfloat16),
        grid=(B,),
        in_specs=in_specs,
        out_specs=pl.BlockSpec((1, HW, cout), lambda b: (b, 0, 0)),
        scratch_shapes=[pltpu.VMEM((3, (H + 2) * W, cin), jnp.bfloat16)],
        compiler_params=pltpu.CompilerParams(
            dimension_semantics=("parallel",),
            vmem_limit_bytes=_VMEM_LIMIT),
    )(*args)


# ---------------------------------------------------------------------------
# Kernel 3: GroupNorm (no Swish) + fused q/k/v 1x1 projection (bias-free)
# ---------------------------------------------------------------------------
def _gn_qkv_kernel(h_ref, g_ref, b_ref, gmat_ref, wqkv_ref,
                   q_ref, k_ref, v_ref, *, inv_n):
    C = q_ref.shape[-1]
    x2 = h_ref[0].astype(jnp.float32)                           # (HW, C)
    mean_c, var_c = _group_stats(x2, gmat_ref[...], inv_n)
    nrm = (x2 - mean_c) * lax.rsqrt(var_c + _EPS) * g_ref[...] + b_ref[...]
    nb = nrm.astype(jnp.bfloat16)
    qkv = jnp.dot(nb, wqkv_ref[...],                            # (HW, 3C), one pass
                  preferred_element_type=jnp.float32).astype(jnp.bfloat16)
    q_ref[0] = qkv[:, :C]
    k_ref[0] = qkv[:, C:2 * C]
    v_ref[0] = qkv[:, 2 * C:]


def _gn_qkv(h, gamma, beta, gmat, wqkv, *, inv_n):
    B, HW, C = h.shape
    seq_spec = pl.BlockSpec((1, HW, C), lambda b: (b, 0, 0))
    vec_spec = pl.BlockSpec((1, C), lambda b: (0, 0))
    out_shape = jax.ShapeDtypeStruct((B, HW, C), jnp.bfloat16)
    return pl.pallas_call(
        functools.partial(_gn_qkv_kernel, inv_n=inv_n),
        out_shape=(out_shape, out_shape, out_shape),
        grid=(B,),
        in_specs=[seq_spec, vec_spec, vec_spec,
                  pl.BlockSpec((C, C), lambda b: (0, 0)),
                  pl.BlockSpec((C, 3 * C), lambda b: (0, 0))],
        out_specs=(seq_spec, seq_spec, seq_spec),
        compiler_params=pltpu.CompilerParams(
            dimension_semantics=("parallel",),
            vmem_limit_bytes=_VMEM_LIMIT),
    )(h, gamma, beta, gmat, wqkv)


# ---------------------------------------------------------------------------
# Kernel 4: flash-style attention + output projection + residual
# (softmax scale is pre-folded into wq, so no per-step scale multiply)
# ---------------------------------------------------------------------------
def _flash_attn_kernel(q_ref, k_ref, v_ref, h_ref, wo_ref, bo_ref, o_ref,
                       m_sc, l_sc, acc_sc):
    kv = pl.program_id(2)

    @pl.when(kv == 0)
    def _():
        m_sc[...] = jnp.full_like(m_sc, -jnp.inf)
        l_sc[...] = jnp.zeros_like(l_sc)
        acc_sc[...] = jnp.zeros_like(acc_sc)

    q = q_ref[0]                                                # (tq, C)  bf16
    k = k_ref[0]                                                # (tkv, C) bf16
    v = v_ref[0]                                                # (tkv, C) bf16

    s = lax.dot_general(q, k, (((1,), (1,)), ((), ())),
                        preferred_element_type=jnp.float32)     # (tq, tkv)
    m_prev = m_sc[...]
    m_new = jnp.maximum(m_prev, jnp.max(s, axis=-1, keepdims=True))
    alpha = jnp.exp(m_prev - m_new)
    p = jnp.exp(s - m_new)
    l_sc[...] = alpha * l_sc[...] + jnp.sum(p, axis=-1, keepdims=True)
    acc_sc[...] = alpha * acc_sc[...] + jnp.dot(p.astype(v.dtype), v,
                                                preferred_element_type=jnp.float32)
    m_sc[...] = m_new

    @pl.when(kv == pl.num_programs(2) - 1)
    def _():
        out = acc_sc[...] * pl.reciprocal(l_sc[...], approx=True)
        proj = jnp.dot(out.astype(jnp.bfloat16), wo_ref[...],
                       preferred_element_type=jnp.float32)
        o_ref[0] = (proj + bo_ref[...] + h_ref[0].astype(jnp.float32)
                    ).astype(o_ref.dtype)


def _flash_attention_outproj(q, k, v, h, wo, bo, *, tq, tkv):
    B, HW, C = h.shape
    grid = (B, HW // tq, HW // tkv)
    return pl.pallas_call(
        _flash_attn_kernel,
        out_shape=jax.ShapeDtypeStruct((B, HW, C), jnp.float32),
        grid=grid,
        in_specs=[
            pl.BlockSpec((1, tq, C), lambda b, qi, ki: (b, qi, 0)),
            pl.BlockSpec((1, tkv, C), lambda b, qi, ki: (b, ki, 0)),
            pl.BlockSpec((1, tkv, C), lambda b, qi, ki: (b, ki, 0)),
            pl.BlockSpec((1, tq, C), lambda b, qi, ki: (b, qi, 0)),
            pl.BlockSpec((C, C), lambda b, qi, ki: (0, 0)),
            pl.BlockSpec((1, C), lambda b, qi, ki: (0, 0)),
        ],
        out_specs=pl.BlockSpec((1, tq, C), lambda b, qi, ki: (b, qi, 0)),
        scratch_shapes=[
            pltpu.VMEM((tq, 1), jnp.float32),
            pltpu.VMEM((tq, 1), jnp.float32),
            pltpu.VMEM((tq, C), jnp.float32),
        ],
        compiler_params=pltpu.CompilerParams(
            dimension_semantics=("parallel", "parallel", "arbitrary"),
            vmem_limit_bytes=_VMEM_LIMIT),
    )(q, k, v, h, wo, bo)


# ---------------------------------------------------------------------------
# Forward pass
# ---------------------------------------------------------------------------
def _pick_tile(n, cap):
    """Largest divisor of n <= cap, preferring mult-of-128 then mult-of-8."""
    if n <= cap:
        return n
    best_any = None
    best_8 = None
    for t in range(cap, 0, -1):
        if n % t:
            continue
        if best_any is None:
            best_any = t
        if t % 128 == 0:
            return t
        if best_8 is None and t % 8 == 0:
            best_8 = t
    if best_8 is not None:
        return best_8
    return best_any if best_any is not None else n


def resnet_block_with_attn(x_nchw, time_emb, prep, *, groups,
                           attn_q_tile=256, attn_kv_tile=512):
    B, cin, H, W = x_nchw.shape
    cout = prep["conv1_w9"].shape[-1]
    HW = H * W

    # one layout pass: NCHW -> (B, HW, C) channel-last rows
    x = jnp.transpose(x_nchw, (0, 2, 3, 1)).reshape(B, HW, cin)

    # image-border column masks for the conv column shifts (hoisted, constant)
    col = (jnp.arange(HW, dtype=jnp.int32) % W)[:, None]
    mask_l = (col != 0).astype(jnp.bfloat16)                    # (HW, 1)
    mask_r = (col != W - 1).astype(jnp.bfloat16)

    # FeatureWiseAffine: tiny (B, emb) @ (emb, cout) Linear -> left to XLA and
    # folded into the conv1 bias epilogue (per-batch bias row).
    noise = time_emb @ prep["nf_w_t"] + prep["nf_b"]            # (B, cout)

    # block1: GN + Swish + conv3x3 + bias + noise  (bf16 output)
    h = _fused_gn_swish_conv3x3(
        x, prep["gn1_w"], prep["gn1_b"], prep["gmat_in"],
        prep["conv1_w9"], prep["conv1_b"], mask_l, mask_r,
        inv_n=1.0 / (HW * (cin // groups)), H=H, W=W, extra=noise)

    # block2: GN + Swish + conv3x3 + bias, fused with res_conv(x) + residual
    h = _fused_gn_swish_conv3x3(
        h, prep["gn2_w"], prep["gn2_b"], prep["gmat_out"],
        prep["conv2_w9"], prep["conv2_b"], mask_l, mask_r,
        inv_n=1.0 / (HW * (cout // groups)), H=H, W=W,
        residual=(x, prep["res_w"], prep["res_b"]))

    # SelfAttention (n_head = 1)
    q, k, v = _gn_qkv(h, prep["agn_w"], prep["agn_b"], prep["gmat_out"],
                      prep["wqkv"], inv_n=1.0 / (HW * (cout // groups)))
    tq = _pick_tile(HW, attn_q_tile)
    tkv = _pick_tile(HW, attn_kv_tile)
    out = _flash_attention_outproj(q, k, v, h, prep["out_w_t"], prep["out_b"],
                                   tq=tq, tkv=tkv)

    return jnp.transpose(out.reshape(B, H, W, cout), (0, 3, 1, 2))  # -> NCHW


# ---------------------------------------------------------------------------
# One-time weight preparation (hoisted out of the per-step path)
# ---------------------------------------------------------------------------
def prepare_params(p, groups):
    bf16 = jnp.bfloat16
    cout = p["conv1_w"].shape[0]
    cin = p["conv1_w"].shape[1]

    def conv9(w):   # (O, I, 3, 3) -> (9, I, O), tap index = ki*3 + kj
        return jnp.transpose(w, (2, 3, 1, 0)).reshape(9, w.shape[1], w.shape[0]).astype(bf16)

    def row(v):
        return v.reshape(1, -1).astype(jnp.float32)

    def gmat(c):    # (C, C) block-diagonal group-aggregation matrix
        gi = jnp.arange(c)[:, None] // (c // groups)
        gj = jnp.arange(c)[None, :] // (c // groups)
        return (gi == gj).astype(jnp.float32)

    qkv_w = p["qkv_w"][:, :, 0, 0]                              # (3C, C)
    scale = 1.0 / math.sqrt(cout)
    wq = qkv_w[:cout].T * scale                                 # fold attn scale into q
    wk = qkv_w[cout:2 * cout].T
    wv = qkv_w[2 * cout:].T
    return {
        "gn1_w": row(p["gn1_w"]), "gn1_b": row(p["gn1_b"]),
        "conv1_w9": conv9(p["conv1_w"]), "conv1_b": row(p["conv1_b"]),
        "nf_w_t": p["nf_w"].T.astype(jnp.float32), "nf_b": p["nf_b"].astype(jnp.float32),
        "gn2_w": row(p["gn2_w"]), "gn2_b": row(p["gn2_b"]),
        "conv2_w9": conv9(p["conv2_w"]), "conv2_b": row(p["conv2_b"]),
        "res_w": p["res_w"][:, :, 0, 0].T.astype(bf16), "res_b": row(p["res_b"]),
        "agn_w": row(p["agn_w"]), "agn_b": row(p["agn_b"]),
        "wqkv": jnp.concatenate([wq, wk, wv], axis=1).astype(bf16),   # (C, 3C)
        "out_w_t": p["out_w"][:, :, 0, 0].T.astype(bf16),
        "out_b": row(p["out_b"]),
        "gmat_in": gmat(cin), "gmat_out": gmat(cout),
    }


# ---------------------------------------------------------------------------
# Pure-JAX reference (mirrors the PyTorch module literally, NCHW, f32)
# ---------------------------------------------------------------------------
def _ref_gn(x, gamma, beta, groups):
    B, C, H, W = x.shape
    xg = x.reshape(B, groups, -1)
    mean = xg.mean(-1, keepdims=True)
    var = ((xg - mean) ** 2).mean(-1, keepdims=True)
    y = ((xg - mean) / jnp.sqrt(var + _EPS)).reshape(B, C, H, W)
    return y * gamma[None, :, None, None] + beta[None, :, None, None]


def _ref_conv(x, w, b, pad):
    y = lax.conv_general_dilated(
        x, w, (1, 1), [(pad, pad), (pad, pad)],
        dimension_numbers=("NCHW", "OIHW", "NCHW"))
    return y + b[None, :, None, None]


def ref_forward(x, temb, p, groups):
    B, _, H, W = x.shape
    swish = lambda t: t * jax.nn.sigmoid(t)
    h = _ref_conv(swish(_ref_gn(x, p["gn1_w"], p["gn1_b"], groups)),
                  p["conv1_w"], p["conv1_b"], 1)
    h = h + (temb @ p["nf_w"].T + p["nf_b"])[:, :, None, None]
    h = _ref_conv(swish(_ref_gn(h, p["gn2_w"], p["gn2_b"], groups)),
                  p["conv2_w"], p["conv2_b"], 1)
    h = h + _ref_conv(x, p["res_w"], p["res_b"], 0)

    cout = h.shape[1]
    norm = _ref_gn(h, p["agn_w"], p["agn_b"], groups)
    qkv = lax.conv_general_dilated(
        norm, p["qkv_w"], (1, 1), [(0, 0), (0, 0)],
        dimension_numbers=("NCHW", "OIHW", "NCHW")).reshape(B, 1, 3 * cout, H, W)
    q, k, v = jnp.split(qkv, 3, axis=2)
    attn = jnp.einsum("bnchw,bncyx->bnhwyx", q, k) / math.sqrt(cout)
    attn = jax.nn.softmax(attn.reshape(B, 1, H, W, -1), axis=-1)
    attn = attn.reshape(B, 1, H, W, H, W)
    out = jnp.einsum("bnhwyx,bncyx->bnchw", attn, v).reshape(B, cout, H, W)
    out = _ref_conv(out, p["out_w"], p["out_b"], 0)
    return out + h


# ---------------------------------------------------------------------------
# Deterministic synthetic parameters (shapes from the module's __init__)
# ---------------------------------------------------------------------------
def init_params(key, cin, cout, emb_dim):
    ks = jax.random.split(key, 16)
    n = lambda k, s, sc=0.2: sc * jax.random.normal(k, s, jnp.float32)
    return {
        "gn1_w": 1.0 + n(ks[0], (cin,), 0.1),   "gn1_b": n(ks[1], (cin,), 0.1),
        "conv1_w": n(ks[2], (cout, cin, 3, 3)), "conv1_b": n(ks[3], (cout,), 0.1),
        "nf_w": n(ks[4], (cout, emb_dim)),      "nf_b": n(ks[5], (cout,), 0.1),
        "gn2_w": 1.0 + n(ks[6], (cout,), 0.1),  "gn2_b": n(ks[7], (cout,), 0.1),
        "conv2_w": n(ks[8], (cout, cout, 3, 3)),"conv2_b": n(ks[9], (cout,), 0.1),
        "res_w": n(ks[10], (cout, cin, 1, 1)),  "res_b": n(ks[11], (cout,), 0.1),
        "agn_w": 1.0 + n(ks[12], (cout,), 0.1), "agn_b": n(ks[13], (cout,), 0.1),
        "qkv_w": n(ks[14], (3 * cout, cout, 1, 1)),
        "out_w": n(ks[15], (cout, cout, 1, 1)),
        "out_b": jnp.zeros((cout,), jnp.float32),
    }


if __name__ == "__main__":
    B, CIN, COUT, H, W = 2, 8, 16, 8, 8
    GROUPS, EMB = 4, 32

    key = jax.random.PRNGKey(0)
    kp, kx, kt = jax.random.split(key, 3)
    params = init_params(kp, CIN, COUT, EMB)
    x = jax.random.normal(kx, (B, CIN, H, W), jnp.float32)       # NCHW, like PyTorch
    time_emb = jax.random.normal(kt, (B, EMB), jnp.float32)

    prep = prepare_params(params, GROUPS)   # weight re-layouts hoisted out of the step
    # small attention tiles so the KV-tiled online-softmax path is exercised
    fwd = jax.jit(functools.partial(resnet_block_with_attn, groups=GROUPS,
                                    attn_q_tile=32, attn_kv_tile=16))
    y = jax.block_until_ready(fwd(x, time_emb, prep))

    y_ref = ref_forward(x, time_emb, params, GROUPS)
    assert y.shape == (B, COUT, H, W)
    err = float(jnp.max(jnp.abs(y - y_ref)))
    ref_mag = float(jnp.max(jnp.abs(y_ref)))
    # bf16 MXU operands + bf16 inter-stage activations + approx reciprocal
    tol = 5e-2 * max(1.0, ref_mag)
    assert err <= tol, f"mismatch vs reference: max abs err {err} (ref max {ref_mag})"
    print("KERNEL_OK")
</pallas_src>

<mosaic_0001>
module attributes {stable_mosaic.version = 11 : i64} {
  func.func @_fused_block_kernel(%arg0: i32, %arg1: memref<1x64x8xf32, #tpu.memory_space<vmem>>, %arg2: memref<1x8xf32, #tpu.memory_space<vmem>>, %arg3: memref<1x8xf32, #tpu.memory_space<vmem>>, %arg4: memref<8x8xf32, #tpu.memory_space<vmem>>, %arg5: memref<9x8x16xbf16, #tpu.memory_space<vmem>>, %arg6: memref<1x16xf32, #tpu.memory_space<vmem>>, %arg7: memref<64x1xbf16, #tpu.memory_space<vmem>>, %arg8: memref<64x1xbf16, #tpu.memory_space<vmem>>, %arg9: memref<1x1x16xf32, #tpu.memory_space<vmem>>, %arg10: memref<1x64x16xbf16, #tpu.memory_space<vmem>>, %arg11: memref<3x80x8xbf16, #tpu.memory_space<vmem>>) attributes {dimension_semantics = [#tpu.dimension_semantics<parallel>], iteration_bounds = array<i64: 2>, scalar_prefetch = 0 : i64, scratch_operands = 1 : i64, tpu.core_type = #tpu.core_type<tc>, window_params = [{transform_indices = @transform_0, window_bounds = array<i64: 1, 64, 8>}, {pipeline_mode = #tpu.pipeline_mode<synchronous>, transform_indices = @transform_1, window_bounds = array<i64: 1, 8>}, {pipeline_mode = #tpu.pipeline_mode<synchronous>, transform_indices = @transform_2, window_bounds = array<i64: 1, 8>}, {pipeline_mode = #tpu.pipeline_mode<synchronous>, transform_indices = @transform_3, window_bounds = array<i64: 8, 8>}, {pipeline_mode = #tpu.pipeline_mode<synchronous>, transform_indices = @transform_4, window_bounds = array<i64: 9, 8, 16>}, {pipeline_mode = #tpu.pipeline_mode<synchronous>, transform_indices = @transform_5, window_bounds = array<i64: 1, 16>}, {pipeline_mode = #tpu.pipeline_mode<synchronous>, transform_indices = @transform_6, window_bounds = array<i64: 64, 1>}, {pipeline_mode = #tpu.pipeline_mode<synchronous>, transform_indices = @transform_7, window_bounds = array<i64: 64, 1>}, {transform_indices = @transform_8, window_bounds = array<i64: 1, 1, 16>}, {transform_indices = @transform_9, window_bounds = array<i64: 1, 64, 16>}]} {
    %c0_i32 = arith.constant 0 : i32
    %0 = arith.cmpi eq, %arg0, %c0_i32 : i32
    %1 = arith.extui %0 : i1 to i32
    %c0_i32_0 = arith.constant 0 : i32
    %2 = arith.cmpi ne, %1, %c0_i32_0 : i32
    scf.if %2 {
      %cst_97 = arith.constant 0.000000e+00 : bf16
      %124 = vector.broadcast %cst_97 : bf16 to vector<3x80x8xbf16>
      %c0_98 = arith.constant 0 : index
      %c0_99 = arith.constant 0 : index
      %c0_100 = arith.constant 0 : index
      %125 = vector.load %arg11[%c0_98, %c0_99, %c0_100] : memref<3x80x8xbf16, #tpu.memory_space<vmem>>, vector<3x80x8xbf16>
      tpu.vector_store %arg11[%c0_98, %c0_99, %c0_100], %124 {strides = array<i32>} : memref<3x80x8xbf16, #tpu.memory_space<vmem>>, vector<3x80x8xbf16>,
    } else {
    }
    %c0 = arith.constant 0 : index
    %c0_1 = arith.constant 0 : index
    %c0_2 = arith.constant 0 : index
    %3 = vector.load %arg1[%c0, %c0_1, %c0_2] : memref<1x64x8xf32, #tpu.memory_space<vmem>>, vector<1x64x8xf32>
    %4 = vector.shape_cast %3 : vector<1x64x8xf32> to vector<64x8xf32>
    %c0_3 = arith.constant 0 : index
    %c0_4 = arith.constant 0 : index
    %5 = vector.load %arg4[%c0_3, %c0_4] : memref<8x8xf32, #tpu.memory_space<vmem>>, vector<8x8xf32>
    %cst = arith.constant dense<0.000000e+00> : vector<8xf32>
    %6 = vector.multi_reduction <add>, %4, %cst [0] : vector<64x8xf32> to vector<8xf32>
    %7 = vector.shape_cast %6 : vector<8xf32> to vector<1x8xf32>
    %8 = arith.mulf %4, %4 : vector<64x8xf32>
    %cst_5 = arith.constant dense<0.000000e+00> : vector<8xf32>
    %9 = vector.multi_reduction <add>, %8, %cst_5 [0] : vector<64x8xf32> to vector<8xf32>
    %10 = vector.shape_cast %9 : vector<8xf32> to vector<1x8xf32>
    %cst_6 = arith.constant dense<0.000000e+00> : vector<1x8xf32>
    %11 = tpu.matmul %7, %5, %cst_6 {dimension_numbers = #tpu.dot_dimension_numbers<[1], [0], [0], [1], [0, 0, 1, 1], [], []>} : vector<1x8xf32>, vector<8x8xf32>, vector<1x8xf32> -> vector<1x8xf32>
    %cst_7 = arith.constant 7.812500e-03 : f32
    %12 = vector.broadcast %cst_7 : f32 to vector<1x8xf32>
    %13 = arith.mulf %11, %12 : vector<1x8xf32>
    %cst_8 = arith.constant dense<0.000000e+00> : vector<1x8xf32>
    %14 = tpu.matmul %10, %5, %cst_8 {dimension_numbers = #tpu.dot_dimension_numbers<[1], [0], [0], [1], [0, 0, 1, 1], [], []>} : vector<1x8xf32>, vector<8x8xf32>, vector<1x8xf32> -> vector<1x8xf32>
    %cst_9 = arith.constant 7.812500e-03 : f32
    %15 = vector.broadcast %cst_9 : f32 to vector<1x8xf32>
    %16 = arith.mulf %14, %15 : vector<1x8xf32>
    %17 = arith.mulf %13, %13 : vector<1x8xf32>
    %18 = arith.subf %16, %17 : vector<1x8xf32>
    %19 = vector.broadcast %13 : vector<1x8xf32> to vector<64x8xf32>
    %20 = arith.subf %4, %19 : vector<64x8xf32>
    %cst_10 = arith.constant 9.99999974E-6 : f32
    %21 = vector.broadcast %cst_10 : f32 to vector<1x8xf32>
    %22 = arith.addf %18, %21 : vector<1x8xf32>
    %23 = math.rsqrt %22 : vector<1x8xf32>
    %24 = vector.broadcast %23 : vector<1x8xf32> to vector<64x8xf32>
    %25 = arith.mulf %20, %24 : vector<64x8xf32>
    %c0_11 = arith.constant 0 : index
    %c0_12 = arith.constant 0 : index
    %26 = vector.load %arg2[%c0_11, %c0_12] : memref<1x8xf32, #tpu.memory_space<vmem>>, vector<1x8xf32>
    %27 = vector.broadcast %26 : vector<1x8xf32> to vector<64x8xf32>
    %28 = arith.mulf %25, %27 : vector<64x8xf32>
    %c0_13 = arith.constant 0 : index
    %c0_14 = arith.constant 0 : index
    %29 = vector.load %arg3[%c0_13, %c0_14] : memref<1x8xf32, #tpu.memory_space<vmem>>, vector<1x8xf32>
    %30 = vector.broadcast %29 : vector<1x8xf32> to vector<64x8xf32>
    %31 = arith.addf %28, %30 : vector<64x8xf32>
    %32 = arith.negf %31 : vector<64x8xf32>
    %33 = math.exp %32 : vector<64x8xf32>
    %cst_15 = arith.constant 1.000000e+00 : f32
    %34 = vector.broadcast %cst_15 : f32 to vector<64x8xf32>
    %35 = arith.addf %34, %33 : vector<64x8xf32>
    %36 = arith.divf %34, %35 : vector<64x8xf32>
    %37 = arith.mulf %31, %36 : vector<64x8xf32>
    %38 = arith.truncf %37 : vector<64x8xf32> to vector<64x8xbf16>
    %c0_16 = arith.constant 0 : index
    %c8 = arith.constant 8 : index
    %c0_17 = arith.constant 0 : index
    %39 = vector.load %arg11[%c0_16, %c8, %c0_17] : memref<3x80x8xbf16, #tpu.memory_space<vmem>>, vector<1x64x8xbf16>
    %40 = vector.shape_cast %39 : vector<1x64x8xbf16> to vector<64x8xbf16>
    %41 = vector.shape_cast %38 : vector<64x8xbf16> to vector<1x64x8xbf16>
    tpu.vector_store %arg11[%c0_16, %c8, %c0_17], %41 {strides = array<i32>} : memref<3x80x8xbf16, #tpu.memory_space<vmem>>, vector<1x64x8xbf16>,
    %c0_18 = arith.constant 0 : index
    %c7 = arith.constant 7 : index
    %c0_19 = arith.constant 0 : index
    %42 = vector.load %arg11[%c0_18, %c7, %c0_19] : memref<3x80x8xbf16, #tpu.memory_space<vmem>>, vector<1x64x8xbf16>
    %43 = vector.shape_cast %42 : vector<1x64x8xbf16> to vector<64x8xbf16>
    %c0_20 = arith.constant 0 : index
    %c0_21 = arith.constant 0 : index
    %44 = vector.load %arg7[%c0_20, %c0_21] : memref<64x1xbf16, #tpu.memory_space<vmem>>, vector<64x1xbf16>
    %45 = vector.broadcast %44 : vector<64x1xbf16> to vector<64x8xbf16>
    %46 = arith.mulf %43, %45 : vector<64x8xbf16>
    %c0_22 = arith.constant 0 : index
    %c9 = arith.constant 9 : index
    %c0_23 = arith.constant 0 : index
    %47 = vector.load %arg11[%c0_22, %c9, %c0_23] : memref<3x80x8xbf16, #tpu.memory_space<vmem>>, vector<1x64x8xbf16>
    %48 = vector.shape_cast %47 : vector<1x64x8xbf16> to vector<64x8xbf16>
    %c0_24 = arith.constant 0 : index
    %c0_25 = arith.constant 0 : index
    %49 = vector.load %arg8[%c0_24, %c0_25] : memref<64x1xbf16, #tpu.memory_space<vmem>>, vector<64x1xbf16>
    %50 = vector.broadcast %49 : vector<64x1xbf16> to vector<64x8xbf16>
    %51 = arith.mulf %48, %50 : vector<64x8xbf16>
    %c1 = arith.constant 1 : index
    %c8_26 = arith.constant 8 : index
    %c0_27 = arith.constant 0 : index
    %52 = vector.load %arg11[%c1, %c8_26, %c0_27] : memref<3x80x8xbf16, #tpu.memory_space<vmem>>, vector<1x64x8xbf16>
    %53 = vector.shape_cast %52 : vector<1x64x8xbf16> to vector<64x8xbf16>
    %54 = vector.shape_cast %46 : vector<64x8xbf16> to vector<1x64x8xbf16>
    tpu.vector_store %arg11[%c1, %c8_26, %c0_27], %54 {strides = array<i32>} : memref<3x80x8xbf16, #tpu.memory_space<vmem>>, vector<1x64x8xbf16>,
    %c2 = arith.constant 2 : index
    %c8_28 = arith.constant 8 : index
    %c0_29 = arith.constant 0 : index
    %55 = vector.load %arg11[%c2, %c8_28, %c0_29] : memref<3x80x8xbf16, #tpu.memory_space<vmem>>, vector<1x64x8xbf16>
    %56 = vector.shape_cast %55 : vector<1x64x8xbf16> to vector<64x8xbf16>
    %57 = vector.shape_cast %51 : vector<64x8xbf16> to vector<1x64x8xbf16>
    tpu.vector_store %arg11[%c2, %c8_28, %c0_29], %57 {strides = array<i32>} : memref<3x80x8xbf16, #tpu.memory_space<vmem>>, vector<1x64x8xbf16>,
    %cst_30 = arith.constant 0.000000e+00 : f32
    %58 = vector.broadcast %cst_30 : f32 to vector<64x16xf32>
    %c1_31 = arith.constant 1 : index
    %c0_32 = arith.constant 0 : index
    %c0_33 = arith.constant 0 : index
    %59 = vector.load %arg11[%c1_31, %c0_32, %c0_33] : memref<3x80x8xbf16, #tpu.memory_space<vmem>>, vector<1x64x8xbf16>
    %60 = vector.shape_cast %59 : vector<1x64x8xbf16> to vector<64x8xbf16>
    %c0_34 = arith.constant 0 : index
    %c0_35 = arith.constant 0 : index
    %c0_36 = arith.constant 0 : index
    %61 = vector.load %arg5[%c0_34, %c0_35, %c0_36] : memref<9x8x16xbf16, #tpu.memory_space<vmem>>, vector<1x8x16xbf16>
    %62 = vector.shape_cast %61 : vector<1x8x16xbf16> to vector<8x16xbf16>
    %cst_37 = arith.constant dense<0.000000e+00> : vector<64x16xf32>
    %63 = tpu.matmul %60, %62, %cst_37 {dimension_numbers = #tpu.dot_dimension_numbers<[1], [0], [0], [1], [0, 0, 1, 1], [], []>} : vector<64x8xbf16>, vector<8x16xbf16>, vector<64x16xf32> -> vector<64x16xf32>
    %64 = arith.addf %58, %63 : vector<64x16xf32>
    %c0_38 = arith.constant 0 : index
    %c0_39 = arith.constant 0 : index
    %c0_40 = arith.constant 0 : index
    %65 = vector.load %arg11[%c0_38, %c0_39, %c0_40] : memref<3x80x8xbf16, #tpu.memory_space<vmem>>, vector<1x64x8xbf16>
    %66 = vector.shape_cast %65 : vector<1x64x8xbf16> to vector<64x8xbf16>
    %c1_41 = arith.constant 1 : index
    %c0_42 = arith.constant 0 : index
    %c0_43 = arith.constant 0 : index
    %67 = vector.load %arg5[%c1_41, %c0_42, %c0_43] : memref<9x8x16xbf16, #tpu.memory_space<vmem>>, vector<1x8x16xbf16>
    %68 = vector.shape_cast %67 : vector<1x8x16xbf16> to vector<8x16xbf16>
    %cst_44 = arith.constant dense<0.000000e+00> : vector<64x16xf32>
    %69 = tpu.matmul %66, %68, %cst_44 {dimension_numbers = #tpu.dot_dimension_numbers<[1], [0], [0], [1], [0, 0, 1, 1], [], []>} : vector<64x8xbf16>, vector<8x16xbf16>, vector<64x16xf32> -> vector<64x16xf32>
    %70 = arith.addf %64, %69 : vector<64x16xf32>
    %c2_45 = arith.constant 2 : index
    %c0_46 = arith.constant 0 : index
    %c0_47 = arith.constant 0 : index
    %71 = vector.load %arg11[%c2_45, %c0_46, %c0_47] : memref<3x80x8xbf16, #tpu.memory_space<vmem>>, vector<1x64x8xbf16>
    %72 = vector.shape_cast %71 : vector<1x64x8xbf16> to vector<64x8xbf16>
    %c2_48 = arith.constant 2 : index
    %c0_49 = arith.constant 0 : index
    %c0_50 = arith.constant 0 : index
    %73 = vector.load %arg5[%c2_48, %c0_49, %c0_50] : memref<9x8x16xbf16, #tpu.memory_space<vmem>>, vector<1x8x16xbf16>
    %74 = vector.shape_cast %73 : vector<1x8x16xbf16> to vector<8x16xbf16>
    %cst_51 = arith.constant dense<0.000000e+00> : vector<64x16xf32>
    %75 = tpu.matmul %72, %74, %cst_51 {dimension_numbers = #tpu.dot_dimension_numbers<[1], [0], [0], [1], [0, 0, 1, 1], [], []>} : vector<64x8xbf16>, vector<8x16xbf16>, vector<64x16xf32> -> vector<64x16xf32>
    %76 = arith.addf %70, %75 : vector<64x16xf32>
    %c1_52 = arith.constant 1 : index
    %c8_53 = arith.constant 8 : index
    %c0_54 = arith.constant 0 : index
    %77 = vector.load %arg11[%c1_52, %c8_53, %c0_54] : memref<3x80x8xbf16, #tpu.memory_space<vmem>>, vector<1x64x8xbf16>
    %78 = vector.shape_cast %77 : vector<1x64x8xbf16> to vector<64x8xbf16>
    %c3 = arith.constant 3 : index
    %c0_55 = arith.constant 0 : index
    %c0_56 = arith.constant 0 : index
    %79 = vector.load %arg5[%c3, %c0_55, %c0_56] : memref<9x8x16xbf16, #tpu.memory_space<vmem>>, vector<1x8x16xbf16>
    %80 = vector.shape_cast %79 : vector<1x8x16xbf16> to vector<8x16xbf16>
    %cst_57 = arith.constant dense<0.000000e+00> : vector<64x16xf32>
    %81 = tpu.matmul %78, %80, %cst_57 {dimension_numbers = #tpu.dot_dimension_numbers<[1], [0], [0], [1], [0, 0, 1, 1], [], []>} : vector<64x8xbf16>, vector<8x16xbf16>, vector<64x16xf32> -> vector<64x16xf32>
    %82 = arith.addf %76, %81 : vector<64x16xf32>
    %c0_58 = arith.constant 0 : index
    %c8_59 = arith.constant 8 : index
    %c0_60 = arith.constant 0 : index
    %83 = vector.load %arg11[%c0_58, %c8_59, %c0_60] : memref<3x80x8xbf16, #tpu.memory_space<vmem>>, vector<1x64x8xbf16>
    %84 = vector.shape_cast %83 : vector<1x64x8xbf16> to vector<64x8xbf16>
    %c4 = arith.constant 4 : index
    %c0_61 = arith.constant 0 : index
    %c0_62 = arith.constant 0 : index
    %85 = vector.load %arg5[%c4, %c0_61, %c0_62] : memref<9x8x16xbf16, #tpu.memory_space<vmem>>, vector<1x8x16xbf16>
    %86 = vector.shape_cast %85 : vector<1x8x16xbf16> to vector<8x16xbf16>
    %cst_63 = arith.constant dense<0.000000e+00> : vector<64x16xf32>
    %87 = tpu.matmul %84, %86, %cst_63 {dimension_numbers = #tpu.dot_dimension_numbers<[1], [0], [0], [1], [0, 0, 1, 1], [], []>} : vector<64x8xbf16>, vector<8x16xbf16>, vector<64x16xf32> -> vector<64x16xf32>
    %88 = arith.addf %82, %87 : vector<64x16xf32>
    %c2_64 = arith.constant 2 : index
    %c8_65 = arith.constant 8 : index
    %c0_66 = arith.constant 0 : index
    %89 = vector.load %arg11[%c2_64, %c8_65, %c0_66] : memref<3x80x8xbf16, #tpu.memory_space<vmem>>, vector<1x64x8xbf16>
    %90 = vector.shape_cast %89 : vector<1x64x8xbf16> to vector<64x8xbf16>
    %c5 = arith.constant 5 : index
    %c0_67 = arith.constant 0 : index
    %c0_68 = arith.constant 0 : index
    %91 = vector.load %arg5[%c5, %c0_67, %c0_68] : memref<9x8x16xbf16, #tpu.memory_space<vmem>>, vector<1x8x16xbf16>
    %92 = vector.shape_cast %91 : vector<1x8x16xbf16> to vector<8x16xbf16>
    %cst_69 = arith.constant dense<0.000000e+00> : vector<64x16xf32>
    %93 = tpu.matmul %90, %92, %cst_69 {dimension_numbers = #tpu.dot_dimension_numbers<[1], [0], [0], [1], [0, 0, 1, 1], [], []>} : vector<64x8xbf16>, vector<8x16xbf16>, vector<64x16xf32> -> vector<64x16xf32>
    %94 = arith.addf %88, %93 : vector<64x16xf32>
    %c1_70 = arith.constant 1 : index
    %c16 = arith.constant 16 : index
    %c0_71 = arith.constant 0 : index
    %95 = vector.load %arg11[%c1_70, %c16, %c0_71] : memref<3x80x8xbf16, #tpu.memory_space<vmem>>, vector<1x64x8xbf16>
    %96 = vector.shape_cast %95 : vector<1x64x8xbf16> to vector<64x8xbf16>
    %c6 = arith.constant 6 : index
    %c0_72 = arith.constant 0 : index
    %c0_73 = arith.constant 0 : index
    %97 = vector.load %arg5[%c6, %c0_72, %c0_73] : memref<9x8x16xbf16, #tpu.memory_space<vmem>>, vector<1x8x16xbf16>
    %98 = vector.shape_cast %97 : vector<1x8x16xbf16> to vector<8x16xbf16>
    %cst_74 = arith.constant dense<0.000000e+00> : vector<64x16xf32>
    %99 = tpu.matmul %96, %98, %cst_74 {dimension_numbers = #tpu.dot_dimension_numbers<[1], [0], [0], [1], [0, 0, 1, 1], [], []>} : vector<64x8xbf16>, vector<8x16xbf16>, vector<64x16xf32> -> vector<64x16xf32>
    %100 = arith.addf %94, %99 : vector<64x16xf32>
    %c0_75 = arith.constant 0 : index
    %c16_76 = arith.constant 16 : index
    %c0_77 = arith.constant 0 : index
    %101 = vector.load %arg11[%c0_75, %c16_76, %c0_77] : memref<3x80x8xbf16, #tpu.memory_space<vmem>>, vector<1x64x8xbf16>
    %102 = vector.shape_cast %101 : vector<1x64x8xbf16> to vector<64x8xbf16>
    %c7_78 = arith.constant 7 : index
    %c0_79 = arith.constant 0 : index
    %c0_80 = arith.constant 0 : index
    %103 = vector.load %arg5[%c7_78, %c0_79, %c0_80] : memref<9x8x16xbf16, #tpu.memory_space<vmem>>, vector<1x8x16xbf16>
    %104 = vector.shape_cast %103 : vector<1x8x16xbf16> to vector<8x16xbf16>
    %cst_81 = arith.constant dense<0.000000e+00> : vector<64x16xf32>
    %105 = tpu.matmul %102, %104, %cst_81 {dimension_numbers = #tpu.dot_dimension_numbers<[1], [0], [0], [1], [0, 0, 1, 1], [], []>} : vector<64x8xbf16>, vector<8x16xbf16>, vector<64x16xf32> -> vector<64x16xf32>
    %106 = arith.addf %100, %105 : vector<64x16xf32>
    %c2_82 = arith.constant 2 : index
    %c16_83 = arith.constant 16 : index
    %c0_84 = arith.constant 0 : index
    %107 = vector.load %arg11[%c2_82, %c16_83, %c0_84] : memref<3x80x8xbf16, #tpu.memory_space<vmem>>, vector<1x64x8xbf16>
    %108 = vector.shape_cast %107 : vector<1x64x8xbf16> to vector<64x8xbf16>
    %c8_85 = arith.constant 8 : index
    %c0_86 = arith.constant 0 : index
    %c0_87 = arith.constant 0 : index
    %109 = vector.load %arg5[%c8_85, %c0_86, %c0_87] : memref<9x8x16xbf16, #tpu.memory_space<vmem>>, vector<1x8x16xbf16>
    %110 = vector.shape_cast %109 : vector<1x8x16xbf16> to vector<8x16xbf16>
    %cst_88 = arith.constant dense<0.000000e+00> : vector<64x16xf32>
    %111 = tpu.matmul %108, %110, %cst_88 {dimension_numbers = #tpu.dot_dimension_numbers<[1], [0], [0], [1], [0, 0, 1, 1], [], []>} : vector<64x8xbf16>, vector<8x16xbf16>, vector<64x16xf32> -> vector<64x16xf32>
    %112 = arith.addf %106, %111 : vector<64x16xf32>
    %c0_89 = arith.constant 0 : index
    %c0_90 = arith.constant 0 : index
    %113 = vector.load %arg6[%c0_89, %c0_90] : memref<1x16xf32, #tpu.memory_space<vmem>>, vector<1x16xf32>
    %114 = vector.broadcast %113 : vector<1x16xf32> to vector<64x16xf32>
    %115 = arith.addf %112, %114 : vector<64x16xf32>
    %c0_91 = arith.constant 0 : index
    %c0_92 = arith.constant 0 : index
    %c0_93 = arith.constant 0 : index
    %116 = vector.load %arg9[%c0_91, %c0_92, %c0_93] : memref<1x1x16xf32, #tpu.memory_space<vmem>>, vector<1x1x16xf32>
    %117 = vector.shape_cast %116 : vector<1x1x16xf32> to vector<1x16xf32>
    %118 = vector.broadcast %117 : vector<1x16xf32> to vector<64x16xf32>
    %119 = arith.addf %115, %118 : vector<64x16xf32>
    %120 = arith.truncf %119 : vector<64x16xf32> to vector<64x16xbf16>
    %c0_94 = arith.constant 0 : index
    %c0_95 = arith.constant 0 : index
    %c0_96 = arith.constant 0 : index
    %121 = vector.load %arg10[%c0_94, %c0_95, %c0_96] : memref<1x64x16xbf16, #tpu.memory_space<vmem>>, vector<1x64x16xbf16>
    %122 = vector.shape_cast %121 : vector<1x64x16xbf16> to vector<64x16xbf16>
    %123 = vector.shape_cast %120 : vector<64x16xbf16> to vector<1x64x16xbf16>
    tpu.vector_store %arg10[%c0_94, %c0_95, %c0_96], %123 {strides = array<i32>} : memref<1x64x16xbf16, #tpu.memory_space<vmem>>, vector<1x64x16xbf16>,
    return
  }
  func.func @transform_0(%arg0: i32) -> (i32, i32, i32) {
    %c0_i32 = arith.constant 0 : i32
    %c0_i32_0 = arith.constant 0 : i32
    %c0_i32_1 = arith.constant 0 : i32
    return %arg0, %c0_i32, %c0_i32_0 : i32, i32, i32
  }
  func.func @transform_1(%arg0: i32) -> (i32, i32) {
    %c0_i32 = arith.constant 0 : i32
    %c0_i32_0 = arith.constant 0 : i32
    %c0_i32_1 = arith.constant 0 : i32
    return %c0_i32, %c0_i32_0 : i32, i32
  }
  func.func @transform_2(%arg0: i32) -> (i32, i32) {
    %c0_i32 = arith.constant 0 : i32
    %c0_i32_0 = arith.constant 0 : i32
    %c0_i32_1 = arith.constant 0 : i32
    return %c0_i32, %c0_i32_0 : i32, i32
  }
  func.func @transform_3(%arg0: i32) -> (i32, i32) {
    %c0_i32 = arith.constant 0 : i32
    %c0_i32_0 = arith.constant 0 : i32
    %c0_i32_1 = arith.constant 0 : i32
    return %c0_i32, %c0_i32_0 : i32, i32
  }
  func.func @transform_4(%arg0: i32) -> (i32, i32, i32) {
    %c0_i32 = arith.constant 0 : i32
    %c0_i32_0 = arith.constant 0 : i32
    %c0_i32_1 = arith.constant 0 : i32
    %c0_i32_2 = arith.constant 0 : i32
    return %c0_i32, %c0_i32_0, %c0_i32_1 : i32, i32, i32
  }
  func.func @transform_5(%arg0: i32) -> (i32, i32) {
    %c0_i32 = arith.constant 0 : i32
    %c0_i32_0 = arith.constant 0 : i32
    %c0_i32_1 = arith.constant 0 : i32
    return %c0_i32, %c0_i32_0 : i32, i32
  }
  func.func @transform_6(%arg0: i32) -> (i32, i32) {
    %c0_i32 = arith.constant 0 : i32
    %c0_i32_0 = arith.constant 0 : i32
    %c0_i32_1 = arith.constant 0 : i32
    return %c0_i32, %c0_i32_0 : i32, i32
  }
  func.func @transform_7(%arg0: i32) -> (i32, i32) {
    %c0_i32 = arith.constant 0 : i32
    %c0_i32_0 = arith.constant 0 : i32
    %c0_i32_1 = arith.constant 0 : i32
    return %c0_i32, %c0_i32_0 : i32, i32
  }
  func.func @transform_8(%arg0: i32) -> (i32, i32, i32) {
    %c0_i32 = arith.constant 0 : i32
    %c0_i32_0 = arith.constant 0 : i32
    %c0_i32_1 = arith.constant 0 : i32
    return %arg0, %c0_i32, %c0_i32_0 : i32, i32, i32
  }
  func.func @transform_9(%arg0: i32) -> (i32, i32, i32) {
    %c0_i32 = arith.constant 0 : i32
    %c0_i32_0 = arith.constant 0 : i32
    %c0_i32_1 = arith.constant 0 : i32
    return %arg0, %c0_i32, %c0_i32_0 : i32, i32, i32
  }
}

module attributes {stable_mosaic.version = 11 : i64} {
  func.func @_flash_attn_kernel(%arg0: i32, %arg1: i32, %arg2: i32, %arg3: memref<1x32x16xbf16, #tpu.memory_space<vmem>>, %arg4: memref<1x16x16xbf16, #tpu.memory_space<vmem>>, %arg5: memref<1x16x16xbf16, #tpu.memory_space<vmem>>, %arg6: memref<1x32x16xbf16, #tpu.memory_space<vmem>>, %arg7: memref<16x16xbf16, #tpu.memory_space<vmem>>, %arg8: memref<1x16xf32, #tpu.memory_space<vmem>>, %arg9: memref<1x32x16xf32, #tpu.memory_space<vmem>>, %arg10: memref<32x1xf32, #tpu.memory_space<vmem>>, %arg11: memref<32x1xf32, #tpu.memory_space<vmem>>, %arg12: memref<32x16xf32, #tpu.memory_space<vmem>>) attributes {dimension_semantics = [#tpu.dimension_semantics<parallel>, #tpu.dimension_semantics<parallel>, #tpu.dimension_semantics<arbitrary>], iteration_bounds = array<i64: 2, 2, 4>, scalar_prefetch = 0 : i64, scratch_operands = 3 : i64, tpu.core_type = #tpu.core_type<tc>, window_params = [{transform_indices = @transform_0, window_bounds = array<i64: 1, 32, 16>}, {transform_indices = @transform_1, window_bounds = array<i64: 1, 16, 16>}, {transform_indices = @transform_2, window_bounds = array<i64: 1, 16, 16>}, {transform_indices = @transform_3, window_bounds = array<i64: 1, 32, 16>}, {pipeline_mode = #tpu.pipeline_mode<synchronous>, transform_indices = @transform_4, window_bounds = array<i64: 16, 16>}, {pipeline_mode = #tpu.pipeline_mode<synchronous>, transform_indices = @transform_5, window_bounds = array<i64: 1, 16>}, {transform_indices = @transform_6, window_bounds = array<i64: 1, 32, 16>}]} {
    %c0_i32 = arith.constant 0 : i32
    %0 = arith.cmpi eq, %arg2, %c0_i32 : i32
    %1 = arith.extui %0 : i1 to i32
    %c0_i32_0 = arith.constant 0 : i32
    %2 = arith.cmpi ne, %1, %c0_i32_0 : i32
    scf.if %2 {
      %cst_25 = arith.constant 0xFF800000 : f32
      %36 = vector.broadcast %cst_25 : f32 to vector<32x1xf32>
      %c0_26 = arith.constant 0 : index
      %c0_27 = arith.constant 0 : index
      %37 = vector.load %arg10[%c0_26, %c0_27] : memref<32x1xf32, #tpu.memory_space<vmem>>, vector<32x1xf32>
      tpu.vector_store %arg10[%c0_26, %c0_27], %36 {strides = array<i32>} : memref<32x1xf32, #tpu.memory_space<vmem>>, vector<32x1xf32>,
      %cst_28 = arith.constant 0.000000e+00 : f32
      %38 = vector.broadcast %cst_28 : f32 to vector<32x1xf32>
      %c0_29 = arith.constant 0 : index
      %c0_30 = arith.constant 0 : index
      %39 = vector.load %arg11[%c0_29, %c0_30] : memref<32x1xf32, #tpu.memory_space<vmem>>, vector<32x1xf32>
      tpu.vector_store %arg11[%c0_29, %c0_30], %38 {strides = array<i32>} : memref<32x1xf32, #tpu.memory_space<vmem>>, vector<32x1xf32>,
      %cst_31 = arith.constant 0.000000e+00 : f32
      %40 = vector.broadcast %cst_31 : f32 to vector<32x16xf32>
      %c0_32 = arith.constant 0 : index
      %c0_33 = arith.constant 0 : index
      %41 = vector.load %arg12[%c0_32, %c0_33] : memref<32x16xf32, #tpu.memory_space<vmem>>, vector<32x16xf32>
      tpu.vector_store %arg12[%c0_32, %c0_33], %40 {strides = array<i32>} : memref<32x16xf32, #tpu.memory_space<vmem>>, vector<32x16xf32>,
    } else {
    }
    %c0 = arith.constant 0 : index
    %c0_1 = arith.constant 0 : index
    %c0_2 = arith.constant 0 : index
    %3 = vector.load %arg3[%c0, %c0_1, %c0_2] : memref<1x32x16xbf16, #tpu.memory_space<vmem>>, vector<1x32x16xbf16>
    %4 = vector.shape_cast %3 : vector<1x32x16xbf16> to vector<32x16xbf16>
    %c0_3 = arith.constant 0 : index
    %c0_4 = arith.constant 0 : index
    %c0_5 = arith.constant 0 : index
    %5 = vector.load %arg4[%c0_3, %c0_4, %c0_5] : memref<1x16x16xbf16, #tpu.memory_space<vmem>>, vector<1x16x16xbf16>
    %6 = vector.shape_cast %5 : vector<1x16x16xbf16> to vector<16x16xbf16>
    %c0_6 = arith.constant 0 : index
    %c0_7 = arith.constant 0 : index
    %c0_8 = arith.constant 0 : index
    %7 = vector.load %arg5[%c0_6, %c0_7, %c0_8] : memref<1x16x16xbf16, #tpu.memory_space<vmem>>, vector<1x16x16xbf16>
    %8 = vector.shape_cast %7 : vector<1x16x16xbf16> to vector<16x16xbf16>
    %cst = arith.constant dense<0.000000e+00> : vector<32x16xf32>
    %9 = tpu.matmul %4, %6, %cst {dimension_numbers = #tpu.dot_dimension_numbers<[1], [1], [0], [0], [0, 0, 1, 0], [], []>} : vector<32x16xbf16>, vector<16x16xbf16>, vector<32x16xf32> -> vector<32x16xf32>
    %c0_9 = arith.constant 0 : index
    %c0_10 = arith.constant 0 : index
    %10 = vector.load %arg10[%c0_9, %c0_10] : memref<32x1xf32, #tpu.memory_space<vmem>>, vector<32x1xf32>
    %cst_11 = arith.constant dense<0xFF800000> : vector<32xf32>
    %11 = vector.multi_reduction <maximumf>, %9, %cst_11 [1] : vector<32x16xf32> to vector<32xf32>
    %12 = vector.shape_cast %11 : vector<32xf32> to vector<32x1xf32>
    %13 = arith.maximumf %10, %12 : vector<32x1xf32>
    %14 = arith.subf %10, %13 : vector<32x1xf32>
    %15 = math.exp %14 : vector<32x1xf32>
    %16 = vector.broadcast %13 : vector<32x1xf32> to vector<32x16xf32>
    %17 = arith.subf %9, %16 : vector<32x16xf32>
    %18 = math.exp %17 : vector<32x16xf32>
    %c0_12 = arith.constant 0 : index
    %c0_13 = arith.constant 0 : index
    %19 = vector.load %arg11[%c0_12, %c0_13] : memref<32x1xf32, #tpu.memory_space<vmem>>, vector<32x1xf32>
    %20 = arith.mulf %15, %19 : vector<32x1xf32>
    %cst_14 = arith.constant dense<0.000000e+00> : vector<32xf32>
    %21 = vector.multi_reduction <add>, %18, %cst_14 [1] : vector<32x16xf32> to vector<32xf32>
    %22 = vector.shape_cast %21 : vector<32xf32> to vector<32x1xf32>
    %23 = arith.addf %20, %22 : vector<32x1xf32>
    %c0_15 = arith.constant 0 : index
    %c0_16 = arith.constant 0 : index
    %24 = vector.load %arg11[%c0_15, %c0_16] : memref<32x1xf32, #tpu.memory_space<vmem>>, vector<32x1xf32>
    tpu.vector_store %arg11[%c0_15, %c0_16], %23 {strides = array<i32>} : memref<32x1xf32, #tpu.memory_space<vmem>>, vector<32x1xf32>,
    %c0_17 = arith.constant 0 : index
    %c0_18 = arith.constant 0 : index
    %25 = vector.load %arg12[%c0_17, %c0_18] : memref<32x16xf32, #tpu.memory_space<vmem>>, vector<32x16xf32>
    %26 = vector.broadcast %15 : vector<32x1xf32> to vector<32x16xf32>
    %27 = arith.mulf %26, %25 : vector<32x16xf32>
    %28 = arith.truncf %18 : vector<32x16xf32> to vector<32x16xbf16>
    %cst_19 = arith.constant dense<0.000000e+00> : vector<32x16xf32>
    %29 = tpu.matmul %28, %8, %cst_19 {dimension_numbers = #tpu.dot_dimension_numbers<[1], [0], [0], [1], [0, 0, 1, 1], [], []>} : vector<32x16xbf16>, vector<16x16xbf16>, vector<32x16xf32> -> vector<32x16xf32>
    %30 = arith.addf %27, %29 : vector<32x16xf32>
    %c0_20 = arith.constant 0 : index
    %c0_21 = arith.constant 0 : index
    %31 = vector.load %arg12[%c0_20, %c0_21] : memref<32x16xf32, #tpu.memory_space<vmem>>, vector<32x16xf32>
    tpu.vector_store %arg12[%c0_20, %c0_21], %30 {strides = array<i32>} : memref<32x16xf32, #tpu.memory_space<vmem>>, vector<32x16xf32>,
    %c0_22 = arith.constant 0 : index
    %c0_23 = arith.constant 0 : index
    %32 = vector.load %arg10[%c0_22, %c0_23] : memref<32x1xf32, #tpu.memory_space<vmem>>, vector<32x1xf32>
    tpu.vector_store %arg10[%c0_22, %c0_23], %13 {strides = array<i32>} : memref<32x1xf32, #tpu.memory_space<vmem>>, vector<32x1xf32>,
    %c3_i32 = arith.constant 3 : i32
    %33 = arith.cmpi eq, %arg2, %c3_i32 : i32
    %34 = arith.extui %33 : i1 to i32
    %c0_i32_24 = arith.constant 0 : i32
    %35 = arith.cmpi ne, %34, %c0_i32_24 : i32
    scf.if %35 {
      %c0_25 = arith.constant 0 : index
      %c0_26 = arith.constant 0 : index
      %36 = vector.load %arg12[%c0_25, %c0_26] : memref<32x16xf32, #tpu.memory_space<vmem>>, vector<32x16xf32>
      %c0_27 = arith.constant 0 : index
      %c0_28 = arith.constant 0 : index
      %37 = vector.load %arg11[%c0_27, %c0_28] : memref<32x1xf32, #tpu.memory_space<vmem>>, vector<32x1xf32>
      %38 = tpu.reciprocal %37 {approx = true} : vector<32x1xf32> -> vector<32x1xf32>
      %39 = vector.broadcast %38 : vector<32x1xf32> to vector<32x16xf32>
      %40 = arith.mulf %36, %39 : vector<32x16xf32>
      %41 = arith.truncf %40 : vector<32x16xf32> to vector<32x16xbf16>
      %c0_29 = arith.constant 0 : index
      %c0_30 = arith.constant 0 : index
      %42 = vector.load %arg7[%c0_29, %c0_30] : memref<16x16xbf16, #tpu.memory_space<vmem>>, vector<16x16xbf16>
      %cst_31 = arith.constant dense<0.000000e+00> : vector<32x16xf32>
      %43 = tpu.matmul %41, %42, %cst_31 {dimension_numbers = #tpu.dot_dimension_numbers<[1], [0], [0], [1], [0, 0, 1, 1], [], []>} : vector<32x16xbf16>, vector<16x16xbf16>, vector<32x16xf32> -> vector<32x16xf32>
      %c0_32 = arith.constant 0 : index
      %c0_33 = arith.constant 0 : index
      %44 = vector.load %arg8[%c0_32, %c0_33] : memref<1x16xf32, #tpu.memory_space<vmem>>, vector<1x16xf32>
      %45 = vector.broadcast %44 : vector<1x16xf32> to vector<32x16xf32>
      %46 = arith.addf %43, %45 : vector<32x16xf32>
      %c0_34 = arith.constant 0 : index
      %c0_35 = arith.constant 0 : index
      %c0_36 = arith.constant 0 : index
      %47 = vector.load %arg6[%c0_34, %c0_35, %c0_36] : memref<1x32x16xbf16, #tpu.memory_space<vmem>>, vector<1x32x16xbf16>
      %48 = vector.shape_cast %47 : vector<1x32x16xbf16> to vector<32x16xbf16>
      %49 = arith.extf %48 : vector<32x16xbf16> to vector<32x16xf32>
      %50 = arith.addf %46, %49 : vector<32x16xf32>
      %c0_37 = arith.constant 0 : index
      %c0_38 = arith.constant 0 : index
      %c0_39 = arith.constant 0 : index
      %51 = vector.load %arg9[%c0_37, %c0_38, %c0_39] : memref<1x32x16xf32, #tpu.memory_space<vmem>>, vector<1x32x16xf32>
      %52 = vector.shape_cast %51 : vector<1x32x16xf32> to vector<32x16xf32>
      %53 = vector.shape_cast %50 : vector<32x16xf32> to vector<1x32x16xf32>
      tpu.vector_store %arg9[%c0_37, %c0_38, %c0_39], %53 {strides = array<i32>} : memref<1x32x16xf32, #tpu.memory_space<vmem>>, vector<1x32x16xf32>,
    } else {
    }
    return
  }
  func.func @transform_0(%arg0: i32, %arg1: i32, %arg2: i32) -> (i32, i32, i32) {
    %c0_i32 = arith.constant 0 : i32
    %c0_i32_0 = arith.constant 0 : i32
    return %arg0, %arg1, %c0_i32 : i32, i32, i32
  }
  func.func @transform_1(%arg0: i32, %arg1: i32, %arg2: i32) -> (i32, i32, i32) {
    %c0_i32 = arith.constant 0 : i32
    %c0_i32_0 = arith.constant 0 : i32
    return %arg0, %arg2, %c0_i32 : i32, i32, i32
  }
  func.func @transform_2(%arg0: i32, %arg1: i32, %arg2: i32) -> (i32, i32, i32) {
    %c0_i32 = arith.constant 0 : i32
    %c0_i32_0 = arith.constant 0 : i32
    return %arg0, %arg2, %c0_i32 : i32, i32, i32
  }
  func.func @transform_3(%arg0: i32, %arg1: i32, %arg2: i32) -> (i32, i32, i32) {
    %c0_i32 = arith.constant 0 : i32
    %c0_i32_0 = arith.constant 0 : i32
    return %arg0, %arg1, %c0_i32 : i32, i32, i32
  }
  func.func @transform_4(%arg0: i32, %arg1: i32, %arg2: i32) -> (i32, i32) {
    %c0_i32 = arith.constant 0 : i32
    %c0_i32_0 = arith.constant 0 : i32
    %c0_i32_1 = arith.constant 0 : i32
    return %c0_i32, %c0_i32_0 : i32, i32
  }
  func.func @transform_5(%arg0: i32, %arg1: i32, %arg2: i32) -> (i32, i32) {
    %c0_i32 = arith.constant 0 : i32
    %c0_i32_0 = arith.constant 0 : i32
    %c0_i32_1 = arith.constant 0 : i32
    return %c0_i32, %c0_i32_0 : i32, i32
  }
  func.func @transform_6(%arg0: i32, %arg1: i32, %arg2: i32) -> (i32, i32, i32) {
    %c0_i32 = arith.constant 0 : i32
    %c0_i32_0 = arith.constant 0 : i32
    return %arg0, %arg1, %c0_i32 : i32, i32, i32
  }
}

module attributes {stable_mosaic.version = 11 : i64} {
  func.func @_gn_qkv_kernel(%arg0: i32, %arg1: memref<1x64x16xbf16, #tpu.memory_space<vmem>>, %arg2: memref<1x16xf32, #tpu.memory_space<vmem>>, %arg3: memref<1x16xf32, #tpu.memory_space<vmem>>, %arg4: memref<16x16xf32, #tpu.memory_space<vmem>>, %arg5: memref<16x48xbf16, #tpu.memory_space<vmem>>, %arg6: memref<1x64x16xbf16, #tpu.memory_space<vmem>>, %arg7: memref<1x64x16xbf16, #tpu.memory_space<vmem>>, %arg8: memref<1x64x16xbf16, #tpu.memory_space<vmem>>) attributes {dimension_semantics = [#tpu.dimension_semantics<parallel>], iteration_bounds = array<i64: 2>, scalar_prefetch = 0 : i64, scratch_operands = 0 : i64, tpu.core_type = #tpu.core_type<tc>, window_params = [{transform_indices = @transform_0, window_bounds = array<i64: 1, 64, 16>}, {pipeline_mode = #tpu.pipeline_mode<synchronous>, transform_indices = @transform_1, window_bounds = array<i64: 1, 16>}, {pipeline_mode = #tpu.pipeline_mode<synchronous>, transform_indices = @transform_2, window_bounds = array<i64: 1, 16>}, {pipeline_mode = #tpu.pipeline_mode<synchronous>, transform_indices = @transform_3, window_bounds = array<i64: 16, 16>}, {pipeline_mode = #tpu.pipeline_mode<synchronous>, transform_indices = @transform_4, window_bounds = array<i64: 16, 48>}, {transform_indices = @transform_5, window_bounds = array<i64: 1, 64, 16>}, {transform_indices = @transform_6, window_bounds = array<i64: 1, 64, 16>}, {transform_indices = @transform_7, window_bounds = array<i64: 1, 64, 16>}]} {
    %c0 = arith.constant 0 : index
    %c0_0 = arith.constant 0 : index
    %c0_1 = arith.constant 0 : index
    %0 = vector.load %arg1[%c0, %c0_0, %c0_1] : memref<1x64x16xbf16, #tpu.memory_space<vmem>>, vector<1x64x16xbf16>
    %1 = vector.shape_cast %0 : vector<1x64x16xbf16> to vector<64x16xbf16>
    %2 = arith.extf %1 : vector<64x16xbf16> to vector<64x16xf32>
    %c0_2 = arith.constant 0 : index
    %c0_3 = arith.constant 0 : index
    %3 = vector.load %arg4[%c0_2, %c0_3] : memref<16x16xf32, #tpu.memory_space<vmem>>, vector<16x16xf32>
    %cst = arith.constant dense<0.000000e+00> : vector<16xf32>
    %4 = vector.multi_reduction <add>, %2, %cst [0] : vector<64x16xf32> to vector<16xf32>
    %5 = vector.shape_cast %4 : vector<16xf32> to vector<1x16xf32>
    %6 = arith.mulf %2, %2 : vector<64x16xf32>
    %cst_4 = arith.constant dense<0.000000e+00> : vector<16xf32>
    %7 = vector.multi_reduction <add>, %6, %cst_4 [0] : vector<64x16xf32> to vector<16xf32>
    %8 = vector.shape_cast %7 : vector<16xf32> to vector<1x16xf32>
    %cst_5 = arith.constant dense<0.000000e+00> : vector<1x16xf32>
    %9 = tpu.matmul %5, %3, %cst_5 {dimension_numbers = #tpu.dot_dimension_numbers<[1], [0], [0], [1], [0, 0, 1, 1], [], []>} : vector<1x16xf32>, vector<16x16xf32>, vector<1x16xf32> -> vector<1x16xf32>
    %cst_6 = arith.constant 3.906250e-03 : f32
    %10 = vector.broadcast %cst_6 : f32 to vector<1x16xf32>
    %11 = arith.mulf %9, %10 : vector<1x16xf32>
    %cst_7 = arith.constant dense<0.000000e+00> : vector<1x16xf32>
    %12 = tpu.matmul %8, %3, %cst_7 {dimension_numbers = #tpu.dot_dimension_numbers<[1], [0], [0], [1], [0, 0, 1, 1], [], []>} : vector<1x16xf32>, vector<16x16xf32>, vector<1x16xf32> -> vector<1x16xf32>
    %cst_8 = arith.constant 3.906250e-03 : f32
    %13 = vector.broadcast %cst_8 : f32 to vector<1x16xf32>
    %14 = arith.mulf %12, %13 : vector<1x16xf32>
    %15 = arith.mulf %11, %11 : vector<1x16xf32>
    %16 = arith.subf %14, %15 : vector<1x16xf32>
    %17 = vector.broadcast %11 : vector<1x16xf32> to vector<64x16xf32>
    %18 = arith.subf %2, %17 : vector<64x16xf32>
    %cst_9 = arith.constant 9.99999974E-6 : f32
    %19 = vector.broadcast %cst_9 : f32 to vector<1x16xf32>
    %20 = arith.addf %16, %19 : vector<1x16xf32>
    %21 = math.rsqrt %20 : vector<1x16xf32>
    %22 = vector.broadcast %21 : vector<1x16xf32> to vector<64x16xf32>
    %23 = arith.mulf %18, %22 : vector<64x16xf32>
    %c0_10 = arith.constant 0 : index
    %c0_11 = arith.constant 0 : index
    %24 = vector.load %arg2[%c0_10, %c0_11] : memref<1x16xf32, #tpu.memory_space<vmem>>, vector<1x16xf32>
    %25 = vector.broadcast %24 : vector<1x16xf32> to vector<64x16xf32>
    %26 = arith.mulf %23, %25 : vector<64x16xf32>
    %c0_12 = arith.constant 0 : index
    %c0_13 = arith.constant 0 : index
    %27 = vector.load %arg3[%c0_12, %c0_13] : memref<1x16xf32, #tpu.memory_space<vmem>>, vector<1x16xf32>
    %28 = vector.broadcast %27 : vector<1x16xf32> to vector<64x16xf32>
    %29 = arith.addf %26, %28 : vector<64x16xf32>
    %30 = arith.truncf %29 : vector<64x16xf32> to vector<64x16xbf16>
    %c0_14 = arith.constant 0 : index
    %c0_15 = arith.constant 0 : index
    %31 = vector.load %arg5[%c0_14, %c0_15] : memref<16x48xbf16, #tpu.memory_space<vmem>>, vector<16x48xbf16>
    %cst_16 = arith.constant dense<0.000000e+00> : vector<64x48xf32>
    %32 = tpu.matmul %30, %31, %cst_16 {dimension_numbers = #tpu.dot_dimension_numbers<[1], [0], [0], [1], [0, 0, 1, 1], [], []>} : vector<64x16xbf16>, vector<16x48xbf16>, vector<64x48xf32> -> vector<64x48xf32>
    %33 = arith.truncf %32 : vector<64x48xf32> to vector<64x48xbf16>
    %34 = vector.extract_strided_slice %33 {offsets = [0, 0], sizes = [64, 16], strides = [1, 1]} : vector<64x48xbf16> to vector<64x16xbf16>
    %c0_17 = arith.constant 0 : index
    %c0_18 = arith.constant 0 : index
    %c0_19 = arith.constant 0 : index
    %35 = vector.load %arg6[%c0_17, %c0_18, %c0_19] : memref<1x64x16xbf16, #tpu.memory_space<vmem>>, vector<1x64x16xbf16>
    %36 = vector.shape_cast %35 : vector<1x64x16xbf16> to vector<64x16xbf16>
    %37 = vector.shape_cast %34 : vector<64x16xbf16> to vector<1x64x16xbf16>
    tpu.vector_store %arg6[%c0_17, %c0_18, %c0_19], %37 {strides = array<i32>} : memref<1x64x16xbf16, #tpu.memory_space<vmem>>, vector<1x64x16xbf16>,
    %38 = vector.extract_strided_slice %33 {offsets = [0, 16], sizes = [64, 16], strides = [1, 1]} : vector<64x48xbf16> to vector<64x16xbf16>
    %c0_20 = arith.constant 0 : index
    %c0_21 = arith.constant 0 : index
    %c0_22 = arith.constant 0 : index
    %39 = vector.load %arg7[%c0_20, %c0_21, %c0_22] : memref<1x64x16xbf16, #tpu.memory_space<vmem>>, vector<1x64x16xbf16>
    %40 = vector.shape_cast %39 : vector<1x64x16xbf16> to vector<64x16xbf16>
    %41 = vector.shape_cast %38 : vector<64x16xbf16> to vector<1x64x16xbf16>
    tpu.vector_store %arg7[%c0_20, %c0_21, %c0_22], %41 {strides = array<i32>} : memref<1x64x16xbf16, #tpu.memory_space<vmem>>, vector<1x64x16xbf16>,
    %42 = vector.extract_strided_slice %33 {offsets = [0, 32], sizes = [64, 16], strides = [1, 1]} : vector<64x48xbf16> to vector<64x16xbf16>
    %c0_23 = arith.constant 0 : index
    %c0_24 = arith.constant 0 : index
    %c0_25 = arith.constant 0 : index
    %43 = vector.load %arg8[%c0_23, %c0_24, %c0_25] : memref<1x64x16xbf16, #tpu.memory_space<vmem>>, vector<1x64x16xbf16>
    %44 = vector.shape_cast %43 : vector<1x64x16xbf16> to vector<64x16xbf16>
    %45 = vector.shape_cast %42 : vector<64x16xbf16> to vector<1x64x16xbf16>
    tpu.vector_store %arg8[%c0_23, %c0_24, %c0_25], %45 {strides = array<i32>} : memref<1x64x16xbf16, #tpu.memory_space<vmem>>, vector<1x64x16xbf16>,
    return
  }
  func.func @transform_0(%arg0: i32) -> (i32, i32, i32) {
    %c0_i32 = arith.constant 0 : i32
    %c0_i32_0 = arith.constant 0 : i32
    %c0_i32_1 = arith.constant 0 : i32
    return %arg0, %c0_i32, %c0_i32_0 : i32, i32, i32
  }
  func.func @transform_1(%arg0: i32) -> (i32, i32) {
    %c0_i32 = arith.constant 0 : i32
    %c0_i32_0 = arith.constant 0 : i32
    %c0_i32_1 = arith.constant 0 : i32
    return %c0_i32, %c0_i32_0 : i32, i32
  }
  func.func @transform_2(%arg0: i32) -> (i32, i32) {
    %c0_i32 = arith.constant 0 : i32
    %c0_i32_0 = arith.constant 0 : i32
    %c0_i32_1 = arith.constant 0 : i32
    return %c0_i32, %c0_i32_0 : i32, i32
  }
  func.func @transform_3(%arg0: i32) -> (i32, i32) {
    %c0_i32 = arith.constant 0 : i32
    %c0_i32_0 = arith.constant 0 : i32
    %c0_i32_1 = arith.constant 0 : i32
    return %c0_i32, %c0_i32_0 : i32, i32
  }
  func.func @transform_4(%arg0: i32) -> (i32, i32) {
    %c0_i32 = arith.constant 0 : i32
    %c0_i32_0 = arith.constant 0 : i32
    %c0_i32_1 = arith.constant 0 : i32
    return %c0_i32, %c0_i32_0 : i32, i32
  }
  func.func @transform_5(%arg0: i32) -> (i32, i32, i32) {
    %c0_i32 = arith.constant 0 : i32
    %c0_i32_0 = arith.constant 0 : i32
    %c0_i32_1 = arith.constant 0 : i32
    return %arg0, %c0_i32, %c0_i32_0 : i32, i32, i32
  }
  func.func @transform_6(%arg0: i32) -> (i32, i32, i32) {
    %c0_i32 = arith.constant 0 : i32
    %c0_i32_0 = arith.constant 0 : i32
    %c0_i32_1 = arith.constant 0 : i32
    return %arg0, %c0_i32, %c0_i32_0 : i32, i32, i32
  }
  func.func @transform_7(%arg0: i32) -> (i32, i32, i32) {
    %c0_i32 = arith.constant 0 : i32
    %c0_i32_0 = arith.constant 0 : i32
    %c0_i32_1 = arith.constant 0 : i32
    return %arg0, %c0_i32, %c0_i32_0 : i32, i32, i32
  }
}

module attributes {stable_mosaic.version = 11 : i64} {
  func.func @_fused_block_kernel(%arg0: i32, %arg1: memref<1x64x16xbf16, #tpu.memory_space<vmem>>, %arg2: memref<1x16xf32, #tpu.memory_space<vmem>>, %arg3: memref<1x16xf32, #tpu.memory_space<vmem>>, %arg4: memref<16x16xf32, #tpu.memory_space<vmem>>, %arg5: memref<9x16x16xbf16, #tpu.memory_space<vmem>>, %arg6: memref<1x16xf32, #tpu.memory_space<vmem>>, %arg7: memref<64x1xbf16, #tpu.memory_space<vmem>>, %arg8: memref<64x1xbf16, #tpu.memory_space<vmem>>, %arg9: memref<1x64x8xf32, #tpu.memory_space<vmem>>, %arg10: memref<8x16xbf16, #tpu.memory_space<vmem>>, %arg11: memref<1x16xf32, #tpu.memory_space<vmem>>, %arg12: memref<1x64x16xbf16, #tpu.memory_space<vmem>>, %arg13: memref<3x80x16xbf16, #tpu.memory_space<vmem>>) attributes {dimension_semantics = [#tpu.dimension_semantics<parallel>], iteration_bounds = array<i64: 2>, scalar_prefetch = 0 : i64, scratch_operands = 1 : i64, tpu.core_type = #tpu.core_type<tc>, window_params = [{transform_indices = @transform_0, window_bounds = array<i64: 1, 64, 16>}, {pipeline_mode = #tpu.pipeline_mode<synchronous>, transform_indices = @transform_1, window_bounds = array<i64: 1, 16>}, {pipeline_mode = #tpu.pipeline_mode<synchronous>, transform_indices = @transform_2, window_bounds = array<i64: 1, 16>}, {pipeline_mode = #tpu.pipeline_mode<synchronous>, transform_indices = @transform_3, window_bounds = array<i64: 16, 16>}, {pipeline_mode = #tpu.pipeline_mode<synchronous>, transform_indices = @transform_4, window_bounds = array<i64: 9, 16, 16>}, {pipeline_mode = #tpu.pipeline_mode<synchronous>, transform_indices = @transform_5, window_bounds = array<i64: 1, 16>}, {pipeline_mode = #tpu.pipeline_mode<synchronous>, transform_indices = @transform_6, window_bounds = array<i64: 64, 1>}, {pipeline_mode = #tpu.pipeline_mode<synchronous>, transform_indices = @transform_7, window_bounds = array<i64: 64, 1>}, {transform_indices = @transform_8, window_bounds = array<i64: 1, 64, 8>}, {pipeline_mode = #tpu.pipeline_mode<synchronous>, transform_indices = @transform_9, window_bounds = array<i64: 8, 16>}, {pipeline_mode = #tpu.pipeline_mode<synchronous>, transform_indices = @transform_10, window_bounds = array<i64: 1, 16>}, {transform_indices = @transform_11, window_bounds = array<i64: 1, 64, 16>}]} {
    %c0_i32 = arith.constant 0 : i32
    %0 = arith.cmpi eq, %arg0, %c0_i32 : i32
    %1 = arith.extui %0 : i1 to i32
    %c0_i32_0 = arith.constant 0 : i32
    %2 = arith.cmpi ne, %1, %c0_i32_0 : i32
    scf.if %2 {
      %cst_102 = arith.constant 0.000000e+00 : bf16
      %130 = vector.broadcast %cst_102 : bf16 to vector<3x80x16xbf16>
      %c0_103 = arith.constant 0 : index
      %c0_104 = arith.constant 0 : index
      %c0_105 = arith.constant 0 : index
      %131 = vector.load %arg13[%c0_103, %c0_104, %c0_105] : memref<3x80x16xbf16, #tpu.memory_space<vmem>>, vector<3x80x16xbf16>
      tpu.vector_store %arg13[%c0_103, %c0_104, %c0_105], %130 {strides = array<i32>} : memref<3x80x16xbf16, #tpu.memory_space<vmem>>, vector<3x80x16xbf16>,
    } else {
    }
    %c0 = arith.constant 0 : index
    %c0_1 = arith.constant 0 : index
    %c0_2 = arith.constant 0 : index
    %3 = vector.load %arg1[%c0, %c0_1, %c0_2] : memref<1x64x16xbf16, #tpu.memory_space<vmem>>, vector<1x64x16xbf16>
    %4 = vector.shape_cast %3 : vector<1x64x16xbf16> to vector<64x16xbf16>
    %5 = arith.extf %4 : vector<64x16xbf16> to vector<64x16xf32>
    %c0_3 = arith.constant 0 : index
    %c0_4 = arith.constant 0 : index
    %6 = vector.load %arg4[%c0_3, %c0_4] : memref<16x16xf32, #tpu.memory_space<vmem>>, vector<16x16xf32>
    %cst = arith.constant dense<0.000000e+00> : vector<16xf32>
    %7 = vector.multi_reduction <add>, %5, %cst [0] : vector<64x16xf32> to vector<16xf32>
    %8 = vector.shape_cast %7 : vector<16xf32> to vector<1x16xf32>
    %9 = arith.mulf %5, %5 : vector<64x16xf32>
    %cst_5 = arith.constant dense<0.000000e+00> : vector<16xf32>
    %10 = vector.multi_reduction <add>, %9, %cst_5 [0] : vector<64x16xf32> to vector<16xf32>
    %11 = vector.shape_cast %10 : vector<16xf32> to vector<1x16xf32>
    %cst_6 = arith.constant dense<0.000000e+00> : vector<1x16xf32>
    %12 = tpu.matmul %8, %6, %cst_6 {dimension_numbers = #tpu.dot_dimension_numbers<[1], [0], [0], [1], [0, 0, 1, 1], [], []>} : vector<1x16xf32>, vector<16x16xf32>, vector<1x16xf32> -> vector<1x16xf32>
    %cst_7 = arith.constant 3.906250e-03 : f32
    %13 = vector.broadcast %cst_7 : f32 to vector<1x16xf32>
    %14 = arith.mulf %12, %13 : vector<1x16xf32>
    %cst_8 = arith.constant dense<0.000000e+00> : vector<1x16xf32>
    %15 = tpu.matmul %11, %6, %cst_8 {dimension_numbers = #tpu.dot_dimension_numbers<[1], [0], [0], [1], [0, 0, 1, 1], [], []>} : vector<1x16xf32>, vector<16x16xf32>, vector<1x16xf32> -> vector<1x16xf32>
    %cst_9 = arith.constant 3.906250e-03 : f32
    %16 = vector.broadcast %cst_9 : f32 to vector<1x16xf32>
    %17 = arith.mulf %15, %16 : vector<1x16xf32>
    %18 = arith.mulf %14, %14 : vector<1x16xf32>
    %19 = arith.subf %17, %18 : vector<1x16xf32>
    %20 = vector.broadcast %14 : vector<1x16xf32> to vector<64x16xf32>
    %21 = arith.subf %5, %20 : vector<64x16xf32>
    %cst_10 = arith.constant 9.99999974E-6 : f32
    %22 = vector.broadcast %cst_10 : f32 to vector<1x16xf32>
    %23 = arith.addf %19, %22 : vector<1x16xf32>
    %24 = math.rsqrt %23 : vector<1x16xf32>
    %25 = vector.broadcast %24 : vector<1x16xf32> to vector<64x16xf32>
    %26 = arith.mulf %21, %25 : vector<64x16xf32>
    %c0_11 = arith.constant 0 : index
    %c0_12 = arith.constant 0 : index
    %27 = vector.load %arg2[%c0_11, %c0_12] : memref<1x16xf32, #tpu.memory_space<vmem>>, vector<1x16xf32>
    %28 = vector.broadcast %27 : vector<1x16xf32> to vector<64x16xf32>
    %29 = arith.mulf %26, %28 : vector<64x16xf32>
    %c0_13 = arith.constant 0 : index
    %c0_14 = arith.constant 0 : index
    %30 = vector.load %arg3[%c0_13, %c0_14] : memref<1x16xf32, #tpu.memory_space<vmem>>, vector<1x16xf32>
    %31 = vector.broadcast %30 : vector<1x16xf32> to vector<64x16xf32>
    %32 = arith.addf %29, %31 : vector<64x16xf32>
    %33 = arith.negf %32 : vector<64x16xf32>
    %34 = math.exp %33 : vector<64x16xf32>
    %cst_15 = arith.constant 1.000000e+00 : f32
    %35 = vector.broadcast %cst_15 : f32 to vector<64x16xf32>
    %36 = arith.addf %35, %34 : vector<64x16xf32>
    %37 = arith.divf %35, %36 : vector<64x16xf32>
    %38 = arith.mulf %32, %37 : vector<64x16xf32>
    %39 = arith.truncf %38 : vector<64x16xf32> to vector<64x16xbf16>
    %c0_16 = arith.constant 0 : index
    %c8 = arith.constant 8 : index
    %c0_17 = arith.constant 0 : index
    %40 = vector.load %arg13[%c0_16, %c8, %c0_17] : memref<3x80x16xbf16, #tpu.memory_space<vmem>>, vector<1x64x16xbf16>
    %41 = vector.shape_cast %40 : vector<1x64x16xbf16> to vector<64x16xbf16>
    %42 = vector.shape_cast %39 : vector<64x16xbf16> to vector<1x64x16xbf16>
    tpu.vector_store %arg13[%c0_16, %c8, %c0_17], %42 {strides = array<i32>} : memref<3x80x16xbf16, #tpu.memory_space<vmem>>, vector<1x64x16xbf16>,
    %c0_18 = arith.constant 0 : index
    %c7 = arith.constant 7 : index
    %c0_19 = arith.constant 0 : index
    %43 = vector.load %arg13[%c0_18, %c7, %c0_19] : memref<3x80x16xbf16, #tpu.memory_space<vmem>>, vector<1x64x16xbf16>
    %44 = vector.shape_cast %43 : vector<1x64x16xbf16> to vector<64x16xbf16>
    %c0_20 = arith.constant 0 : index
    %c0_21 = arith.constant 0 : index
    %45 = vector.load %arg7[%c0_20, %c0_21] : memref<64x1xbf16, #tpu.memory_space<vmem>>, vector<64x1xbf16>
    %46 = vector.broadcast %45 : vector<64x1xbf16> to vector<64x16xbf16>
    %47 = arith.mulf %44, %46 : vector<64x16xbf16>
    %c0_22 = arith.constant 0 : index
    %c9 = arith.constant 9 : index
    %c0_23 = arith.constant 0 : index
    %48 = vector.load %arg13[%c0_22, %c9, %c0_23] : memref<3x80x16xbf16, #tpu.memory_space<vmem>>, vector<1x64x16xbf16>
    %49 = vector.shape_cast %48 : vector<1x64x16xbf16> to vector<64x16xbf16>
    %c0_24 = arith.constant 0 : index
    %c0_25 = arith.constant 0 : index
    %50 = vector.load %arg8[%c0_24, %c0_25] : memref<64x1xbf16, #tpu.memory_space<vmem>>, vector<64x1xbf16>
    %51 = vector.broadcast %50 : vector<64x1xbf16> to vector<64x16xbf16>
    %52 = arith.mulf %49, %51 : vector<64x16xbf16>
    %c1 = arith.constant 1 : index
    %c8_26 = arith.constant 8 : index
    %c0_27 = arith.constant 0 : index
    %53 = vector.load %arg13[%c1, %c8_26, %c0_27] : memref<3x80x16xbf16, #tpu.memory_space<vmem>>, vector<1x64x16xbf16>
    %54 = vector.shape_cast %53 : vector<1x64x16xbf16> to vector<64x16xbf16>
    %55 = vector.shape_cast %47 : vector<64x16xbf16> to vector<1x64x16xbf16>
    tpu.vector_store %arg13[%c1, %c8_26, %c0_27], %55 {strides = array<i32>} : memref<3x80x16xbf16, #tpu.memory_space<vmem>>, vector<1x64x16xbf16>,
    %c2 = arith.constant 2 : index
    %c8_28 = arith.constant 8 : index
    %c0_29 = arith.constant 0 : index
    %56 = vector.load %arg13[%c2, %c8_28, %c0_29] : memref<3x80x16xbf16, #tpu.memory_space<vmem>>, vector<1x64x16xbf16>
    %57 = vector.shape_cast %56 : vector<1x64x16xbf16> to vector<64x16xbf16>
    %58 = vector.shape_cast %52 : vector<64x16xbf16> to vector<1x64x16xbf16>
    tpu.vector_store %arg13[%c2, %c8_28, %c0_29], %58 {strides = array<i32>} : memref<3x80x16xbf16, #tpu.memory_space<vmem>>, vector<1x64x16xbf16>,
    %cst_30 = arith.constant 0.000000e+00 : f32
    %59 = vector.broadcast %cst_30 : f32 to vector<64x16xf32>
    %c1_31 = arith.constant 1 : index
    %c0_32 = arith.constant 0 : index
    %c0_33 = arith.constant 0 : index
    %60 = vector.load %arg13[%c1_31, %c0_32, %c0_33] : memref<3x80x16xbf16, #tpu.memory_space<vmem>>, vector<1x64x16xbf16>
    %61 = vector.shape_cast %60 : vector<1x64x16xbf16> to vector<64x16xbf16>
    %c0_34 = arith.constant 0 : index
    %c0_35 = arith.constant 0 : index
    %c0_36 = arith.constant 0 : index
    %62 = vector.load %arg5[%c0_34, %c0_35, %c0_36] : memref<9x16x16xbf16, #tpu.memory_space<vmem>>, vector<1x16x16xbf16>
    %63 = vector.shape_cast %62 : vector<1x16x16xbf16> to vector<16x16xbf16>
    %cst_37 = arith.constant dense<0.000000e+00> : vector<64x16xf32>
    %64 = tpu.matmul %61, %63, %cst_37 {dimension_numbers = #tpu.dot_dimension_numbers<[1], [0], [0], [1], [0, 0, 1, 1], [], []>} : vector<64x16xbf16>, vector<16x16xbf16>, vector<64x16xf32> -> vector<64x16xf32>
    %65 = arith.addf %59, %64 : vector<64x16xf32>
    %c0_38 = arith.constant 0 : index
    %c0_39 = arith.constant 0 : index
    %c0_40 = arith.constant 0 : index
    %66 = vector.load %arg13[%c0_38, %c0_39, %c0_40] : memref<3x80x16xbf16, #tpu.memory_space<vmem>>, vector<1x64x16xbf16>
    %67 = vector.shape_cast %66 : vector<1x64x16xbf16> to vector<64x16xbf16>
    %c1_41 = arith.constant 1 : index
    %c0_42 = arith.constant 0 : index
    %c0_43 = arith.constant 0 : index
    %68 = vector.load %arg5[%c1_41, %c0_42, %c0_43] : memref<9x16x16xbf16, #tpu.memory_space<vmem>>, vector<1x16x16xbf16>
    %69 = vector.shape_cast %68 : vector<1x16x16xbf16> to vector<16x16xbf16>
    %cst_44 = arith.constant dense<0.000000e+00> : vector<64x16xf32>
    %70 = tpu.matmul %67, %69, %cst_44 {dimension_numbers = #tpu.dot_dimension_numbers<[1], [0], [0], [1], [0, 0, 1, 1], [], []>} : vector<64x16xbf16>, vector<16x16xbf16>, vector<64x16xf32> -> vector<64x16xf32>
    %71 = arith.addf %65, %70 : vector<64x16xf32>
    %c2_45 = arith.constant 2 : index
    %c0_46 = arith.constant 0 : index
    %c0_47 = arith.constant 0 : index
    %72 = vector.load %arg13[%c2_45, %c0_46, %c0_47] : memref<3x80x16xbf16, #tpu.memory_space<vmem>>, vector<1x64x16xbf16>
    %73 = vector.shape_cast %72 : vector<1x64x16xbf16> to vector<64x16xbf16>
    %c2_48 = arith.constant 2 : index
    %c0_49 = arith.constant 0 : index
    %c0_50 = arith.constant 0 : index
    %74 = vector.load %arg5[%c2_48, %c0_49, %c0_50] : memref<9x16x16xbf16, #tpu.memory_space<vmem>>, vector<1x16x16xbf16>
    %75 = vector.shape_cast %74 : vector<1x16x16xbf16> to vector<16x16xbf16>
    %cst_51 = arith.constant dense<0.000000e+00> : vector<64x16xf32>
    %76 = tpu.matmul %73, %75, %cst_51 {dimension_numbers = #tpu.dot_dimension_numbers<[1], [0], [0], [1], [0, 0, 1, 1], [], []>} : vector<64x16xbf16>, vector<16x16xbf16>, vector<64x16xf32> -> vector<64x16xf32>
    %77 = arith.addf %71, %76 : vector<64x16xf32>
    %c1_52 = arith.constant 1 : index
    %c8_53 = arith.constant 8 : index
    %c0_54 = arith.constant 0 : index
    %78 = vector.load %arg13[%c1_52, %c8_53, %c0_54] : memref<3x80x16xbf16, #tpu.memory_space<vmem>>, vector<1x64x16xbf16>
    %79 = vector.shape_cast %78 : vector<1x64x16xbf16> to vector<64x16xbf16>
    %c3 = arith.constant 3 : index
    %c0_55 = arith.constant 0 : index
    %c0_56 = arith.constant 0 : index
    %80 = vector.load %arg5[%c3, %c0_55, %c0_56] : memref<9x16x16xbf16, #tpu.memory_space<vmem>>, vector<1x16x16xbf16>
    %81 = vector.shape_cast %80 : vector<1x16x16xbf16> to vector<16x16xbf16>
    %cst_57 = arith.constant dense<0.000000e+00> : vector<64x16xf32>
    %82 = tpu.matmul %79, %81, %cst_57 {dimension_numbers = #tpu.dot_dimension_numbers<[1], [0], [0], [1], [0, 0, 1, 1], [], []>} : vector<64x16xbf16>, vector<16x16xbf16>, vector<64x16xf32> -> vector<64x16xf32>
    %83 = arith.addf %77, %82 : vector<64x16xf32>
    %c0_58 = arith.constant 0 : index
    %c8_59 = arith.constant 8 : index
    %c0_60 = arith.constant 0 : index
    %84 = vector.load %arg13[%c0_58, %c8_59, %c0_60] : memref<3x80x16xbf16, #tpu.memory_space<vmem>>, vector<1x64x16xbf16>
    %85 = vector.shape_cast %84 : vector<1x64x16xbf16> to vector<64x16xbf16>
    %c4 = arith.constant 4 : index
    %c0_61 = arith.constant 0 : index
    %c0_62 = arith.constant 0 : index
    %86 = vector.load %arg5[%c4, %c0_61, %c0_62] : memref<9x16x16xbf16, #tpu.memory_space<vmem>>, vector<1x16x16xbf16>
    %87 = vector.shape_cast %86 : vector<1x16x16xbf16> to vector<16x16xbf16>
    %cst_63 = arith.constant dense<0.000000e+00> : vector<64x16xf32>
    %88 = tpu.matmul %85, %87, %cst_63 {dimension_numbers = #tpu.dot_dimension_numbers<[1], [0], [0], [1], [0, 0, 1, 1], [], []>} : vector<64x16xbf16>, vector<16x16xbf16>, vector<64x16xf32> -> vector<64x16xf32>
    %89 = arith.addf %83, %88 : vector<64x16xf32>
    %c2_64 = arith.constant 2 : index
    %c8_65 = arith.constant 8 : index
    %c0_66 = arith.constant 0 : index
    %90 = vector.load %arg13[%c2_64, %c8_65, %c0_66] : memref<3x80x16xbf16, #tpu.memory_space<vmem>>, vector<1x64x16xbf16>
    %91 = vector.shape_cast %90 : vector<1x64x16xbf16> to vector<64x16xbf16>
    %c5 = arith.constant 5 : index
    %c0_67 = arith.constant 0 : index
    %c0_68 = arith.constant 0 : index
    %92 = vector.load %arg5[%c5, %c0_67, %c0_68] : memref<9x16x16xbf16, #tpu.memory_space<vmem>>, vector<1x16x16xbf16>
    %93 = vector.shape_cast %92 : vector<1x16x16xbf16> to vector<16x16xbf16>
    %cst_69 = arith.constant dense<0.000000e+00> : vector<64x16xf32>
    %94 = tpu.matmul %91, %93, %cst_69 {dimension_numbers = #tpu.dot_dimension_numbers<[1], [0], [0], [1], [0, 0, 1, 1], [], []>} : vector<64x16xbf16>, vector<16x16xbf16>, vector<64x16xf32> -> vector<64x16xf32>
    %95 = arith.addf %89, %94 : vector<64x16xf32>
    %c1_70 = arith.constant 1 : index
    %c16 = arith.constant 16 : index
    %c0_71 = arith.constant 0 : index
    %96 = vector.load %arg13[%c1_70, %c16, %c0_71] : memref<3x80x16xbf16, #tpu.memory_space<vmem>>, vector<1x64x16xbf16>
    %97 = vector.shape_cast %96 : vector<1x64x16xbf16> to vector<64x16xbf16>
    %c6 = arith.constant 6 : index
    %c0_72 = arith.constant 0 : index
    %c0_73 = arith.constant 0 : index
    %98 = vector.load %arg5[%c6, %c0_72, %c0_73] : memref<9x16x16xbf16, #tpu.memory_space<vmem>>, vector<1x16x16xbf16>
    %99 = vector.shape_cast %98 : vector<1x16x16xbf16> to vector<16x16xbf16>
    %cst_74 = arith.constant dense<0.000000e+00> : vector<64x16xf32>
    %100 = tpu.matmul %97, %99, %cst_74 {dimension_numbers = #tpu.dot_dimension_numbers<[1], [0], [0], [1], [0, 0, 1, 1], [], []>} : vector<64x16xbf16>, vector<16x16xbf16>, vector<64x16xf32> -> vector<64x16xf32>
    %101 = arith.addf %95, %100 : vector<64x16xf32>
    %c0_75 = arith.constant 0 : index
    %c16_76 = arith.constant 16 : index
    %c0_77 = arith.constant 0 : index
    %102 = vector.load %arg13[%c0_75, %c16_76, %c0_77] : memref<3x80x16xbf16, #tpu.memory_space<vmem>>, vector<1x64x16xbf16>
    %103 = vector.shape_cast %102 : vector<1x64x16xbf16> to vector<64x16xbf16>
    %c7_78 = arith.constant 7 : index
    %c0_79 = arith.constant 0 : index
    %c0_80 = arith.constant 0 : index
    %104 = vector.load %arg5[%c7_78, %c0_79, %c0_80] : memref<9x16x16xbf16, #tpu.memory_space<vmem>>, vector<1x16x16xbf16>
    %105 = vector.shape_cast %104 : vector<1x16x16xbf16> to vector<16x16xbf16>
    %cst_81 = arith.constant dense<0.000000e+00> : vector<64x16xf32>
    %106 = tpu.matmul %103, %105, %cst_81 {dimension_numbers = #tpu.dot_dimension_numbers<[1], [0], [0], [1], [0, 0, 1, 1], [], []>} : vector<64x16xbf16>, vector<16x16xbf16>, vector<64x16xf32> -> vector<64x16xf32>
    %107 = arith.addf %101, %106 : vector<64x16xf32>
    %c2_82 = arith.constant 2 : index
    %c16_83 = arith.constant 16 : index
    %c0_84 = arith.constant 0 : index
    %108 = vector.load %arg13[%c2_82, %c16_83, %c0_84] : memref<3x80x16xbf16, #tpu.memory_space<vmem>>, vector<1x64x16xbf16>
    %109 = vector.shape_cast %108 : vector<1x64x16xbf16> to vector<64x16xbf16>
    %c8_85 = arith.constant 8 : index
    %c0_86 = arith.constant 0 : index
    %c0_87 = arith.constant 0 : index
    %110 = vector.load %arg5[%c8_85, %c0_86, %c0_87] : memref<9x16x16xbf16, #tpu.memory_space<vmem>>, vector<1x16x16xbf16>
    %111 = vector.shape_cast %110 : vector<1x16x16xbf16> to vector<16x16xbf16>
    %cst_88 = arith.constant dense<0.000000e+00> : vector<64x16xf32>
    %112 = tpu.matmul %109, %111, %cst_88 {dimension_numbers = #tpu.dot_dimension_numbers<[1], [0], [0], [1], [0, 0, 1, 1], [], []>} : vector<64x16xbf16>, vector<16x16xbf16>, vector<64x16xf32> -> vector<64x16xf32>
    %113 = arith.addf %107, %112 : vector<64x16xf32>
    %c0_89 = arith.constant 0 : index
    %c0_90 = arith.constant 0 : index
    %114 = vector.load %arg6[%c0_89, %c0_90] : memref<1x16xf32, #tpu.memory_space<vmem>>, vector<1x16xf32>
    %115 = vector.broadcast %114 : vector<1x16xf32> to vector<64x16xf32>
    %116 = arith.addf %113, %115 : vector<64x16xf32>
    %c0_91 = arith.constant 0 : index
    %c0_92 = arith.constant 0 : index
    %c0_93 = arith.constant 0 : index
    %117 = vector.load %arg9[%c0_91, %c0_92, %c0_93] : memref<1x64x8xf32, #tpu.memory_space<vmem>>, vector<1x64x8xf32>
    %118 = vector.shape_cast %117 : vector<1x64x8xf32> to vector<64x8xf32>
    %119 = arith.truncf %118 : vector<64x8xf32> to vector<64x8xbf16>
    %c0_94 = arith.constant 0 : index
    %c0_95 = arith.constant 0 : index
    %120 = vector.load %arg10[%c0_94, %c0_95] : memref<8x16xbf16, #tpu.memory_space<vmem>>, vector<8x16xbf16>
    %cst_96 = arith.constant dense<0.000000e+00> : vector<64x16xf32>
    %121 = tpu.matmul %119, %120, %cst_96 {dimension_numbers = #tpu.dot_dimension_numbers<[1], [0], [0], [1], [0, 0, 1, 1], [], []>} : vector<64x8xbf16>, vector<8x16xbf16>, vector<64x16xf32> -> vector<64x16xf32>
    %122 = arith.addf %116, %121 : vector<64x16xf32>
    %c0_97 = arith.constant 0 : index
    %c0_98 = arith.constant 0 : index
    %123 = vector.load %arg11[%c0_97, %c0_98] : memref<1x16xf32, #tpu.memory_space<vmem>>, vector<1x16xf32>
    %124 = vector.broadcast %123 : vector<1x16xf32> to vector<64x16xf32>
    %125 = arith.addf %122, %124 : vector<64x16xf32>
    %126 = arith.truncf %125 : vector<64x16xf32> to vector<64x16xbf16>
    %c0_99 = arith.constant 0 : index
    %c0_100 = arith.constant 0 : index
    %c0_101 = arith.constant 0 : index
    %127 = vector.load %arg12[%c0_99, %c0_100, %c0_101] : memref<1x64x16xbf16, #tpu.memory_space<vmem>>, vector<1x64x16xbf16>
    %128 = vector.shape_cast %127 : vector<1x64x16xbf16> to vector<64x16xbf16>
    %129 = vector.shape_cast %126 : vector<64x16xbf16> to vector<1x64x16xbf16>
    tpu.vector_store %arg12[%c0_99, %c0_100, %c0_101], %129 {strides = array<i32>} : memref<1x64x16xbf16, #tpu.memory_space<vmem>>, vector<1x64x16xbf16>,
    return
  }
  func.func @transform_0(%arg0: i32) -> (i32, i32, i32) {
    %c0_i32 = arith.constant 0 : i32
    %c0_i32_0 = arith.constant 0 : i32
    %c0_i32_1 = arith.constant 0 : i32
    return %arg0, %c0_i32, %c0_i32_0 : i32, i32, i32
  }
  func.func @transform_1(%arg0: i32) -> (i32, i32) {
    %c0_i32 = arith.constant 0 : i32
    %c0_i32_0 = arith.constant 0 : i32
    %c0_i32_1 = arith.constant 0 : i32
    return %c0_i32, %c0_i32_0 : i32, i32
  }
  func.func @transform_2(%arg0: i32) -> (i32, i32) {
    %c0_i32 = arith.constant 0 : i32
    %c0_i32_0 = arith.constant 0 : i32
    %c0_i32_1 = arith.constant 0 : i32
    return %c0_i32, %c0_i32_0 : i32, i32
  }
  func.func @transform_3(%arg0: i32) -> (i32, i32) {
    %c0_i32 = arith.constant 0 : i32
    %c0_i32_0 = arith.constant 0 : i32
    %c0_i32_1 = arith.constant 0 : i32
    return %c0_i32, %c0_i32_0 : i32, i32
  }
  func.func @transform_4(%arg0: i32) -> (i32, i32, i32) {
    %c0_i32 = arith.constant 0 : i32
    %c0_i32_0 = arith.constant 0 : i32
    %c0_i32_1 = arith.constant 0 : i32
    %c0_i32_2 = arith.constant 0 : i32
    return %c0_i32, %c0_i32_0, %c0_i32_1 : i32, i32, i32
  }
  func.func @transform_5(%arg0: i32) -> (i32, i32) {
    %c0_i32 = arith.constant 0 : i32
    %c0_i32_0 = arith.constant 0 : i32
    %c0_i32_1 = arith.constant 0 : i32
    return %c0_i32, %c0_i32_0 : i32, i32
  }
  func.func @transform_6(%arg0: i32) -> (i32, i32) {
    %c0_i32 = arith.constant 0 : i32
    %c0_i32_0 = arith.constant 0 : i32
    %c0_i32_1 = arith.constant 0 : i32
    return %c0_i32, %c0_i32_0 : i32, i32
  }
  func.func @transform_7(%arg0: i32) -> (i32, i32) {
    %c0_i32 = arith.constant 0 : i32
    %c0_i32_0 = arith.constant 0 : i32
    %c0_i32_1 = arith.constant 0 : i32
    return %c0_i32, %c0_i32_0 : i32, i32
  }
  func.func @transform_8(%arg0: i32) -> (i32, i32, i32) {
    %c0_i32 = arith.constant 0 : i32
    %c0_i32_0 = arith.constant 0 : i32
    %c0_i32_1 = arith.constant 0 : i32
    return %arg0, %c0_i32, %c0_i32_0 : i32, i32, i32
  }
  func.func @transform_9(%arg0: i32) -> (i32, i32) {
    %c0_i32 = arith.constant 0 : i32
    %c0_i32_0 = arith.constant 0 : i32
    %c0_i32_1 = arith.constant 0 : i32
    return %c0_i32, %c0_i32_0 : i32, i32
  }
  func.func @transform_10(%arg0: i32) -> (i32, i32) {
    %c0_i32 = arith.constant 0 : i32
    %c0_i32_0 = arith.constant 0 : i32
    %c0_i32_1 = arith.constant 0 : i32
    return %c0_i32, %c0_i32_0 : i32, i32
  }
  func.func @transform_11(%arg0: i32) -> (i32, i32, i32) {
    %c0_i32 = arith.constant 0 : i32
    %c0_i32_0 = arith.constant 0 : i32
    %c0_i32_1 = arith.constant 0 : i32
    return %arg0, %c0_i32, %c0_i32_0 : i32, i32, i32
  }
}

</mosaic_0001>

<bundles_post_ra>
// kernel: resnet_block_with_attn.7
= control target key start
LH: loop header
LB: loop body
LE: loop exit
PB: predicated region body
PF: predicated region fallthrough
CT: control target
= control target key end

     0   :  { %11 = vsyncpa [#allocation6], 0  ;;  %s1573_s0 = inlined_call_operand.vmem [shape: bf16[2,64,16], index: 0, kind: input, shape index: {}]   ;;  %s1574_s1 = inlined_call_operand.vmem [shape: bf16[2,64,16], index: 1, kind: input, shape index: {}]   ;;  %s1575_s2 = inlined_call_operand.vmem [shape: bf16[2,64,16], index: 2, kind: input, shape index: {}]   ;;  %s1576_s3 = inlined_call_operand.vmem [shape: bf16[2,64,16], index: 3, kind: input, shape index: {}]   ;;  %s1577_s4 = inlined_call_operand.vmem [shape: bf16[16,16], index: 4, kind: input, shape index: {}]   ;;  %s1578_s5 = inlined_call_operand.vmem [shape: f32[1,16], index: 5, kind: input, shape index: {}]   ;;  %s1579_s6 = inlined_call_operand.hbm [shape: f32[2,64,16], index: 6, kind: output, shape index: {}]  }
   0x1   :  { %13 = vsyncpa [#allocation6 + $0x1], 0  ;;  %s1334_s21 = smov 0   ;;  %s1336_s22 = smov 0  }
   0x2   :  { %s1338_s23 = smov 0   ;;  %s1340_s24 = smov 0  }
   0x3   :  { %s1342_s25 = smov 0   ;;  %s1344_s26 = smov 0  }
   0x4   :  { %s1346_s27 = smov 0   ;;  %s1348_s28 = smov 0  }
   0x5   :  { %s1350_s29 = smov 0   ;;  %s1352_s30 = smov 0  }
   0x6 LB: > { %1589 = sst [smem:[#allocation8_spill]] %s1254_s21  ;;  %s979_s7 = sadd.s32 4294967295, %s1290_s30   ;;  %s1290_s30 = sphi %s1352_s30, %s19_s30   ;;  %s1286_s29 = sphi %s1350_s29, %s1611_s29   ;;  %s1282_s28 = sphi %s1348_s28, %s1610_s28   ;;  %s1278_s27 = sphi %s1346_s27, %s1609_s27   ;;  %s1274_s26 = sphi %s1344_s26, %s1608_s26   ;;  %s1270_s25 = sphi %s1342_s25, %s1607_s25   ;;  %s1266_s24 = sphi %s1340_s24, %s1606_s24   ;;  %s1262_s23 = sphi %s1338_s23, %s1605_s23   ;;  %s1258_s22 = sphi %s1336_s22, %s1613_s22   ;;  %s1254_s21 = sphi %s1334_s21, %s1612_s21  }
   0x7   : > { %1590 = sst [smem:[#allocation9_spill]] %s1262_s23  ;;  %s980_s8 = sadd.s32 4294967294, %s1290_s30  }
   0x8   : > { %1591 = sst [smem:[#allocation10_spill]] %s1278_s27  ;;  %s31_s9 = sadd.s32 1, %s1278_s27 }
   0x9   : > { %1592 = sst [smem:[#allocation11_spill]] %s1282_s28  ;;  %p32_p0 = scmp.ge.s32.totalorder %s31_s9, 4 }
   0xa   : > { %1593 = sst [smem:[#allocation12_spill]] %s1286_s29  ;;  %s34_s10 = sadd.s32 1, %s1282_s28 }
   0xb   : > { %s38_s11 = sadd.s32 1, %s1286_s29  ;;  %p211_p1 = scmp.ne.s32.totalorder %s1262_s23, %s1258_s22 }
   0xc   : > { %s1615_s9 = smov (%p32_p0, %s31_s9), 0  ;;  %s1617_s10 = smov (!%p32_p0, %s34_s10), %s1282_s28 }
   0xd   : > { %1594 = sst [smem:[#allocation13_spill]] %s1615_s9  ;;  %p212_p2 = scmp.eq.s32.totalorder %s979_s7, 15 }
   0xe   : > { %p217_p3 = scmp.ne.s32.totalorder %s1258_s22, %s1254_s21  ;;  %p36_p4 = scmp.ge.s32.totalorder %s1617_s10, 2 }
   0xf   : > { %p218_p5 = scmp.eq.s32.totalorder %s980_s8, 15  ;;  %p1396_p6 = por %p212_p2, %p211_p1 }
  0x10   : > { %s1619_s10 = smov (%p36_p4, %s1617_s10), 0  ;;  %s1621_s11 = smov (!%p36_p4, %s38_s11), %s1286_s29 }
  0x11   : > { %1596 = sst [smem:[#allocation14_spill]] %s1619_s10  ;;  %p1403_p7 = por %p218_p5, %p217_p3 }
  0x12   : > { %p983_p8 = scmp.ge.s32.totalorder %s1290_s30, 1  ;;  %p40_p9 = scmp.ge.s32.totalorder %s1621_s11, 2 }
  0x13   : > { %s1597_s13 = scalar_select %p1403_p7, 1, 0 }
  0x14   : > { %p294_p10 = scmp.lt.s32.totalorder %s1290_s30, 17  ;;  %s197_s14 = ssub.s32 %s1282_s28, %s1619_s10 }
  0x15   : > { %1598 = sst [smem:[#allocation15_spill]] %s1597_s13  ;;  %s1623_s11 = smov (%p40_p9, %s1621_s11), 0 }
  0x16   : > { %1599 = sst [smem:[#allocation16_spill]] %s1623_s11  ;;  %p295_p11 = pnand %p983_p8, %p294_p10 }
  0x17   : > { %s196_s15 = ssub.s32 %s1286_s29, %s1623_s11  ;;  %s201_s17 = sadd.s32 1, %s1262_s23 }
  0x18   : > { %s198_s16 = sor.u32 %s197_s14, %s196_s15  ;;  %298 = sbr.rel (%p295_p11) target bundleno = 1110 (0x456), region = 44 }
  0x19   : > { %p199_p12 = scmp.eq.s32.totalorder %s198_s16, 0  ;;  %s1585_s19 = sand.u32 (!%p295_p11), 1, %s1258_s22  }
  0x1a   : > { %s1421_s20 = sshll.u32 (!%p295_p11), %s1270_s25, 2  ;;  %s984_s7 = sshll.u32 (!%p295_p11), %s1585_s19, 5 }
  0x1b   : > { %s1417_s18 = scalar_select %p199_p12, %s1262_s23, %s201_s17  }
  0x1c   : > { %p356_p13 = scmp.lt.s32.totalorder (!%p295_p11), %s1274_s26, 1  ;;  %p358_p0 = scmp.lt.s32.totalorder (!%p295_p11), %s1421_s20, 7 }
  0x1d   : > { %1600 = sst [smem:[#allocation17_spill]] %s1417_s18  ;;  %s988_s16 = sshll.u32 (!%p295_p11), %s1266_s24, 1 }
  0x1e   : > { %p368_p1 = scmp.lt.s32.totalorder (!%p295_p11), %s988_s16, 7  ;;  %s1448_s9 = scalar_lea.vmem (!%p295_p11), [#allocation5], %s984_s7 }
  0x1f   : > { %s357_s8 = scalar_select %p356_p13, %s1274_s26, 1 }
  0x20   : > { %s359_s14 = scalar_select %p358_p0, %s1421_s20, 7 }
  0x21   : > { %s986_s15 = sshll.u32 %s357_s8, 3  ;;  %s1625_s16 = smov (!%p368_p1, %s988_s16), 7 }
  0x22   : > { %s361_s17 = sadd.s32 %s986_s15, %s359_s14  ;;  %s371_s19 = sadd.s32 %s986_s15, %s1625_s16 }
  0x23   : > { %s987_s11 = sshll.u32 %s361_s17, 2  ;;  %s990_s18 = sshll.u32 %s371_s19, 2 }
  0x24   : > { %s1433_s29 = scalar_lea.vmem %s1573_s0, %s987_s11  ;;  %s1438_s27 = scalar_lea.vmem %s1576_s3, %s987_s11 }
  0x25   : > { %s373_s8 = scalar_lea.vmem %s1574_s1, %s990_s18  ;;  %s1446_s17 = scalar_lea.vmem %s1575_s2, %s990_s18 }
  0x26   : > { %p997_p2 = scmp.ne.s32.totalorder %s1266_s24, 0 }
  0x27   : > { %vm401_vm0 = vcmask (!%p997_p2), 7168   ;;  %vm410_vm1 = vcmask (!%p997_p2), 130048   ;;  %v1292_v0 = vmov (!%p997_p2), -inf   ;;  %v1293_v1 = vmov (!%p997_p2), 0.0  }
  0x28   : > { %400 = sbr.rel (%p997_p2) target bundleno = 47 (0x2f), region = 48  ;;  %402 = vst.msk [vmem:[#allocation2] sm:$0xff] (!%p997_p2), %vm401_vm0, %v1292_v0  ;;  %403 = vst.msk [vmem:[#allocation2 + $0x8] sm:$0xff] (!%p997_p2), %vm401_vm0, %v1292_v0 }
  0x29   : > { %404 = vst.msk [vmem:[#allocation2 + $0x10] sm:$0xff] (!%p997_p2), %vm401_vm0, %v1292_v0  ;;  %405 = vst.msk [vmem:[#allocation2 + $0x18] sm:$0xff] (!%p997_p2), %vm401_vm0, %v1292_v0 }
  0x2a   : > { %406 = vst.msk [vmem:[#allocation3] sm:$0xff] (!%p997_p2), %vm401_vm0, %v1293_v1  ;;  %407 = vst.msk [vmem:[#allocation3 + $0x8] sm:$0xff] (!%p997_p2), %vm401_vm0, %v1293_v1 }
  0x2b   : > { %408 = vst.msk [vmem:[#allocation3 + $0x10] sm:$0xff] (!%p997_p2), %vm401_vm0, %v1293_v1  ;;  %409 = vst.msk [vmem:[#allocation3 + $0x18] sm:$0xff] (!%p997_p2), %vm401_vm0, %v1293_v1 }
  0x2c   : > { %411 = vst.msk [vmem:[#allocation4] sm:$0xff] (!%p997_p2), %vm410_vm1, %v1293_v1  ;;  %412 = vst.msk [vmem:[#allocation4 + $0x8] sm:$0xff] (!%p997_p2), %vm410_vm1, %v1293_v1 }
  0x2d   : > { %413 = vst.msk [vmem:[#allocation4 + $0x10] sm:$0xff] (!%p997_p2), %vm410_vm1, %v1293_v1  ;;  %414 = vst.msk [vmem:[#allocation4 + $0x18] sm:$0xff] (!%p997_p2), %vm410_vm1, %v1293_v1 }
  0x2f PF: > { %v1149_v2 = vld [vmem:[%s373_s8] sm:$0xff]   ;;  %vm438_vm2 = vcmask 130048   ;;  %v1151_v5 = vld [vmem:[%s1433_s29 + $0x8] sm:$0xff]   ;;  %v1294_v14 = vmov 0   ;;  %vm585_vm3 = vcmask 7168   ;;  %p1006_p3 = scmp.ne.s32.totalorder %s1266_s24, 3 }
  0x30   : > { %v1150_v3 = vld [vmem:[%s1433_s29] sm:$0xff]   ;;  %1053 = vmatprep.subr.msk.bf16.mxu0 %vm438_vm2, %v1149_v2  ;;  %v446_v4 = vsel %vm438_vm2, %v1149_v2, 0  ;;  %1148 = vset.pattern.permute.xlu1 %v1294_v14  ;;  %v1461_v15 = vld [vmem:[#allocation2 + $0x10] sm:$0xff]  ;;  %v500_v21 = vld [vmem:[#allocation2 + $0x18] sm:$0xff] }
  0x31   : > { %1036 = vmatpush3.bf16.xpose.msra.mxu0 %v446_v4  ;;  %1037 = vmatprep.mubr.msk.bf16.mxu0 %vm438_vm2, %v1150_v3  ;;  %v497_v16 = vld [vmem:[#allocation2] sm:$0xff]  ;;  %v498_v23 = vld [vmem:[#allocation2 + $0x8] sm:$0xff] }
  0x32   : > { %1147 = vset.pattern.permute.xlu0 %v1294_v14  ;;  %v1152_v33 = vld [vmem:[%s1446_s17] sm:$0xff]   ;;  %v563_v63 = vld [vmem:[#allocation3 + $0x10] sm:$0xff]  ;;  %v562_v4 = vld [vmem:[#allocation3 + $0x8] sm:$0xff] }
  0x33   : > { %1041 = vmatprep.subr.bf16.mxu1 %v1152_v33  ;;  %v561_v2 = vld [vmem:[#allocation3] sm:$0xff] }
  0x34   : > { %1042 = vmatpush3.bf16.msra.mxu1 %v1152_v33 }
  0x38   : > { %1038 = vmatmul.mubr.msk.bf16.vlgmr.msra.gmra.mrb[0].mxu0 %vm438_vm2, %v1151_v5 }
 0x10b   : > { %v1039_v6 = vpop.f32.mrb[0].mxu0 }
 0x10c   : > { %v482_v7 = vpop.f32.mrb[1].mxu0  ;;  %v507_v8 = vsel %vm438_vm2, %v1039_v6, -inf }
 0x10d   : > { %508 = vmax.xlane.f32.xlu1 %v507_v8  ;;  %v1040_v9 = vpop.f32.mrb[2].mxu0  ;;  %v501_v10 = vsel %vm438_vm2, %v482_v7, -inf }
 0x10e   : > { %502 = vmax.xlane.f32.xlu0 %v501_v10  ;;  %v485_v11 = vpop.f32.mrb[3].mxu0  ;;  %v510_v12 = vsel %vm438_vm2, %v1040_v9, -inf  ;;  %v564_v10 = vld [vmem:[#allocation3 + $0x18] sm:$0xff] }
 0x10f   : > { %v504_v13 = vsel %vm438_vm2, %v485_v11, -inf }
 0x111   : > { %511 = vmax.xlane.f32.xlu1 %v510_v12 }
 0x112   : > { %505 = vmax.xlane.f32.xlu0 %v504_v13 }
 0x19a   : > { %v509_v17 = vpop.xlane.xlu1 %508 }
 0x19b   : > { %v515_v18 = vmax.f32 %v1461_v15, %v509_v17  ;;  %v503_v19 = vpop.xlane.xlu0 %502  ;;  %v590_v17 = vld [vmem:[#allocation4] sm:$0xff] }
 0x19c   : > { %v513_v20 = vmax.f32 %v497_v16, %v503_v19 }
 0x19d   : > { %v519_v22 = vsub.f32 %v1461_v15, %v515_v18  ;;  %691 = vst.msk [vmem:[#allocation2 + $0x10] sm:$0xff] %vm585_vm3, %v515_v18  ;;  %541 = vperm.xlu1 %1148, %v515_v18   ;;  %v593_v18 = vld [vmem:[#allocation4 + $0x18] sm:$0xff] }
 0x19e   : > { %v517_v24 = vsub.f32 %v497_v16, %v513_v20  ;;  %689 = vst.msk [vmem:[#allocation2] sm:$0xff] %vm585_vm3, %v513_v20  ;;  %v512_v25 = vpop.xlane.xlu1 %511  ;;  %531 = vperm.xlu0 %1147, %v513_v20   ;;  %v592_v16 = vld [vmem:[#allocation4 + $0x10] sm:$0xff] }
 0x19f   : > { %v516_v26 = vmax.f32 %v500_v21, %v512_v25  ;;  %v506_v27 = vpop.xlane.xlu0 %505  ;;  %v525_v56 = vmul.f32 1.442695, %v519_v22 }
 0x1a0   : > { %v521_v28 = vmul.f32 1.442695, %v517_v24  ;;  %v514_v29 = vmax.f32 %v498_v23, %v506_v27 }
 0x1a1   : > { %v520_v30 = vsub.f32 %v500_v21, %v516_v26  ;;  %692 = vst.msk [vmem:[#allocation2 + $0x18] sm:$0xff] %vm585_vm3, %v516_v26  ;;  %v591_v21 = vld [vmem:[#allocation4 + $0x8] sm:$0xff] }
 0x1a2   : > { %1153 = vpow2.f32 %v521_v28  ;;  %v518_v31 = vsub.f32 %v498_v23, %v514_v29  ;;  %690 = vst.msk [vmem:[#allocation2 + $0x8] sm:$0xff] %vm585_vm3, %v514_v29  ;;  %536 = vperm.xlu1 %1148, %v514_v29  }
 0x1a3   : > { %v527_v58 = vmul.f32 1.442695, %v520_v30 }
 0x1a4   : > { %v523_v57 = vmul.f32 1.442695, %v518_v31 }
 0x1a6   : > { %546 = vperm.xlu1 %1148, %v516_v26  }
 0x1ac   : > { %v1154_v32 = vpop.eup %1153 }
 0x1ad   : > { %596 = vperm.xlu1 %1148, %v1154_v32   ;;  %v565_v5 = vmul.f32 %v1154_v32, %v561_v2 }
 0x21c   : > { %v542_v34 = vpop.permute.xlu1 %541 }
 0x21d   : > { %v551_v35 = vsub.f32 %v1039_v6, %v542_v34  ;;  %v532_v36 = vpop.permute.xlu0 %531 }
 0x21e   : > { %v549_v37 = vsub.f32 %v482_v7, %v532_v36 }
 0x21f   : > { %v557_v38 = vmul.f32 1.442695, %v551_v35 }
 0x220   : > { %v553_v39 = vmul.f32 1.442695, %v549_v37  ;;  %v1295_v37 = vmov (!%p1006_p3), 0  }
 0x221   : > { %1155 = vpow2.f32 %v557_v38  ;;  %v537_v40 = vpop.permute.xlu1 %536 }
 0x222   : > { %v550_v41 = vsub.f32 %v485_v11, %v537_v40  ;;  %1157 = vpow2.f32 %v553_v39 }
 0x224   : > { %v555_v42 = vmul.f32 1.442695, %v550_v41 }
 0x225   : > { %v547_v43 = vpop.permute.xlu1 %546 }
 0x226   : > { %1159 = vpow2.f32 %v555_v42  ;;  %v552_v44 = vsub.f32 %v1040_v9, %v547_v43  ;;  %v1171_v43 = vld [vmem:[%s1577_s4] sm:$0xff] (!%p1006_p3)  }
 0x227   : > { %1047 = vmatprep.subr.bf16.mxu0 (!%p1006_p3), %v1171_v43 }
 0x228   : > { %v559_v45 = vmul.f32 1.442695, %v552_v44  ;;  %1048 = vmatpush3.bf16.msra.mxu0 (!%p1006_p3), %v1171_v43 }
 0x22a   : > { %1161 = vpow2.f32 %v559_v45 }
 0x22b   : > { %v1156_v46 = vpop.eup %1155  ;;  %1163 = vpow2.f32 %v525_v56 }
 0x22c   : > { %v575_v47 = vsel %vm438_vm2, %v1156_v46, 0.0  ;;  %v1158_v48 = vpop.eup %1157  ;;  %1165 = vpow2.f32 %v523_v57  ;;  %v597_v62 = vpop.permute.xlu1 %596 }
 0x22d   : > { %576 = vadd.xlane.f32.xlu1 %v575_v47  ;;  %v569_v50 = vsel %vm438_vm2, %v1158_v48, 0.0  ;;  %1167 = vpow2.f32 %v527_v58  ;;  %v614_v23 = vmul.f32 %v597_v62, %v590_v17  ;;  %v1025_v58 = vld [vmem:[%s1438_s27 + $0x8] sm:$0xff] (!%p1006_p3)  }
 0x22e   : > { %v1024_v2 = vunpack.c.h.bf16 (!%p1006_p3), %v1025_v58 }
 0x230   : > { %v1160_v49 = vpop.eup %1159 }
 0x231   : > { %570 = vadd.xlane.f32.xlu1 %v569_v50  ;;  %v572_v51 = vsel %vm438_vm2, %v1160_v49, 0.0  ;;  %v618_v52 = vpack.c.bf16 %v1160_v49, %v1158_v48 }
 0x232   : > { %573 = vadd.xlane.f32.xlu0 %v572_v51 }
 0x233   : > { %1043 = vmatprep.mubr.msk.bf16.mxu1 %vm438_vm2, %v618_v52 }
 0x234   : > { %v1162_v53 = vpop.eup %1161 }
 0x235   : > { %v578_v54 = vsel %vm438_vm2, %v1162_v53, 0.0  ;;  %v619_v55 = vpack.c.bf16 %v1162_v53, %v1156_v46  ;;  %v1164_v59 = vpop.eup %1163 }
 0x236   : > { %579 = vadd.xlane.f32.xlu1 %v578_v54  ;;  %v1166_v60 = vpop.eup %1165  ;;  %v567_v0 = vmul.f32 %v1164_v59, %v563_v63 }
 0x237   : > { %1044 = vmatmul.mubr.msk.bf16.vlgmr.msra.gmra.mrb[0].mxu1 %vm438_vm2, %v619_v55  ;;  %v1168_v61 = vpop.eup %1167  ;;  %v566_v7 = vmul.f32 %v1166_v60, %v562_v4 }
 0x238   : > { %v568_v12 = vmul.f32 %v1168_v61, %v564_v10 }
 0x247   : > { %606 = vperm.xlu1 %1148, %v1164_v59   ;;  %v1018_v59 = vld [vmem:[%s1438_s27] sm:$0xff] (!%p1006_p3)  }
 0x248   : > { %601 = vperm.xlu0 %1147, %v1166_v60   ;;  %v1007_v60 = vld [vmem:[%s1578_s5] ss:$0 sm:$0xff] (!%p1006_p3)  ;;  %v1019_v63 = vunpack.c.l.bf16 (!%p1006_p3), %v1018_v59 }
 0x24b   : > { %611 = vperm.xlu1 %1148, %v1168_v61   ;;  %v1023_v61 = vunpack.c.l.bf16 (!%p1006_p3), %v1025_v58 }
 0x24c   : > { %1169 = vset.pattern.permute.xlu0 (!%p1006_p3), %v1295_v37 }
 0x24f   : > { %1170 = vset.pattern.permute.xlu1 (!%p1006_p3), %v1295_v37 }
 0x2ba   : > { %v577_v1 = vpop.xlane.xlu1 %576 }
 0x2bb   : > { %v583_v3 = vadd.f32 %v577_v1, %v567_v0 }
 0x2bd   : > { %588 = vst.msk [vmem:[#allocation3 + $0x10] sm:$0xff] %vm585_vm3, %v583_v3 }
 0x2be   : > { %v571_v6 = vpop.xlane.xlu1 %570 }
 0x2bf   : > { %v581_v8 = vadd.f32 %v571_v6, %v565_v5  ;;  %v574_v9 = vpop.xlane.xlu0 %573  ;;  %v1020_v5 = vunpack.c.h.bf16 (!%p1006_p3), %v1018_v59 }
 0x2c0   : > { %v582_v11 = vadd.f32 %v574_v9, %v566_v7 }
 0x2c1   : > { %586 = vst.msk [vmem:[#allocation3] sm:$0xff] %vm585_vm3, %v581_v8 }
 0x2c2   : > { %587 = vst.msk [vmem:[#allocation3 + $0x8] sm:$0xff] %vm585_vm3, %v582_v11 }
 0x2c3   : > { %v580_v13 = vpop.xlane.xlu1 %579 }
 0x2c4   : > { %v584_v14 = vadd.f32 %v580_v13, %v568_v12  ;;  %v703_v34 = vld [vmem:[#allocation3 + $0x10] sm:$0xff] (!%p1006_p3) }
 0x2c5   : > { %1172 = vrcp.f32 (!%p1006_p3), %v703_v34 }
 0x2c6   : > { %589 = vst.msk [vmem:[#allocation3 + $0x18] sm:$0xff] %vm585_vm3, %v584_v14 }
 0x2c7   : > { %v607_v15 = vpop.permute.xlu1 %606  ;;  %v602_v22 = vpop.permute.xlu0 %601 }
 0x2c8   : > { %v616_v20 = vmul.f32 %v607_v15, %v592_v16  ;;  %v615_v28 = vmul.f32 %v602_v22, %v591_v21  ;;  %v701_v35 = vld [vmem:[#allocation3] sm:$0xff] (!%p1006_p3) }
 0x2c9   : > { %v702_v38 = vld [vmem:[#allocation3 + $0x8] sm:$0xff] (!%p1006_p3)  ;;  %1174 = vrcp.f32 (!%p1006_p3), %v701_v35 }
 0x2cb   : > { %v612_v19 = vpop.permute.xlu1 %611 }
 0x2cc   : > { %v617_v25 = vmul.f32 %v612_v19, %v593_v18 }
 0x2cd   : > { %v704_v36 = vld [vmem:[#allocation3 + $0x18] sm:$0xff] (!%p1006_p3) }
 0x2ce   : > { %1176 = vrcp.f32 (!%p1006_p3), %v704_v36 }
 0x2cf   : > { %1178 = vrcp.f32 (!%p1006_p3), %v702_v38  ;;  %v1173_v39 = vpop.eup (!%p1006_p3), %1172 }
 0x2d0   : > { %721 = vperm.xlu1 (!%p1006_p3), %1170, %v1173_v39  }
 0x2d3   : > { %v1175_v40 = vpop.eup (!%p1006_p3), %1174 }
 0x2d4   : > { %711 = vperm.xlu0 (!%p1006_p3), %1169, %v1175_v40  }
 0x2d8   : > { %v1177_v41 = vpop.eup (!%p1006_p3), %1176 }
 0x2d9   : > { %v1179_v42 = vpop.eup (!%p1006_p3), %1178  ;;  %726 = vperm.xlu1 (!%p1006_p3), %1170, %v1177_v41  }
 0x2da   : > { %716 = vperm.xlu0 (!%p1006_p3), %1169, %v1179_v42  }
 0x30a   : > { %v1045_v24 = vpop.f32.mrb[0].mxu1  ;;  %696 = sbr.rel (%p1006_p3) target bundleno = 1083 (0x43b), region = 52 }
 0x30b   : > { %v683_v26 = vadd.f32 %v1045_v24, %v616_v20  ;;  %v666_v27 = vpop.f32.mrb[1].mxu1 }
 0x30c   : > { %v681_v29 = vadd.f32 %v666_v27, %v614_v23  ;;  %v1046_v30 = vpop.f32.mrb[2].mxu1 }
 0x30d   : > { %687 = vst.msk [vmem:[#allocation4 + $0x10] sm:$0xff] %vm438_vm2, %v683_v26  ;;  %v684_v31 = vadd.f32 %v1046_v30, %v617_v25  ;;  %v669_v32 = vpop.f32.mrb[3].mxu1 }
 0x30e   : > { %685 = vst.msk [vmem:[#allocation4] sm:$0xff] %vm438_vm2, %v681_v29  ;;  %v682_v33 = vadd.f32 %v669_v32, %v615_v28 }
 0x30f   : > { %688 = vst.msk [vmem:[#allocation4 + $0x18] sm:$0xff] %vm438_vm2, %v684_v31 }
 0x310   : > { %686 = vst.msk [vmem:[#allocation4 + $0x8] sm:$0xff] %vm438_vm2, %v682_v33 }
 0x314   : > { %v699_v46 = vld [vmem:[#allocation4 + $0x10] sm:$0xff] }
 0x315   : > { %v697_v48 = vld [vmem:[#allocation4] sm:$0xff] }
 0x316   : > { %v700_v47 = vld [vmem:[#allocation4 + $0x18] sm:$0xff] }
 0x317   : > { %v698_v49 = vld [vmem:[#allocation4 + $0x8] sm:$0xff] }
 0x34f   : > { %v722_v44 = vpop.permute.xlu1 %721 }
 0x350   : > { %v731_v51 = vmul.f32 %v722_v44, %v699_v46 }
 0x353   : > { %v712_v45 = vpop.permute.xlu0 %711 }
 0x354   : > { %v729_v54 = vmul.f32 %v712_v45, %v697_v48 }
 0x358   : > { %v727_v50 = vpop.permute.xlu1 %726 }
 0x359   : > { %v732_v52 = vmul.f32 %v727_v50, %v700_v47  ;;  %v717_v53 = vpop.permute.xlu0 %716 }
 0x35a   : > { %v730_v55 = vmul.f32 %v717_v53, %v698_v49 }
 0x35b   : > { %v734_v56 = vpack.c.bf16 %v732_v52, %v731_v51 }
 0x35c   : > { %v733_v57 = vpack.c.bf16 %v730_v55, %v729_v54 }
 0x35e   : > { %1049 = vmatprep.mubr.msk.bf16.mxu0 %vm438_vm2, %v733_v57 }
 0x35f   : > { %1050 = vmatmul.mubr.msk.bf16.vlgmr.msra.gmra.mrb[0].mxu0 %vm438_vm2, %v734_v56 }
 0x432   : > { %v1051_v62 = vpop.f32.mrb[0].mxu0 }
 0x433   : > { %v799_v0 = vadd.f32 %v1051_v62, %v1007_v60  ;;  %v790_v1 = vpop.f32.mrb[1].mxu0 }
 0x434   : > { %v791_v3 = vadd.f32 %v1007_v60, %v790_v1  ;;  %v1052_v4 = vpop.f32.mrb[2].mxu0 }
 0x435   : > { %v815_v6 = vadd.f32 %v1023_v61, %v799_v0  ;;  %v802_v7 = vadd.f32 %v1052_v4, %v1007_v60  ;;  %v793_v8 = vpop.f32.mrb[3].mxu0 }
 0x436   : > { %v813_v9 = vadd.f32 %v1019_v63, %v791_v3  ;;  %v794_v10 = vadd.f32 %v1007_v60, %v793_v8 }
 0x437   : > { %819 = vst.msk [vmem:[%s1448_s9 + $0x10] sm:$0xff] %vm438_vm2, %v815_v6  ;;  %v816_v11 = vadd.f32 %v1024_v2, %v802_v7 }
 0x438   : > { %817 = vst.msk [vmem:[%s1448_s9] sm:$0xff] %vm438_vm2, %v813_v9  ;;  %v814_v12 = vadd.f32 %v1020_v5, %v794_v10 }
 0x439   : > { %820 = vst.msk [vmem:[%s1448_s9 + $0x18] sm:$0xff] %vm438_vm2, %v816_v11 }
 0x43a   : > { %818 = vst.msk [vmem:[%s1448_s9 + $0x8] sm:$0xff] %vm438_vm2, %v814_v12 }
 0x43b PF: > { %s1013_s27 = sshll.u32 %s1274_s26, 3  ;;  %s837_s10 = sshll.u32 %s1448_s9, 4  ;;  %s1506_s10 = int_to_ptr.vmem [resolvable:$true] %s837_s10 }
 0x43c   : > { %s834_s29 = sadd.s32 %s1013_s27, %s1421_s20  ;;  %s1601_s7 = sand.u32 1, %s1258_s22  }
 0x43d   : > { %s1014_s11 = sshll.u32 %s834_s29, 7  ;;  %s1515_s15 = scalar_lea.sflag [#allocation6], %s1601_s7 }
 0x43e   : > { %s1511_s19 = scalar_lea.hbm %s1579_s6, %s1014_s11  ;;  %s1180_s16 = scalar_lea.vmem %s1506_s10, 512 }
 0x43f   : > { %p1181_p4 = scmp.ne.s32.totalorder %s1506_s10, %s1180_s16  ;;  %s1296_s26 = smov [#allocation5]  }
 0x440   : > { %s1184_s20 = sshll.u32 %s1296_s26, 4  ;;  %s1185_s20 = int_to_ptr.vmem [resolvable:$false] %s1184_s20 }
 0x441   : > { %p1182_p5 = pnand %p1181_p4, %p1396_p6  ;;  %s1186_s25 = scalar_lea.vmem %s1185_s20, 1024 }
 0x442   : > { %p1187_p9 = scmp.lt.s32.totalorder %s1506_s10, %s1185_s20  ;;  %p1188_p10 = scmp.lt.s32.totalorder %s1186_s25, %s1180_s16 }
 0x443   : > { %p1183_p8 = pneg %p1182_p5 }
 0x444   : > { %p1189_p11 = por %p1188_p10, %p1187_p9 }
 0x446   : > { %p1190_p12 = pnand %p1189_p11, %p1183_p8 }
 0x448   : > { %1193 = shalt.err (!%p1190_p12)
}
 0x449   : > { %s1194_s8 = scalar_lea.hbm %s1511_s19, 512  ;;  %s1198_s9 = scalar_lea.hbm %s1579_s6, 2048 }
 0x44a   : > { %p1195_p13 = scmp.ne.s32.totalorder %s1511_s19, %s1194_s8  ;;  %p1199_p2 = scmp.lt.u32.totalorder %s1511_s19, %s1579_s6 }
 0x44b   : > { %p1200_p3 = scmp.lt.u32.totalorder %s1198_s9, %s1194_s8  ;;  %p1202_p5 = scmp.lt.u32.totalorder %s1194_s8, %s1511_s19 }
 0x44c   : > { %p1196_p0 = pnand %p1195_p13, %p1396_p6 }
 0x44d   : > { %p1201_p4 = por %p1200_p3, %p1199_p2 }
 0x44e   : > { %p1197_p1 = pneg %p1196_p0 }
 0x44f   : > { %p1203_p8 = por %p1202_p5, %p1201_p4 }
 0x451   : > { %p1204_p9 = pnand %p1203_p8, %p1197_p1 }
 0x453   : > { %1207 = shalt.err (!%p1204_p9)
}
 0x454   : > { %s1297_s24 = smov 128   ;;  %s1298_s28 = smov 8  }
 0x455   : > { %1054 = dma.vmem_to_hbm [thread:$0]  (%p1396_p6), %s1506_s10, 512, %s1511_s19, %s1515_s15, %s1297_s24, %s1297_s24, %s1298_s28  }
 0x456 PF: > { %s1602_s27 = sld [smem:[#allocation8_spill]]  ;;  %p1060_p10 = scmp.ge.s32.totalorder %s1290_s30, 2 }
 0x458   : > { %p1057_p11 = pnand %p1060_p10, %p1403_p7 }
 0x45c   : > { %s852_s11 = sand.u32 1, %s1602_s27  }
 0x45d   : > { %s853_s13 = scalar_lea.sflag [#allocation6], %s852_s11 }
 0x45e   : > { %1249 = dma.done.wait (!%p1057_p11), %s853_s13, 512  }
 0x45f   : > { %1251 = vsyncadd (!%p1057_p11), %s853_s13, 4294966784  ;;  %s19_s30 = sadd.s32 1, %s1290_s30   ;;  %s1604_s18 = sld [smem:[#allocation9_spill]] }
 0x460   : > { %p16_p12 = scmp.ge.s32.totalorder %s19_s30, 18   ;;  %s1605_s23 = sld [smem:[#allocation17_spill]] }
 0x461   : > { %s1606_s24 = sld [smem:[#allocation10_spill]]  ;;  %s1607_s25 = sld [smem:[#allocation11_spill]] }
 0x462   : > { %s1608_s26 = sld [smem:[#allocation12_spill]]  ;;  %s1609_s27 = sld [smem:[#allocation13_spill]] }
 0x463   : > { %s1610_s28 = sld [smem:[#allocation14_spill]]  ;;  %s1611_s29 = sld [smem:[#allocation16_spill]] }
 0x464   : > { %s1612_s21 = smov %s1258_s22  ;;  %18 = sbr.rel (!%p16_p12) target bundleno = 6 (0x6), region = 96 }
 0x465   : > { %s1613_s22 = smov %s1604_s18 }
 0x46b   :  { %858 = vsyncpa [#allocation6], 1 }
 0x46c   :  { %860 = vsyncpa [#allocation6 + $0x1], 1 }

// kernel: resnet_block_with_attn.6
= control target key start
LH: loop header
LB: loop body
LE: loop exit
PB: predicated region body
PF: predicated region fallthrough
CT: control target
= control target key end

     0   :  { %s1070_s24 = smov 0   ;;  %s1208_s0 = inlined_call_operand.vmem [shape: bf16[2,64,16], index: 0, kind: input, shape index: {}]   ;;  %s1209_s1 = inlined_call_operand.vmem [shape: f32[1,16], index: 1, kind: input, shape index: {}]   ;;  %s1210_s2 = inlined_call_operand.vmem [shape: f32[1,16], index: 2, kind: input, shape index: {}]   ;;  %s1211_s3 = inlined_call_operand.vmem [shape: f32[16,16], index: 3, kind: input, shape index: {}]   ;;  %s1212_s4 = inlined_call_operand.vmem [shape: bf16[16,48], index: 4, kind: input, shape index: {}]   ;;  %s1213_s5 = inlined_call_operand.vmem [shape: bf16[2,64,16], index: 5, kind: output, shape index: {0}]   ;;  %s1214_s6 = inlined_call_operand.vmem [shape: bf16[2,64,16], index: 6, kind: output, shape index: {1}]   ;;  %s1215_s7 = inlined_call_operand.vmem [shape: bf16[2,64,16], index: 7, kind: output, shape index: {2}]  }
   0x1 LB: > { %s895_s25 = sadd.s32 4294967295, %s1023_s24   ;;  %p899_p0 = scmp.ge.s32.totalorder %s1023_s24, 1  ;;  %s1023_s24 = sphi %s1070_s24, %s18_s24  }
   0x2   : > { %p242_p1 = scmp.lt.s32.totalorder %s1023_s24, 3 }
   0x4   : > { %p243_p2 = pnand %p899_p0, %p242_p1 }
   0x5   : > { %v321_v0 = vld [vmem:[%s1211_s3] sm:$0xff] (!%p243_p2)  ;;  %v322_v1 = vld [vmem:[%s1211_s3 + $0x8] sm:$0xff] (!%p243_p2)  ;;  %p284_p3 = scmp.lt.s32.totalorder (!%p243_p2), %s895_s25, 1  ;;  %v1025_v2 = vmov (!%p243_p2), 0.0|0.0   ;;  %vm1026_vm0 = vmmov (!%p243_p2), 0   ;;  %v1027_v4 = vmov (!%p243_p2), 0.0  }
   0x6   : > { %246 = sbr.rel (%p243_p2) target bundleno = 647 (0x287), region = 40  ;;  %993 = vmatprep.subr.bf16.mxu0 (!%p243_p2), %v1025_v2  ;;  %v994_v3 = vpack.c.bf16 (!%p243_p2), %v322_v1, %v321_v0  ;;  %996 = vmatprep.subr.bf16.mxu1 (!%p243_p2), %v1025_v2  ;;  %vm323_vm1 = vcmask (!%p243_p2), 130048   ;;  %vm701_vm2 = vcmask (!%p243_p2), 125952   ;;  %s1028_s20 = smov (!%p243_p2), 112  }
   0x7   : > { %973 = vmatprep.mubr.msk.f32.mxu0 (!%p243_p2), %vm1026_vm0, %v1027_v4  ;;  %980 = vmatprep.mubr.msk.f32.mxu1 (!%p243_p2), %vm1026_vm0, %v1027_v4  ;;  %s1029_s21 = smov (!%p243_p2), 96  }
   0x8   : > { %995 = vmatpush3.bf16.msra.mxu0 (!%p243_p2), %v994_v3  ;;  %998 = vmatpush3.bf16.msra.mxu1 (!%p243_p2), %v994_v3  ;;  %v1014_v3 = vld [vmem:[%s1212_s4] sm:$0xff] (!%p243_p2)  }
   0x9   : > { %983 = vmatprep.subr.bf16.mxu0 (!%p243_p2), %v1014_v3  ;;  %999 = vmatprep.subr.bf16.mxu1 (!%p243_p2), %v1014_v3 }
   0xd   : > { %s1217_s25 = smov (!%p284_p3, %s895_s25), 1 }
   0xe   : > { %s1084_s30 = sshll.u32 %s1217_s25, 5 }
   0xf   : > { %s288_s10 = scalar_lea.vmem %s1208_s0, %s1084_s30  ;;  %s293_s19 = scalar_lea.vmem %s1213_s5, %s1084_s30 }
  0x10   : > { %v940_v5 = vld [vmem:[%s288_s10] sm:$0xff]   ;;  %v955_v6 = vld [vmem:[%s288_s10 + $0x8] sm:$0xff]   ;;  %v956_v7 = vld [vmem:[%s288_s10 + $0x10] sm:$0xff]   ;;  %s298_s25 = scalar_lea.vmem %s1214_s6, %s1084_s30  ;;  %s303_s28 = scalar_lea.vmem %s1215_s7, %s1084_s30 }
  0x11   : > { %v1090_v8 = vunpack.c.l.bf16 %v940_v5  ;;  %v1092_v9 = vunpack.c.h.bf16 %v940_v5  ;;  %v1094_v10 = vunpack.c.l.bf16 %v955_v6  ;;  %v1096_v11 = vunpack.c.h.bf16 %v955_v6  ;;  %v957_v13 = vld [vmem:[%s288_s10 + $0x18] sm:$0xff]  }
  0x12   : > { %v1098_v12 = vunpack.c.l.bf16 %v956_v7  ;;  %v1106_v17 = vunpack.c.h.bf16 %v956_v7  ;;  %v1116_v23 = vunpack.c.l.bf16 %v957_v13  ;;  %v1127_v33 = vunpack.c.h.bf16 %v957_v13 }
  0x13   : > { %v324_v14 = vsel %vm323_vm1, %v1090_v8, 0.0  ;;  %v325_v15 = vsel %vm323_vm1, %v1092_v9, 0.0  ;;  %v327_v16 = vsel %vm323_vm1, %v1094_v10, 0.0  ;;  %v329_v19 = vsel %vm323_vm1, %v1096_v11, 0.0 }
  0x14   : > { %v326_v18 = vadd.f32 %v325_v15, %v324_v14  ;;  %v345_v20 = vmul.f32 %v1090_v8, %v1090_v8  ;;  %v346_v21 = vmul.f32 %v1092_v9, %v1092_v9  ;;  %v347_v22 = vmul.f32 %v1094_v10, %v1094_v10 }
  0x15   : > { %v348_v25 = vmul.f32 %v1096_v11, %v1096_v11  ;;  %v331_v26 = vsel %vm323_vm1, %v1098_v12, 0.0  ;;  %v349_v27 = vmul.f32 %v1098_v12, %v1098_v12  ;;  %v333_v34 = vsel %vm323_vm1, %v1106_v17, 0.0 }
  0x16   : > { %v328_v24 = vadd.f32 %v327_v16, %v326_v18  ;;  %v353_v28 = vsel %vm323_vm1, %v345_v20, 0.0  ;;  %v354_v29 = vsel %vm323_vm1, %v346_v21, 0.0  ;;  %v356_v32 = vsel %vm323_vm1, %v347_v22, 0.0 }
  0x17   : > { %v355_v31 = vadd.f32 %v354_v29, %v353_v28  ;;  %v350_v35 = vmul.f32 %v1106_v17, %v1106_v17  ;;  %v358_v36 = vsel %vm323_vm1, %v348_v25, 0.0  ;;  %v335_v39 = vsel %vm323_vm1, %v1116_v23, 0.0 }
  0x18   : > { %v330_v30 = vadd.f32 %v329_v19, %v328_v24  ;;  %v351_v40 = vmul.f32 %v1116_v23, %v1116_v23  ;;  %v360_v41 = vsel %vm323_vm1, %v349_v27, 0.0  ;;  %v337_v44 = vsel %vm323_vm1, %v1127_v33, 0.0 }
  0x19   : > { %v357_v38 = vadd.f32 %v356_v32, %v355_v31  ;;  %v352_v45 = vmul.f32 %v1127_v33, %v1127_v33  ;;  %v362_v46 = vsel %vm323_vm1, %v350_v35, 0.0  ;;  %v524_v14 = vlaneseq }
  0x1a   : > { %v332_v37 = vadd.f32 %v331_v26, %v330_v30  ;;  %v364_v49 = vsel %vm323_vm1, %v351_v40, 0.0  ;;  %v910_v30 = vld [vmem:[%s1209_s1] ss:$0 sm:$0xff] }
  0x1b   : > { %v359_v43 = vadd.f32 %v358_v36, %v357_v38  ;;  %v366_v52 = vsel %vm323_vm1, %v352_v45, 0.0  ;;  %v525_v19 = vshrl.u32 %v524_v14, 7 }
  0x1c   : > { %v334_v42 = vadd.f32 %v333_v34, %v332_v37 }
  0x1d   : > { %v361_v48 = vadd.f32 %v360_v41, %v359_v43  ;;  %v526_v21 = vsub.s32 0, %v525_v19 }
  0x1e   : > { %v336_v47 = vadd.f32 %v335_v39, %v334_v42 }
  0x1f   : > { %v363_v51 = vadd.f32 %v362_v46, %v361_v48 }
  0x20   : > { %v338_v50 = vadd.f32 %v337_v44, %v336_v47 }
  0x21   : > { %v365_v54 = vadd.f32 %v364_v49, %v363_v51 }
  0x22   : > { %v339_v53 = vrot.slane %v338_v50, 4 }
  0x23   : > { %v367_v56 = vadd.f32 %v366_v52, %v365_v54 }
  0x24   : > { %v340_v55 = vadd.f32 %v339_v53, %v338_v50 }
  0x25   : > { %v368_v58 = vrot.slane %v367_v56, 4 }
  0x26   : > { %v341_v57 = vrot.slane %v340_v55, 2 }
  0x27   : > { %v369_v60 = vadd.f32 %v368_v58, %v367_v56 }
  0x28   : > { %v342_v59 = vadd.f32 %v341_v57, %v340_v55 }
  0x29   : > { %v370_v62 = vrot.slane %v369_v60, 2 }
  0x2a   : > { %v343_v61 = vrot.slane %v342_v59, 1 }
  0x2b   : > { %v371_v0 = vadd.f32 %v370_v62, %v369_v60 }
  0x2c   : > { %v344_v63 = vadd.f32 %v343_v61, %v342_v59 }
  0x2d   : > { %v372_v1 = vrot.slane %v371_v0, 1 }
  0x2e   : > { %974 = vmatmul.mubr.msk.f32.vlgmr.msra.gmra.mrb[0].mxu0 %vm323_vm1, %v344_v63 }
  0x2f   : > { %v373_v2 = vadd.f32 %v372_v1, %v371_v0  ;;  %984 = vmatpush3.bf16.msra.mxu0 %v1014_v3 }
  0x31   : > { %981 = vmatmul.mubr.msk.f32.vlgmr.msra.gmra.mrb[0].mxu1 %vm323_vm1, %v373_v2 }
  0x32   : > { %1000 = vmatpush3.bf16.msra.mxu1 %v1014_v3 }
 0x101   : > { %v443_v4 = vpop.f32.mrb[0].mxu0 }
 0x102   : > { %v447_v5 = vmul.f32 0.00390625, %v443_v4  ;;  %v975_v6 = vpop.f32.mrb[1].mxu0 }
 0x104   : > { %v522_v7 = vmul.f32 %v447_v5, %v447_v5  ;;  %v517_v13 = vpop.f32.mrb[0].mxu1  ;;  %v527_v22 = vrot.slane %v447_v5, %v526_v21 }
 0x105   : > { %v521_v15 = vmul.f32 0.00390625, %v517_v13  ;;  %v982_v16 = vpop.f32.mrb[1].mxu1 }
 0x106   : > { %v528_v25 = vsub.f32 %v1090_v8, %v527_v22  ;;  %v529_v27 = vsub.f32 %v1092_v9, %v527_v22  ;;  %v532_v28 = vsub.f32 %v1098_v12, %v527_v22  ;;  %v533_v29 = vsub.f32 %v1106_v17, %v527_v22  ;;  %v911_v12 = vld [vmem:[%s1210_s2] ss:$0 sm:$0xff] }
 0x107   : > { %v523_v18 = vsub.f32 %v521_v15, %v522_v7  ;;  %v530_v31 = vsub.f32 %v1094_v10, %v527_v22  ;;  %v531_v32 = vsub.f32 %v1096_v11, %v527_v22  ;;  %v534_v34 = vsub.f32 %v1116_v23, %v527_v22 }
 0x108   : > { %v535_v35 = vsub.f32 %v1127_v33, %v527_v22 }
 0x109   : > { %v536_v20 = vadd.f32 1e-05, %v523_v18 }
 0x10b   : > { %1015 = vrsqrt.f32 %v536_v20 }
 0x115   : > { %v1016_v24 = vpop.eup %1015 }
 0x116   : > { %v541_v26 = vrot.slane %v1016_v24, %v526_v21 }
 0x118   : > { %v542_v8 = vmul.f32 %v541_v26, %v528_v25  ;;  %v543_v36 = vmul.f32 %v541_v26, %v529_v27  ;;  %v546_v37 = vmul.f32 %v541_v26, %v532_v28  ;;  %v547_v9 = vmul.f32 %v541_v26, %v533_v29 }
 0x119   : > { %v544_v17 = vmul.f32 %v541_v26, %v530_v31  ;;  %v545_v38 = vmul.f32 %v541_v26, %v531_v32  ;;  %v548_v39 = vmul.f32 %v541_v26, %v534_v34  ;;  %v549_v40 = vmul.f32 %v541_v26, %v535_v35 }
 0x11a   : > { %v557_v41 = vmul.f32 %v910_v30, %v542_v8  ;;  %v558_v10 = vmul.f32 %v910_v30, %v543_v36  ;;  %v561_v42 = vmul.f32 %v910_v30, %v546_v37  ;;  %v562_v11 = vmul.f32 %v910_v30, %v547_v9 }
 0x11b   : > { %v559_v43 = vmul.f32 %v910_v30, %v544_v17  ;;  %v560_v23 = vmul.f32 %v910_v30, %v545_v38  ;;  %v563_v44 = vmul.f32 %v910_v30, %v548_v39  ;;  %v564_v33 = vmul.f32 %v910_v30, %v549_v40 }
 0x11c   : > { %v572_v45 = vadd.f32 %v911_v12, %v557_v41  ;;  %v573_v46 = vadd.f32 %v911_v12, %v558_v10  ;;  %v576_v47 = vadd.f32 %v911_v12, %v561_v42  ;;  %v577_v48 = vadd.f32 %v911_v12, %v562_v11 }
 0x11d   : > { %v574_v49 = vadd.f32 %v911_v12, %v559_v43  ;;  %v575_v50 = vadd.f32 %v911_v12, %v560_v23  ;;  %v578_v51 = vadd.f32 %v911_v12, %v563_v44  ;;  %v579_v52 = vadd.f32 %v911_v12, %v564_v33 }
 0x11e   : > { %v580_v53 = vpack.c.bf16 %v573_v46, %v572_v45  ;;  %v582_v54 = vpack.c.bf16 %v577_v48, %v576_v47 }
 0x11f   : > { %v581_v55 = vpack.c.bf16 %v575_v50, %v574_v49  ;;  %v583_v56 = vpack.c.bf16 %v579_v52, %v578_v51 }
 0x120   : > { %985 = vmatprep.mubr.msk.bf16.mxu0 %vm323_vm1, %v580_v53  ;;  %989 = vmatprep.mubr.msk.bf16.mxu1 %vm323_vm1, %v582_v54 }
 0x121   : > { %986 = vmatmul.mubr.msk.bf16.vlgmr.msra.gmra.mrb[4].mxu0 %vm323_vm1, %v581_v55  ;;  %990 = vmatmul.mubr.msk.bf16.vlgmr.msra.gmra.mrb[4].mxu1 %vm323_vm1, %v583_v56 }
 0x1f4   : > { %v987_v57 = vpop.f32.mrb[4].mxu0  ;;  %v991_v58 = vpop.f32.mrb[4].mxu1 }
 0x1f5   : > { %v933_v59 = vpack.c.bf16 %v987_v57, %v987_v57  ;;  %v937_v60 = vpack.c.bf16 %v991_v58, %v991_v58  ;;  %v638_v61 = vpop.f32.mrb[5].mxu0  ;;  %v654_v62 = vpop.f32.mrb[5].mxu1 }
 0x1f6   : > { %v931_v63 = vpack.c.bf16 %v638_v61, %v638_v61  ;;  %v935_v0 = vpack.c.bf16 %v654_v62, %v654_v62  ;;  %v988_v1 = vpop.f32.mrb[6].mxu0  ;;  %v992_v2 = vpop.f32.mrb[6].mxu1 }
 0x1f7   : > { %704 = vst.msk [vmem:[%s293_s19 + $0x8] sm:$0xf] %vm701_vm2, %v933_v59  ;;  %708 = vst.msk [vmem:[%s293_s19 + $0x18] sm:$0xf] %vm701_vm2, %v937_v60  ;;  %v934_v3 = vpack.c.bf16 %v988_v1, %v988_v1  ;;  %v938_v4 = vpack.c.bf16 %v992_v2, %v992_v2  ;;  %722 = vrot.lane.b32.xlu0 %v937_v60, %s1028_s20  ;;  %v657_v5 = vpop.f32.mrb[7].mxu1  ;;  %714 = vrot.lane.b32.xlu1 %v933_v59, %s1028_s20  ;;  %v641_v6 = vpop.f32.mrb[7].mxu0 }
 0x1f8   : > { %702 = vst.msk [vmem:[%s293_s19] sm:$0xf] %vm701_vm2, %v931_v63  ;;  %706 = vst.msk [vmem:[%s293_s19 + $0x10] sm:$0xf] %vm701_vm2, %v935_v0  ;;  %v936_v7 = vpack.c.bf16 %v657_v5, %v657_v5  ;;  %v932_v13 = vpack.c.bf16 %v641_v6, %v641_v6 }
 0x1f9   : > { %705 = vst.msk [vmem:[%s293_s19 + $0xc] sm:$0xf] %vm701_vm2, %v934_v3  ;;  %709 = vst.msk [vmem:[%s293_s19 + $0x1c] sm:$0xf] %vm701_vm2, %v938_v4 }
 0x1fa   : > { %707 = vst.msk [vmem:[%s293_s19 + $0x14] sm:$0xf] %vm701_vm2, %v936_v7  ;;  %703 = vst.msk [vmem:[%s293_s19 + $0x4] sm:$0xf] %vm701_vm2, %v932_v13 }
 0x1fb   : > { %746 = vrot.lane.b32.xlu0 %v933_v59, %s1029_s21  ;;  %716 = vrot.lane.b32.xlu1 %v934_v3, %s1028_s20 }
 0x1ff   : > { %710 = vrot.lane.b32.xlu0 %v931_v63, %s1028_s20  ;;  %724 = vrot.lane.b32.xlu1 %v938_v4, %s1028_s20 }
 0x203   : > { %718 = vrot.lane.b32.xlu0 %v935_v0, %s1028_s20  ;;  %748 = vrot.lane.b32.xlu1 %v934_v3, %s1029_s21 }
 0x207   : > { %742 = vrot.lane.b32.xlu0 %v931_v63, %s1029_s21  ;;  %720 = vrot.lane.b32.xlu1 %v936_v7, %s1028_s20 }
 0x20b   : > { %750 = vrot.lane.b32.xlu0 %v935_v0, %s1029_s21  ;;  %744 = vrot.lane.b32.xlu1 %v932_v13, %s1029_s21 }
 0x20f   : > { %752 = vrot.lane.b32.xlu1 %v936_v7, %s1029_s21  ;;  %712 = vrot.lane.b32.xlu0 %v932_v13, %s1028_s20 }
 0x213   : > { %756 = vrot.lane.b32.xlu1 %v938_v4, %s1029_s21  ;;  %754 = vrot.lane.b32.xlu0 %v937_v60, %s1029_s21 }
 0x269   : > { %v723_v14 = vpop.permute.xlu0 %722  ;;  %v715_v15 = vpop.permute.xlu1 %714 }
 0x26a   : > { %740 = vst.msk [vmem:[%s298_s25 + $0x18] sm:$0xf] %vm701_vm2, %v723_v14  ;;  %736 = vst.msk [vmem:[%s298_s25 + $0x8] sm:$0xf] %vm701_vm2, %v715_v15 }
 0x26d   : > { %v747_v16 = vpop.permute.xlu0 %746  ;;  %v717_v18 = vpop.permute.xlu1 %716 }
 0x26e   : > { %768 = vst.msk [vmem:[%s303_s28 + $0x8] sm:$0xf] %vm701_vm2, %v747_v16  ;;  %737 = vst.msk [vmem:[%s298_s25 + $0xc] sm:$0xf] %vm701_vm2, %v717_v18 }
 0x271   : > { %v711_v19 = vpop.permute.xlu0 %710  ;;  %v725_v20 = vpop.permute.xlu1 %724 }
 0x272   : > { %734 = vst.msk [vmem:[%s298_s25] sm:$0xf] %vm701_vm2, %v711_v19  ;;  %741 = vst.msk [vmem:[%s298_s25 + $0x1c] sm:$0xf] %vm701_vm2, %v725_v20 }
 0x275   : > { %v719_v21 = vpop.permute.xlu0 %718  ;;  %v749_v22 = vpop.permute.xlu1 %748 }
 0x276   : > { %738 = vst.msk [vmem:[%s298_s25 + $0x10] sm:$0xf] %vm701_vm2, %v719_v21  ;;  %769 = vst.msk [vmem:[%s303_s28 + $0xc] sm:$0xf] %vm701_vm2, %v749_v22 }
 0x279   : > { %v743_v24 = vpop.permute.xlu0 %742  ;;  %v721_v25 = vpop.permute.xlu1 %720 }
 0x27a   : > { %766 = vst.msk [vmem:[%s303_s28] sm:$0xf] %vm701_vm2, %v743_v24  ;;  %739 = vst.msk [vmem:[%s298_s25 + $0x14] sm:$0xf] %vm701_vm2, %v721_v25 }
 0x27d   : > { %v751_v26 = vpop.permute.xlu0 %750  ;;  %v745_v27 = vpop.permute.xlu1 %744 }
 0x27e   : > { %770 = vst.msk [vmem:[%s303_s28 + $0x10] sm:$0xf] %vm701_vm2, %v751_v26  ;;  %767 = vst.msk [vmem:[%s303_s28 + $0x4] sm:$0xf] %vm701_vm2, %v745_v27 }
 0x281   : > { %v753_v28 = vpop.permute.xlu1 %752  ;;  %v713_v29 = vpop.permute.xlu0 %712 }
 0x282   : > { %771 = vst.msk [vmem:[%s303_s28 + $0x14] sm:$0xf] %vm701_vm2, %v753_v28  ;;  %735 = vst.msk [vmem:[%s298_s25 + $0x4] sm:$0xf] %vm701_vm2, %v713_v29 }
 0x285   : > { %v757_v30 = vpop.permute.xlu1 %756  ;;  %v755_v31 = vpop.permute.xlu0 %754 }
 0x286   : > { %773 = vst.msk [vmem:[%s303_s28 + $0x1c] sm:$0xf] %vm701_vm2, %v757_v30  ;;  %772 = vst.msk [vmem:[%s303_s28 + $0x18] sm:$0xf] %vm701_vm2, %v755_v31 }
 0x287 PF: > { %s18_s24 = sadd.s32 1, %s1023_s24  }
 0x288   : > { %p15_p4 = scmp.ge.s32.totalorder %s18_s24, 4  }
 0x28a   :  { %17 = sbr.rel (!%p15_p4) target bundleno = 1 (0x1), region = 94 }

// kernel: resnet_block_with_attn.4
= control target key start
LH: loop header
LB: loop body
LE: loop exit
PB: predicated region body
PF: predicated region fallthrough
CT: control target
= control target key end

     0   :  { %s2601_s30 = smov 0   ;;  %s3078_s0 = inlined_call_operand.vmem [shape: f32[2,64,8], index: 0, kind: input, shape index: {}]   ;;  %s3079_s1 = inlined_call_operand.vmem [shape: f32[1,8], index: 1, kind: input, shape index: {}]   ;;  %s3080_s2 = inlined_call_operand.vmem [shape: f32[1,8], index: 2, kind: input, shape index: {}]   ;;  %s3081_s3 = inlined_call_operand.vmem [shape: f32[8,8], index: 3, kind: input, shape index: {}]   ;;  %s3082_s4 = inlined_call_operand.vmem [shape: bf16[9,8,16], index: 4, kind: input, shape index: {}]   ;;  %s3083_s5 = inlined_call_operand.vmem [shape: f32[1,16], index: 5, kind: input, shape index: {}]   ;;  %s3084_s6 = inlined_call_operand.vmem [shape: bf16[64,1], index: 6, kind: input, shape index: {}]   ;;  %s3085_s7 = inlined_call_operand.vmem [shape: bf16[64,1], index: 7, kind: input, shape index: {}]   ;;  %s3086_s8 = inlined_call_operand.vmem [shape: f32[2,1,16], index: 8, kind: input, shape index: {}]   ;;  %s3087_s9 = inlined_call_operand.vmem [shape: bf16[2,64,16], index: 9, kind: output, shape index: {}]  }
   0x1 LB: > { %s2168_s10 = sadd.s32 4294967295, %s2544_s30   ;;  %p2172_p0 = scmp.ge.s32.totalorder %s2544_s30, 1  ;;  %s2544_s30 = sphi %s2601_s30, %s19_s30  }
   0x2   : > { %p295_p1 = scmp.lt.s32.totalorder %s2544_s30, 3 }
   0x4   : > { %p296_p2 = pnand %p2172_p0, %p295_p1 }
   0x5   : > { %p334_p3 = scmp.lt.s32.totalorder (!%p296_p2), %s2168_s10, 1  ;;  %p2177_p4 = scmp.ne.s32.totalorder (!%p296_p2), %s2168_s10, 0 }
   0x6   : > { %299 = sbr.rel (%p296_p2) target bundleno = 640 (0x280), region = 56 }
   0xd   : > { %s2609_s11 = scalar_select %p334_p3, %s2168_s10, 1 }
   0xe   : > { %351 = sbr.rel (%p2177_p4) target bundleno = 23 (0x17), region = 60  ;;  %vm352_vm0 = vcmask (!%p2177_p4), 64512   ;;  %v2546_v0 = vmov (!%p2177_p4), 0  }
   0xf   : > { %s2254_s12 = sshll.u32 %s2609_s11, 6  ;;  %s341_s15 = scalar_lea.vmem %s3086_s8, %s2609_s11  ;;  %353 = vst.msk [vmem:[#allocation2] sm:$0xff] (!%p2177_p4), %vm352_vm0, %v2546_v0  ;;  %354 = vst.msk [vmem:[#allocation2 + $0x8] sm:$0xff] (!%p2177_p4), %vm352_vm0, %v2546_v0 }
  0x10   : > { %s2619_s18 = scalar_lea.vmem %s3078_s0, %s2254_s12  ;;  %s2255_s19 = sshll.u32 %s2609_s11, 5  ;;  %355 = vst.msk [vmem:[#allocation2 + $0x10] sm:$0xff] (!%p2177_p4), %vm352_vm0, %v2546_v0  ;;  %356 = vst.msk [vmem:[#allocation2 + $0x18] sm:$0xff] (!%p2177_p4), %vm352_vm0, %v2546_v0 }
  0x11   : > { %s2625_s22 = scalar_lea.vmem %s3087_s9, %s2255_s19  ;;  %357 = vst.msk [vmem:[#allocation2 + $0x20] sm:$0xff] (!%p2177_p4), %vm352_vm0, %v2546_v0  ;;  %358 = vst.msk [vmem:[#allocation2 + $0x28] sm:$0xff] (!%p2177_p4), %vm352_vm0, %v2546_v0 }
  0x12   : > { %359 = vst.msk [vmem:[#allocation2 + $0x30] sm:$0xff] (!%p2177_p4), %vm352_vm0, %v2546_v0  ;;  %360 = vst.msk [vmem:[#allocation2 + $0x38] sm:$0xff] (!%p2177_p4), %vm352_vm0, %v2546_v0 }
  0x13   : > { %361 = vst.msk [vmem:[#allocation2 + $0x40] sm:$0xff] (!%p2177_p4), %vm352_vm0, %v2546_v0  ;;  %362 = vst.msk [vmem:[#allocation2 + $0x48] sm:$0xff] (!%p2177_p4), %vm352_vm0, %v2546_v0 }
  0x14   : > { %363 = vst.msk [vmem:[#allocation2 + $0x50] sm:$0xff] (!%p2177_p4), %vm352_vm0, %v2546_v0  ;;  %364 = vst.msk [vmem:[#allocation2 + $0x58] sm:$0xff] (!%p2177_p4), %vm352_vm0, %v2546_v0 }
  0x15   : > { %365 = vst.msk [vmem:[#allocation2 + $0x60] sm:$0xff] %vm352_vm0, %v2546_v0  ;;  %366 = vst.msk [vmem:[#allocation2 + $0x68] sm:$0xff] %vm352_vm0, %v2546_v0 }
  0x16   : > { %367 = vst.msk [vmem:[#allocation2 + $0x70] sm:$0xff] %vm352_vm0, %v2546_v0 }
  0x17 PF: > { %v376_v1 = vld [vmem:[%s3081_s3] sm:$0xff]  ;;  %v2649_v3 = vld [vmem:[%s2619_s18 + $0x8] sm:$0xff]  ;;  %vm377_vm1 = vcmask 64512   ;;  %v2547_v4 = vmov 0.0   ;;  %vm2548_vm2 = vmmov 0   ;;  %v2652_v5 = vld [vmem:[%s2619_s18 + $0x10] sm:$0xff] }
  0x18   : > { %v2646_v2 = vld [vmem:[%s2619_s18] sm:$0xff]  ;;  %2313 = vmatprep.subr.mxu0 %v2547_v4  ;;  %2315 = vmatprep.mubr.msk.f32.mxu0 %vm2548_vm2, %v2547_v4  ;;  %v2655_v6 = vld [vmem:[%s2619_s18 + $0x18] sm:$0xff]  ;;  %v379_v8 = vsel %vm377_vm1, %v2649_v3, 0.0  ;;  %v400_v10 = vmul.f32 %v2649_v3, %v2649_v3  ;;  %v381_v13 = vsel %vm377_vm1, %v2652_v5, 0.0  ;;  %v401_v15 = vmul.f32 %v2652_v5, %v2652_v5  ;;  %v2675_v16 = vld [vmem:[%s2619_s18 + $0x28] sm:$0xff] }
  0x19   : > { %v378_v7 = vsel %vm377_vm1, %v2646_v2, 0.0  ;;  %v399_v9 = vmul.f32 %v2646_v2, %v2646_v2  ;;  %2314 = vmatpush3.msra.mxu0 %v376_v1  ;;  %v2666_v11 = vld [vmem:[%s2619_s18 + $0x20] sm:$0xff]  ;;  %2318 = vmatprep.subr.mxu1 %v2547_v4  ;;  %v383_v14 = vsel %vm377_vm1, %v2655_v6, 0.0  ;;  %v402_v18 = vmul.f32 %v2655_v6, %v2655_v6  ;;  %v2686_v23 = vld [vmem:[%s2619_s18 + $0x30] sm:$0xff]  ;;  %v897_v30 = vld [vmem:[%s3085_s7 + $0x8] sm:$0xf] }
  0x1a   : > { %v380_v12 = vadd.f32 %v379_v8, %v378_v7  ;;  %2319 = vmatpush3.msra.mxu1 %v376_v1  ;;  %2320 = vmatprep.mubr.msk.f32.mxu1 %vm2548_vm2, %v2547_v4  ;;  %v385_v19 = vsel %vm377_vm1, %v2666_v11, 0.0  ;;  %v403_v20 = vmul.f32 %v2666_v11, %v2666_v11  ;;  %v408_v22 = vsel %vm377_vm1, %v400_v10, 0.0  ;;  %v895_v31 = vld [vmem:[%s3085_s7] sm:$0xf]  ;;  %v2701_v32 = vld [vmem:[%s2619_s18 + $0x38] sm:$0xff] }
  0x1b   : > { %v407_v21 = vsel %vm377_vm1, %v399_v9, 0.0  ;;  %v410_v26 = vsel %vm377_vm1, %v401_v15, 0.0  ;;  %v387_v27 = vsel %vm377_vm1, %v2675_v16, 0.0  ;;  %v404_v28 = vmul.f32 %v2675_v16, %v2675_v16  ;;  %v898_v44 = vld [vmem:[%s3085_s7 + $0xc] sm:$0xf] }
  0x1c   : > { %v382_v17 = vadd.f32 %v381_v13, %v380_v12  ;;  %v409_v25 = vadd.f32 %v408_v22, %v407_v21  ;;  %v412_v29 = vsel %vm377_vm1, %v402_v18, 0.0  ;;  %v389_v35 = vsel %vm377_vm1, %v2686_v23, 0.0  ;;  %v896_v45 = vld [vmem:[%s3085_s7 + $0x4] sm:$0xf]  ;;  %v900_v52 = vld [vmem:[%s3085_s7 + $0x14] sm:$0xf] }
  0x1d   : > { %v405_v36 = vmul.f32 %v2686_v23, %v2686_v23  ;;  %v414_v37 = vsel %vm377_vm1, %v403_v20, 0.0  ;;  %v2549_v38 = vmov 0   ;;  %v391_v41 = vsel %vm377_vm1, %v2701_v32, 0.0  ;;  %v899_v53 = vld [vmem:[%s3085_s7 + $0x10] sm:$0xf] }
  0x1e   : > { %v384_v24 = vadd.f32 %v383_v14, %v382_v17  ;;  %v411_v34 = vadd.f32 %v410_v26, %v409_v25  ;;  %2503 = vset.pattern.permute.xlu1 %v2549_v38  ;;  %2502 = vset.pattern.permute.xlu0 %v2549_v38  ;;  %v406_v42 = vmul.f32 %v2701_v32, %v2701_v32  ;;  %v416_v43 = vsel %vm377_vm1, %v404_v28, 0.0  ;;  %v902_v58 = vld [vmem:[%s3085_s7 + $0x1c] sm:$0xf]  ;;  %v901_v59 = vld [vmem:[%s3085_s7 + $0x18] sm:$0xf] }
  0x1f   : > { %929 = vperm.xlu1 %2503, %v897_v30   ;;  %905 = vperm.xlu0 %2502, %v895_v31   ;;  %v418_v48 = vsel %vm377_vm1, %v405_v36, 0.0  ;;  %v724_v0 = vld [vmem:[%s3084_s6 + $0x4] sm:$0xf]  ;;  %v723_v1 = vld [vmem:[%s3084_s6] sm:$0xf]  ;;  %vm698_vm3 = vcmask 1043456  }
  0x20   : > { %v386_v33 = vadd.f32 %v385_v19, %v384_v24  ;;  %v413_v40 = vadd.f32 %v412_v29, %v411_v34  ;;  %v420_v51 = vsel %vm377_vm1, %v406_v42, 0.0  ;;  %v726_v10 = vld [vmem:[%s3084_s6 + $0xc] sm:$0xf]  ;;  %v725_v12 = vld [vmem:[%s3084_s6 + $0x8] sm:$0xf]  ;;  %v578_v34 = vlaneseq }
  0x21   : > { %v728_v15 = vld [vmem:[%s3084_s6 + $0x14] sm:$0xf]  ;;  %v727_v17 = vld [vmem:[%s3084_s6 + $0x10] sm:$0xf]  ;;  %v730_v18 = vld [vmem:[%s3084_s6 + $0x1c] sm:$0xf] }
  0x22   : > { %v388_v39 = vadd.f32 %v387_v27, %v386_v33  ;;  %v415_v47 = vadd.f32 %v414_v37, %v413_v40  ;;  %v729_v19 = vld [vmem:[%s3084_s6 + $0x18] sm:$0xf]  ;;  %v2198_v20 = vld [vmem:[%s3082_s4 + $0x4] sm:$0xf]  ;;  %v2767_v22 = vld [vmem:[%s3082_s4 + $0x10] sm:$0xf] }
  0x23   : > { %941 = vperm.xlu1 %2503, %v898_v44   ;;  %917 = vperm.xlu0 %2502, %v896_v45   ;;  %v1192_v21 = vsel %vm698_vm3, %v2198_v20, 0  ;;  %v2773_v24 = vsel %vm698_vm3, %v2767_v22, 0  ;;  %v2779_v25 = vld [vmem:[%s3082_s4] sm:$0xf]  ;;  %v2784_v26 = vld [vmem:[%s3082_s4 + $0x14] sm:$0xf] }
  0x24   : > { %v390_v46 = vadd.f32 %v389_v35, %v388_v39  ;;  %v417_v50 = vadd.f32 %v416_v43, %v415_v47  ;;  %2479 = vmatprep.subr.msk.bf16.mxu1 %vm698_vm3, %v2198_v20  ;;  %2483 = vmatprep.subr.msk.bf16.mxu0 %vm698_vm3, %v2767_v22  ;;  %v579_v39 = vshrl.u32 %v578_v34, 7  ;;  %vm711_vm4 = vcmask 64516  }
  0x25   : > { %vm716_vm5 = vcmask 60416   ;;  %vm1019_vm6 = vsmask.f32 4352  ;;  %vm1116_vm7 = vsmask.f32 7424  ;;  %vm2095_vm10 = vcmask 125952  }
  0x26   : > { %v392_v49 = vadd.f32 %v391_v41, %v390_v46  ;;  %v419_v55 = vadd.f32 %v418_v48, %v417_v50  ;;  %v580_v41 = vsub.s32 0, %v579_v39  ;;  %vm847_vm8 = vsmask.f32 3328 }
  0x27   : > { %965 = vperm.xlu1 %2503, %v900_v52   ;;  %953 = vperm.xlu0 %2502, %v899_v53   ;;  %vm1065_vm9 = vsmask.f32 256 }
  0x28   : > { %v393_v54 = vrot.slane %v392_v49, 4  ;;  %v421_v57 = vadd.f32 %v420_v51, %v419_v55 }
  0x2a   : > { %v394_v56 = vadd.f32 %v393_v54, %v392_v49  ;;  %v422_v61 = vrot.slane %v421_v57, 4  ;;  %v2550_v49 = vmov 839922192  }
  0x2b   : > { %989 = vperm.xlu1 %2503, %v902_v58   ;;  %977 = vperm.xlu0 %2502, %v901_v59   ;;  %v737_v50 = vunpack.c.l.s4 %v2550_v49 }
  0x2c   : > { %v395_v60 = vrot.slane %v394_v56, 2  ;;  %v423_v63 = vadd.f32 %v422_v61, %v421_v57  ;;  %v2180_v57 = vld [vmem:[%s3079_s1] ss:$0 sm:$0xff] }
  0x2e   : > { %v396_v62 = vadd.f32 %v395_v60, %v394_v56  ;;  %v424_v7 = vrot.slane %v423_v63, 2 }
  0x2f   : > { %745 = vperm.xlu1 %2503, %v724_v0   ;;  %733 = vperm.xlu0 %2502, %v723_v1  }
  0x30   : > { %v397_v4 = vrot.slane %v396_v62, 1  ;;  %v425_v9 = vadd.f32 %v424_v7, %v423_v63 }
  0x32   : > { %v398_v8 = vadd.f32 %v397_v4, %v396_v62  ;;  %v426_v13 = vrot.slane %v425_v9, 1 }
  0x33   : > { %769 = vperm.xlu1 %2503, %v726_v10   ;;  %757 = vperm.xlu0 %2502, %v725_v12  }
  0x34   : > { %2316 = vmatmul.mubr.msk.f32.vlgmr.msra.gmra.mrb[0].mxu0 %vm377_vm1, %v398_v8  ;;  %v427_v14 = vadd.f32 %v426_v13, %v425_v9 }
  0x35   : > { %2364 = vmatpush3.bf16.msra.mxu0 %v2773_v24 }
  0x36   : > { %2321 = vmatmul.mubr.msk.f32.vlgmr.msra.gmra.mrb[0].mxu1 %vm377_vm1, %v427_v14  ;;  %2485 = vmatprep.subr.msk.bf16.mxu0 %vm698_vm3, %v2784_v26 }
  0x37   : > { %793 = vperm.xlu1 %2503, %v728_v15   ;;  %781 = vperm.xlu0 %2502, %v727_v17   ;;  %v738_v15 = vunpack.c.0.s8 %v737_v50 }
  0x38   : > { %2324 = vmatpush3.bf16.msra.mxu1 %v1192_v21 }
  0x39   : > { %2480 = vmatprep.subr.msk.bf16.mxu1 %vm698_vm3, %v2779_v25 }
  0x3b   : > { %817 = vperm.xlu1 %2503, %v730_v18   ;;  %805 = vperm.xlu0 %2502, %v729_v19  }
  0x9e   : > { %v2790_v37 = vpop.permute.xlu1 %929  ;;  %v2792_v38 = vpop.permute.xlu0 %905 }
  0xa2   : > { %v2794_v42 = vpop.permute.xlu1 %941  ;;  %v2796_v43 = vpop.permute.xlu0 %917 }
  0xa6   : > { %v2798_v45 = vpop.permute.xlu1 %965  ;;  %v2800_v46 = vpop.permute.xlu0 %953 }
 0x107   : > { %v497_v27 = vpop.f32.mrb[0].mxu0 }
 0x108   : > { %v501_v28 = vmul.f32 0.0078125, %v497_v27  ;;  %v2317_v29 = vpop.f32.mrb[1].mxu0 }
 0x109   : > { %v571_v31 = vpop.f32.mrb[0].mxu1 }
 0x10a   : > { %v576_v30 = vmul.f32 %v501_v28, %v501_v28  ;;  %v2322_v33 = vpop.f32.mrb[1].mxu1  ;;  %v575_v35 = vmul.f32 0.0078125, %v571_v31  ;;  %v581_v44 = vrot.slane %v501_v28, %v580_v41 }
 0x10c   : > { %v577_v36 = vsub.f32 %v575_v35, %v576_v30  ;;  %v582_v48 = vsub.f32 %v2646_v2, %v581_v44  ;;  %v583_v51 = vsub.f32 %v2649_v3, %v581_v44  ;;  %v586_v52 = vsub.f32 %v2666_v11, %v581_v44 }
 0x10d   : > { %v587_v53 = vsub.f32 %v2675_v16, %v581_v44  ;;  %v584_v55 = vsub.f32 %v2652_v5, %v581_v44  ;;  %v585_v56 = vsub.f32 %v2655_v6, %v581_v44  ;;  %v588_v58 = vsub.f32 %v2686_v23, %v581_v44  ;;  %v2181_v5 = vld [vmem:[%s3080_s2] ss:$0 sm:$0xff]  ;;  %v2816_v16 = vpop.permute.xlu1 %989  ;;  %v2818_v6 = vpop.permute.xlu0 %977 }
 0x10e   : > { %v590_v40 = vadd.f32 1e-05, %v577_v36  ;;  %v589_v2 = vsub.f32 %v2701_v32, %v581_v44  ;;  %v2845_v35 = vsub.s32 %v738_v15, %v579_v39 }
 0x110   : > { %2504 = vrsqrt.f32 %v590_v40  ;;  %v938_v44 = vrot.slane %v2790_v37, %v2845_v35  ;;  %v974_v37 = vrot.slane %v2798_v45, %v2845_v35 }
 0x111   : > { %v2840_v31 = vpop.permute.xlu1 %745  ;;  %v2842_v33 = vpop.permute.xlu0 %733 }
 0x115   : > { %v758_v39 = vpop.permute.xlu0 %757 }
 0x11a   : > { %v2505_v47 = vpop.eup %2504 }
 0x11b   : > { %v595_v54 = vrot.slane %v2505_v47, %v580_v41  ;;  %v950_v47 = vrot.slane %v2794_v42, %v2845_v35  ;;  %v962_v42 = vrot.slane %v2800_v46, %v2845_v35 }
 0x11d   : > { %v600_v59 = vmul.f32 %v595_v54, %v586_v52  ;;  %v601_v60 = vmul.f32 %v595_v54, %v587_v53  ;;  %v596_v3 = vmul.f32 %v595_v54, %v582_v48  ;;  %v597_v61 = vmul.f32 %v595_v54, %v583_v51  ;;  %v770_v48 = vpop.permute.xlu1 %769 }
 0x11e   : > { %v598_v11 = vmul.f32 %v595_v54, %v584_v55  ;;  %v599_v62 = vmul.f32 %v595_v54, %v585_v56  ;;  %v602_v63 = vmul.f32 %v595_v54, %v588_v58  ;;  %v603_v0 = vmul.f32 %v595_v54, %v589_v2  ;;  %v782_v56 = vpop.permute.xlu0 %781 }
 0x11f   : > { %v615_v1 = vmul.f32 %v2180_v57, %v600_v59  ;;  %v616_v23 = vmul.f32 %v2180_v57, %v601_v60  ;;  %v611_v4 = vmul.f32 %v2180_v57, %v596_v3  ;;  %v612_v32 = vmul.f32 %v2180_v57, %v597_v61 }
 0x120   : > { %v613_v7 = vmul.f32 %v2180_v57, %v598_v11  ;;  %v614_v8 = vmul.f32 %v2180_v57, %v599_v62  ;;  %v617_v9 = vmul.f32 %v2180_v57, %v602_v63  ;;  %v618_v10 = vmul.f32 %v2180_v57, %v603_v0 }
 0x121   : > { %v2820_v12 = vadd.f32 %v2181_v5, %v611_v4  ;;  %v2822_v13 = vadd.f32 %v2181_v5, %v612_v32  ;;  %v2824_v14 = vadd.f32 %v2181_v5, %v615_v1  ;;  %v2830_v19 = vadd.f32 %v2181_v5, %v616_v23  ;;  %v794_v55 = vpop.permute.xlu1 %793 }
 0x122   : > { %v2826_v17 = vadd.f32 %v2181_v5, %v613_v7  ;;  %v2828_v18 = vadd.f32 %v2181_v5, %v614_v8  ;;  %v2834_v27 = vadd.f32 %v2181_v5, %v617_v9  ;;  %v2838_v30 = vadd.f32 %v2181_v5, %v618_v10  ;;  %v806_v9 = vpop.permute.xlu0 %805 }
 0x123   : > { %v2182_v20 = vmul.f32 -1.442695, %v2820_v12  ;;  %v2183_v21 = vmul.f32 -1.442695, %v2822_v13  ;;  %v2186_v34 = vmul.f32 -1.442695, %v2824_v14  ;;  %v2195_v49 = vcombine.low %v938_v44, %v950_v47 }
 0x124   : > { %v2184_v28 = vmul.f32 -1.442695, %v2826_v17  ;;  %v2185_v29 = vmul.f32 -1.442695, %v2828_v18  ;;  %v2187_v36 = vmul.f32 -1.442695, %v2830_v19  ;;  %v914_v51 = vrot.slane %v2792_v38, %v2845_v35 }
 0x125   : > { %2506 = vpow2.f32 %v2182_v20  ;;  %v2188_v40 = vmul.f32 -1.442695, %v2834_v27  ;;  %v2189_v41 = vmul.f32 -1.442695, %v2838_v30  ;;  %v926_v52 = vrot.slane %v2796_v43, %v2845_v35  ;;  %v818_v8 = vpop.permute.xlu1 %817 }
 0x126   : > { %2508 = vpow2.f32 %v2183_v21  ;;  %v1029_v59 = vshrl.u32 %v2195_v49, 16  ;;  %v1032_v60 = vshll.u32 %v2195_v49, 16  ;;  %v998_v11 = vrot.slane %v2816_v16, %v2845_v35 }
 0x127   : > { %2510 = vpow2.f32 %v2184_v28  ;;  %v2194_v43 = vcombine.low %v914_v51, %v926_v52  ;;  %v2196_v46 = vcombine.low %v962_v42, %v974_v37  ;;  %v986_v5 = vrot.slane %v2818_v6, %v2845_v35 }
 0x128   : > { %2512 = vpow2.f32 %v2185_v29  ;;  %v754_v1 = vrot.slane %v2840_v31, %v2845_v35  ;;  %v742_v23 = vrot.slane %v2842_v33, %v2845_v35  ;;  %v778_v16 = vrot.slane %v770_v48, %v2845_v35 }
 0x129   : > { %2514 = vpow2.f32 %v2186_v34  ;;  %v766_v7 = vrot.slane %v758_v39, %v2845_v35  ;;  %v1021_v6 = vshrl.u32 %v2194_v43, 16  ;;  %v1024_v10 = vshll.u32 %v2194_v43, 16 }
 0x12a   : > { %2516 = vpow2.f32 %v2187_v36  ;;  %v1038_v20 = vshrl.u32 %v2196_v46, 16  ;;  %v2197_v21 = vcombine.low %v986_v5, %v998_v11  ;;  %v802_v28 = vrot.slane %v794_v55, %v2845_v35 }
 0x12b   : > { %2518 = vpow2.f32 %v2188_v40  ;;  %v790_v29 = vrot.slane %v782_v56, %v2845_v35  ;;  %v826_v31 = vrot.slane %v818_v8, %v2845_v35  ;;  %v814_v33 = vrot.slane %v806_v9, %v2845_v35 }
 0x12c   : > { %2520 = vpow2.f32 %v2189_v41  ;;  %v1041_v34 = vshll.u32 %v2196_v46, 16  ;;  %v2190_v36 = vcombine.low %v742_v23, %v754_v1  ;;  %v1031_v40 = vrot.slane %v1029_v59, 3 }
 0x12d   : > { %v2191_v41 = vcombine.low %v766_v7, %v778_v16  ;;  %v1034_v47 = vrot.slane %v1032_v60, 4  ;;  %v1023_v48 = vrot.slane %v1021_v6, 3  ;;  %v1026_v39 = vrot.slane %v1024_v10, 4 }
 0x12e   : > { %v1047_v49 = vshrl.u32 %v2197_v21, 16  ;;  %v1040_v52 = vrot.slane %v1038_v20, 3  ;;  %v1043_v55 = vrot.slane %v1041_v34, 4  ;;  %v1050_v35 = vshll.u32 %v2197_v21, 16 }
 0x12f   : > { %v2507_v50 = vpop.eup %2506  ;;  %v849_v56 = vshrl.u32 %v2190_v36, 16  ;;  %v857_v59 = vshrl.u32 %v2191_v41, 16  ;;  %v860_v60 = vshll.u32 %v2191_v41, 16 }
 0x130   : > { %v2509_v53 = vpop.eup %2508  ;;  %v658_v54 = vadd.f32 1.0, %v2507_v50 }
 0x131   : > { %v2511_v57 = vpop.eup %2510  ;;  %v659_v58 = vadd.f32 1.0, %v2509_v53  ;;  %v2192_v53 = vcombine.low %v790_v29, %v802_v28  ;;  %v859_v8 = vrot.slane %v857_v59, 4  ;;  %v862_v9 = vrot.slane %v860_v60, 5  ;;  %v2911_v59 = vld [vmem:[%s3082_s4 + $0x8] sm:$0xf] }
 0x132   : > { %v2513_v2 = vpop.eup %2512  ;;  %v660_v3 = vadd.f32 1.0, %v2511_v57  ;;  %2522 = vrcp.f32 %v658_v54  ;;  %v2193_v54 = vcombine.low %v814_v33, %v826_v31  ;;  %v1027_v31 = vor.u32 %v1026_v39, %v1023_v48 }
 0x133   : > { %v2515_v38 = vpop.eup %2514  ;;  %v661_v61 = vadd.f32 1.0, %v2513_v2  ;;  %2524 = vrcp.f32 %v659_v58  ;;  %v852_v2 = vshll.u32 %v2190_v36, 16  ;;  %v1044_v33 = vor.u32 %v1043_v55, %v1040_v52 }
 0x134   : > { %v2517_v45 = vpop.eup %2516  ;;  %v662_v62 = vadd.f32 1.0, %v2515_v38  ;;  %2526 = vrcp.f32 %v660_v3  ;;  %v863_v41 = vor.u32 %v862_v9, %v859_v8  ;;  %v1272_v55 = vsel %vm698_vm3, %v2779_v25, 0 }
 0x135   : > { %v2519_v63 = vpop.eup %2518  ;;  %v663_v0 = vadd.f32 1.0, %v2517_v45  ;;  %2528 = vrcp.f32 %v661_v61  ;;  %v866_v45 = vshrl.u32 %v2192_v53, 16 }
 0x136   : > { %v2521_v4 = vpop.eup %2520  ;;  %2530 = vrcp.f32 %v662_v62  ;;  %v664_v32 = vadd.f32 1.0, %v2519_v63  ;;  %v875_v62 = vshrl.u32 %v2193_v54, 16 }
 0x137   : > { %2532 = vrcp.f32 %v663_v0  ;;  %v665_v15 = vadd.f32 1.0, %v2521_v4  ;;  %v878_v0 = vshll.u32 %v2193_v54, 16  ;;  %v1052_v4 = vrot.slane %v1050_v35, 4 }
 0x138   : > { %2534 = vrcp.f32 %v664_v32  ;;  %v854_v32 = vrot.slane %v852_v2, 5  ;;  %v868_v6 = vrot.slane %v866_v45, 4 }
 0x139   : > { %2536 = vrcp.f32 %v665_v15  ;;  %v880_v28 = vrot.slane %v878_v0, 5 }
 0x13c   : > { %v2523_v44 = vpop.eup %2522 }
 0x13d   : > { %v2525_v50 = vpop.eup %2524  ;;  %v682_v51 = vmul.f32 %v2523_v44, %v2820_v12  ;;  %v1049_v12 = vrot.slane %v1047_v49, 3 }
 0x13e   : > { %v2527_v37 = vpop.eup %2526  ;;  %v683_v42 = vmul.f32 %v2525_v50, %v2822_v13  ;;  %v869_v13 = vshll.u32 %v2192_v53, 16 }
 0x13f   : > { %v2529_v57 = vpop.eup %2528  ;;  %v684_v58 = vmul.f32 %v2527_v37, %v2826_v17 }
 0x140   : > { %v2531_v3 = vpop.eup %2530  ;;  %v685_v38 = vmul.f32 %v2529_v57, %v2828_v18  ;;  %v690_v61 = vpack.c.bf16 %v683_v42, %v682_v51  ;;  %v851_v18 = vrot.slane %v849_v56, 4  ;;  %v871_v10 = vrot.slane %v869_v13, 5 }
 0x141   : > { %v2533_v43 = vpop.eup %2532  ;;  %v686_v11 = vmul.f32 %v2531_v3, %v2824_v14 }
 0x142   : > { %v2535_v46 = vpop.eup %2534  ;;  %v687_v5 = vmul.f32 %v2533_v43, %v2830_v19  ;;  %v691_v63 = vpack.c.bf16 %v685_v38, %v684_v58  ;;  %v699_v17 = vrot.slane %v690_v61, 4  ;;  %v877_v19 = vrot.slane %v875_v62, 4 }
 0x143   : > { %v2537_v1 = vpop.eup %2536  ;;  %v688_v23 = vmul.f32 %v2535_v46, %v2834_v27  ;;  %v1035_v27 = vor.u32 %v1034_v47, %v1031_v40  ;;  %v855_v36 = vor.u32 %v854_v32, %v851_v18  ;;  %v872_v40 = vor.u32 %v871_v10, %v868_v6 }
 0x144   : > { %v692_v16 = vpack.c.bf16 %v687_v5, %v686_v11  ;;  %v700_v7 = vrot.slane %v691_v63, 4  ;;  %712 = vst.msk [vmem:[#allocation2] sm:$0xf0] %vm711_vm4, %v699_v17  ;;  %v689_v14 = vmul.f32 %v2537_v1, %v2838_v30  ;;  %v1053_v30 = vor.u32 %v1052_v4, %v1049_v12 }
 0x145   : > { %v2891_v47 = vor.u32 %v880_v28, %v877_v19  ;;  %v1036_v50 = vsel %vm1019_vm6, %v1027_v31, %v1035_v27  ;;  %v1045_v52 = vsel %vm1019_vm6, %v1035_v27, %v1044_v33  ;;  %v864_v42 = vsel %vm847_vm8, %v855_v36, %v863_v41 }
 0x146   : > { %v701_v15 = vsel %vm698_vm3, %v699_v17, %v700_v7  ;;  %v702_v20 = vrot.slane %v692_v16, 4  ;;  %v693_v21 = vpack.c.bf16 %v689_v14, %v688_v23  ;;  %v1054_v37 = vsel %vm1019_vm6, %v1044_v33, %v1053_v30 }
 0x147   : > { %713 = vst.msk [vmem:[#allocation2 + $0x8] sm:$0xff] %vm377_vm1, %v701_v15  ;;  %v873_v58 = vsel %vm847_vm8, %v863_v41, %v872_v40  ;;  %v882_v2 = vsel %vm847_vm8, %v872_v40, %v2891_v47 }
 0x148   : > { %v703_v29 = vsel %vm698_vm3, %v700_v7, %v702_v20  ;;  %v704_v34 = vrot.slane %v693_v21, 4 }
 0x149   : > { %714 = vst.msk [vmem:[#allocation2 + $0x10] sm:$0xff] %vm377_vm1, %v703_v29 }
 0x14a   : > { %v705_v44 = vsel %vm698_vm3, %v702_v20, %v704_v34  ;;  %717 = vst.msk [vmem:[#allocation2 + $0x20] sm:$0xf] %vm716_vm5, %v704_v34 }
 0x14b   : > { %v893_v49 = vld [vmem:[#allocation2] sm:$0xf0]  ;;  %715 = vst.msk [vmem:[#allocation2 + $0x18] sm:$0xff] %vm377_vm1, %v705_v44 }
 0x14c   : > { %v718_v48 = vld [vmem:[#allocation2] sm:$0xf8]  ;;  %v1060_v51 = vmul.bf16 %v1027_v31, %v893_v49 }
 0x14d   : > { %v1172_v39 = vld [vmem:[#allocation2] sm:$0xff]  ;;  %v888_v53 = vmul.bf16 %v855_v36, %v718_v48 }
 0x14e   : > { %2325 = vmatprep.mubr.msk.bf16.mxu1 %vm377_vm1, %v1172_v39  ;;  %v2897_v54 = vld [vmem:[#allocation2] sm:$0xf0]  ;;  %v2903_v35 = vld [vmem:[#allocation2 + $0x8] sm:$0xff]  ;;  %v1120_v56 = vshll.u32 %v1060_v51, 16  ;;  %v1118_v3 = vshrl.u32 %v1060_v51, 16 }
 0x14f   : > { %v1067_v57 = vshrl.u32 %v888_v53, 16  ;;  %v1061_v60 = vmul.bf16 %v1036_v50, %v2903_v35  ;;  %v889_v38 = vmul.bf16 %v864_v42, %v2903_v35  ;;  %2326 = vmatmul.mubr.msk.bf16.vlgmr.msra.gmra.mrb[4].mxu1 %vm377_vm1, %v2903_v35  ;;  %v1554_v25 = vrot.slane %v2897_v54, 4 }
 0x150   : > { %v1122_v61 = vrot.slane %v1120_v56, 1  ;;  %v2918_v12 = vld [vmem:[#allocation2 + $0x10] sm:$0xff]  ;;  %v1070_v11 = vshll.u32 %v888_v53, 16  ;;  %v1555_v45 = vrot.slane %v2903_v35, 4  ;;  %2334 = vmatpush3.bf16.msra.mxu1 %v1272_v55 }
 0x151   : > { %v1069_v43 = vrot.slane %v1067_v57, 7  ;;  %v1125_v13 = vshll.u32 %v1061_v60, 16  ;;  %v1129_v62 = vshrl.u32 %v1061_v60, 16  ;;  %v1062_v46 = vmul.bf16 %v1045_v52, %v2918_v12  ;;  %v894_v5 = vld [vmem:[#allocation2 + $0x20] sm:$0x1f]  ;;  %2329 = vmatprep.mubr.msk.bf16.mxu1 %vm377_vm1, %v2918_v12  ;;  %2481 = vmatprep.subr.msk.bf16.mxu1 %vm698_vm3, %v2911_v59 }
 0x152   : > { %v1074_v63 = vshrl.u32 %v889_v38, 16  ;;  %v1123_v17 = vor.u32 %v1122_v61, %v1118_v3  ;;  %v2926_v0 = vld [vmem:[#allocation2 + $0x18] sm:$0xff]  ;;  %v1064_v1 = vmul.bf16 %v1053_v30, %v894_v5  ;;  %v1077_v4 = vshll.u32 %v889_v38, 16  ;;  %v722_v31 = vld [vmem:[#allocation2 + $0x20] sm:$0xf] }
 0x153   : > { %v1072_v23 = vor.u32 %v1070_v11, %v1069_v43  ;;  %v1127_v18 = vrot.slane %v1125_v13, 1  ;;  %v1133_v32 = vshll.u32 %v1062_v46, 16  ;;  %v1137_v16 = vshrl.u32 %v1062_v46, 16  ;;  %v2227_v60 = vld [vmem:[%s3082_s4 + $0x18] sm:$0xf] }
 0x154   : > { %v1063_v7 = vmul.bf16 %v1054_v37, %v2926_v0  ;;  %v1149_v14 = vshll.u32 %v1064_v1, 16  ;;  %v1153_v8 = vshrl.u32 %v1064_v1, 16  ;;  %v1076_v9 = vrot.slane %v1074_v63, 7  ;;  %v2212_v5 = vld [vmem:[%s3082_s4 + $0xc] sm:$0xf] }
 0x155   : > { %1111 = vst.msk [vmem:[#allocation2 + $0x28] sm:$0xf0] %vm711_vm4, %v1072_v23  ;;  %v890_v6 = vmul.bf16 %v873_v58, %v2918_v12  ;;  %v1128_v10 = vsel %vm1116_vm7, %v1123_v17, %v1127_v18  ;;  %v1131_v19 = vor.u32 %v1129_v62, %v1127_v18  ;;  %v1135_v15 = vrot.slane %v1133_v32, 1 }
 0x156   : > { %v1141_v20 = vshll.u32 %v1063_v7, 16  ;;  %1162 = vst.msk [vmem:[#allocation2 + $0x50] sm:$0xf0] %vm711_vm4, %v1128_v10  ;;  %v1145_v21 = vshrl.u32 %v1063_v7, 16  ;;  %v1151_v28 = vrot.slane %v1149_v14, 1  ;;  %v1079_v27 = vor.u32 %v1077_v4, %v1076_v9 }
 0x157   : > { %v1082_v29 = vshrl.u32 %v890_v6, 16  ;;  %v1136_v33 = vsel %vm1116_vm7, %v1131_v19, %v1135_v15  ;;  %v1139_v34 = vor.u32 %v1137_v16, %v1135_v15  ;;  %v1085_v36 = vshll.u32 %v890_v6, 16  ;;  %2330 = vmatmul.mubr.msk.bf16.gmra.mrb[8].mxu1 %vm377_vm1, %v2926_v0  ;;  %v2232_v14 = vld [vmem:[%s3082_s4 + $0x1c] sm:$0xf] }
 0x158   : > { %v1143_v30 = vrot.slane %v1141_v20, 1  ;;  %1163 = vst.msk [vmem:[#allocation2 + $0x58] sm:$0xff] %vm377_vm1, %v1136_v33  ;;  %v1155_v41 = vor.u32 %v1153_v8, %v1151_v28  ;;  %v1080_v44 = vsel %vm1065_vm9, %v1069_v43, %v1079_v27  ;;  %v891_v49 = vmul.bf16 %v882_v2, %v2926_v0 }
 0x159   : > { %v1084_v40 = vrot.slane %v1082_v29, 7  ;;  %1112 = vst.msk [vmem:[#allocation2 + $0x30] sm:$0xff] %vm377_vm1, %v1080_v44  ;;  %v892_v50 = vmul.bf16 %v2891_v47, %v722_v31  ;;  %v1556_v51 = vsel %vm698_vm3, %v1554_v25, %v1555_v45  ;;  %v1557_v54 = vrot.slane %v2918_v12, 4  ;;  %v2237_v29 = vld [vmem:[%s3082_s4 + $0x20] sm:$0xf] }
 0x15a   : > { %v1144_v48 = vsel %vm1116_vm7, %v1139_v34, %v1143_v30  ;;  %v1147_v39 = vor.u32 %v1145_v21, %v1143_v30  ;;  %1166 = vst.msk [vmem:[#allocation2 + $0x70] sm:$0xf] %vm716_vm5, %v1155_v41  ;;  %v1090_v53 = vshrl.u32 %v891_v49, 16  ;;  %2365 = vmatprep.mubr.msk.bf16.mxu0 %vm377_vm1, %v1556_v51  ;;  %v1685_v47 = vsel %vm698_vm3, %v2784_v26, 0 }
 0x15b   : > { %1164 = vst.msk [vmem:[#allocation2 + $0x60] sm:$0xff] %vm377_vm1, %v1144_v48  ;;  %v1087_v52 = vor.u32 %v1085_v36, %v1084_v40  ;;  %v1098_v42 = vshrl.u32 %v892_v50, 16  ;;  %v1093_v58 = vshll.u32 %v891_v49, 16  ;;  %v1558_v2 = vsel %vm698_vm3, %v1555_v45, %v1557_v54 }
 0x15c   : > { %v1152_v37 = vsel %vm1116_vm7, %v1147_v39, %v1151_v28  ;;  %v1167_v55 = vld [vmem:[#allocation2 + $0x28] sm:$0xff]  ;;  %v1092_v57 = vrot.slane %v1090_v53, 7  ;;  %v1101_v3 = vshll.u32 %v892_v50, 16  ;;  %2366 = vmatmul.mubr.msk.bf16.vlgmr.msra.gmra.mrb[4].mxu0 %vm377_vm1, %v1558_v2  ;;  %v1358_v45 = vsel %vm698_vm3, %v2911_v59, 0  ;;  %v1851_v39 = vld [vmem:[#allocation2 + $0x20] sm:$0xff] }
 0x15d   : > { %1165 = vst.msk [vmem:[#allocation2 + $0x68] sm:$0xff] %vm377_vm1, %v1152_v37  ;;  %v1088_v56 = vsel %vm1065_vm9, %v1076_v9, %v1087_v52  ;;  %2335 = vmatprep.mubr.msk.bf16.mxu1 %vm377_vm1, %v1167_v55  ;;  %v1100_v26 = vrot.slane %v1098_v42, 7  ;;  %v1651_v38 = vld [vmem:[#allocation2 + $0x50] sm:$0xf0]  ;;  %2374 = vmatpush3.bf16.msra.mxu0 %v1685_v47  ;;  %v1776_v16 = vsel %vm698_vm3, %v2227_v60, 0  ;;  %v1467_v15 = vsel %vm698_vm3, %v2212_v5, 0 }
 0x15e   : > { %1113 = vst.msk [vmem:[#allocation2 + $0x38] sm:$0xff] %vm377_vm1, %v1088_v56  ;;  %v1095_v25 = vor.u32 %v1093_v58, %v1092_v57  ;;  %v1663_v61 = vrot.slane %v1651_v38, 4  ;;  %2486 = vmatprep.subr.msk.bf16.mxu0 %vm698_vm3, %v2227_v60  ;;  %v1339_v9 = vld [vmem:[#allocation2 + $0x50] sm:$0xff]  ;;  %v1433_v20 = vld [vmem:[#allocation2 + $0x28] sm:$0xf0]  ;;  %v1867_v28 = vsel %vm698_vm3, %v2232_v14, 0 }
 0x15f   : > { %v1103_v43 = vor.u32 %v1101_v3, %v1100_v26  ;;  %v2965_v11 = vld [vmem:[#allocation2 + $0x58] sm:$0xff]  ;;  %v1445_v27 = vrot.slane %v1433_v20, 4  ;;  %v1958_v49 = vsel %vm698_vm3, %v2237_v29, 0  ;;  %v2243_v60 = vld [vmem:[%s341_s15] ss:$0 sm:$0xff] }
 0x160   : > { %v1096_v13 = vsel %vm1065_vm9, %v1084_v40, %v1095_v25  ;;  %v1168_v62 = vld [vmem:[#allocation2 + $0x30] sm:$0xff]  ;;  %v1664_v46 = vrot.slane %v2965_v11, 4  ;;  %v1559_v40 = vrot.slane %v2926_v0, 4 }
 0x161   : > { %v1104_v63 = vsel %vm1065_vm9, %v1092_v57, %v1103_v43  ;;  %1114 = vst.msk [vmem:[#allocation2 + $0x40] sm:$0xff] %vm377_vm1, %v1096_v13  ;;  %2336 = vmatmul.mubr.msk.bf16.vlgmr.msra.gmra.mrb[4].mxu1 %vm377_vm1, %v1168_v62  ;;  %v1655_v6 = vld [vmem:[#allocation2 + $0x70] sm:$0xf]  ;;  %v1446_v21 = vrot.slane %v1168_v62, 4  ;;  %v2242_v57 = vld [vmem:[%s3083_s5] ss:$0 sm:$0xff] }
 0x162   : > { %v2978_v17 = vld [vmem:[#allocation2 + $0x60] sm:$0xff]  ;;  %1115 = vst.msk [vmem:[#allocation2 + $0x48] sm:$0xf] %vm716_vm5, %v1104_v63  ;;  %v1665_v59 = vsel %vm698_vm3, %v1663_v61, %v1664_v46  ;;  %2344 = vmatpush3.bf16.msra.mxu1 %v1358_v45  ;;  %v1670_v10 = vrot.slane %v1655_v6, 4 }
 0x163   : > { %v1666_v1 = vrot.slane %v2978_v17, 4  ;;  %2375 = vmatprep.mubr.msk.bf16.mxu0 %vm377_vm1, %v1665_v59  ;;  %2482 = vmatprep.subr.msk.bf16.mxu1 %vm698_vm3, %v2212_v5  ;;  %v1447_v31 = vsel %vm698_vm3, %v1445_v27, %v1446_v21 }
 0x164   : > { %v2984_v23 = vld [vmem:[#allocation2 + $0x68] sm:$0xff] }
 0x165   : > { %v1169_v4 = vld [vmem:[#allocation2 + $0x38] sm:$0xff]  ;;  %v1668_v18 = vrot.slane %v2984_v23, 4  ;;  %v1667_v32 = vsel %vm698_vm3, %v1664_v46, %v1666_v1 }
 0x166   : > { %2339 = vmatprep.mubr.msk.bf16.mxu1 %vm377_vm1, %v1169_v4 }
 0x167   : > { %v1669_v8 = vsel %vm698_vm3, %v1666_v1, %v1668_v18  ;;  %v1671_v19 = vsel %vm698_vm3, %v1668_v18, %v1670_v10 }
 0x168   : > { %v1170_v7 = vld [vmem:[#allocation2 + $0x40] sm:$0xff]  ;;  %2376 = vmatmul.mubr.msk.bf16.vlgmr.msra.gmra.mrb[4].mxu0 %vm377_vm1, %v1667_v32 }
 0x169   : > { %2340 = vmatmul.mubr.msk.bf16.gmra.mrb[8].mxu1 %vm377_vm1, %v1170_v7  ;;  %2384 = vmatpush3.bf16.msra.mxu0 %v1776_v16  ;;  %v1450_v33 = vrot.slane %v1170_v7, 4  ;;  %v1760_v34 = vld [vmem:[#allocation2 + $0x48] sm:$0xff] }
 0x16a   : > { %2379 = vmatprep.mubr.msk.bf16.mxu0 %vm377_vm1, %v1669_v8  ;;  %2345 = vmatprep.mubr.msk.bf16.mxu1 %vm377_vm1, %v1339_v9  ;;  %v1437_v41 = vld [vmem:[#allocation2 + $0x48] sm:$0xf] }
 0x16b   : > { %2487 = vmatprep.subr.msk.bf16.mxu0 %vm698_vm3, %v2232_v14  ;;  %v1452_v44 = vrot.slane %v1437_v41, 4 }
 0x16d   : > { %v1453_v48 = vsel %vm698_vm3, %v1450_v33, %v1452_v44 }
 0x170   : > { %2380 = vmatmul.mubr.msk.bf16.gmra.mrb[8].mxu0 %vm377_vm1, %v1671_v19 }
 0x171   : > { %2346 = vmatmul.mubr.msk.bf16.vlgmr.msra.gmra.mrb[4].mxu1 %vm377_vm1, %v2965_v11  ;;  %2385 = vmatprep.mubr.msk.bf16.mxu0 %vm377_vm1, %v1168_v62 }
 0x172   : > { %2349 = vmatprep.mubr.msk.bf16.mxu1 %vm377_vm1, %v2978_v17  ;;  %2354 = vmatpush3.bf16.msra.mxu1 %v1467_v15 }
 0x173   : > { %2484 = vmatprep.subr.msk.bf16.mxu1 %vm698_vm3, %v2767_v22  ;;  %v1448_v22 = vrot.slane %v1169_v4, 4 }
 0x175   : > { %v1449_v30 = vsel %vm698_vm3, %v1446_v21, %v1448_v22  ;;  %v1451_v36 = vsel %vm698_vm3, %v1448_v22, %v1450_v33 }
 0x178   : > { %2386 = vmatmul.mubr.msk.bf16.vlgmr.msra.gmra.mrb[4].mxu0 %vm377_vm1, %v1169_v4 }
 0x179   : > { %2350 = vmatmul.mubr.msk.bf16.gmra.mrb[8].mxu1 %vm377_vm1, %v2984_v23  ;;  %2394 = vmatpush3.bf16.msra.mxu0 %v1867_v28 }
 0x17a   : > { %2389 = vmatprep.mubr.msk.bf16.mxu0 %vm377_vm1, %v1170_v7  ;;  %2355 = vmatprep.mubr.msk.bf16.mxu1 %vm377_vm1, %v1447_v31 }
 0x17b   : > { %2488 = vmatprep.subr.msk.bf16.mxu0 %vm698_vm3, %v2237_v29 }
 0x180   : > { %2390 = vmatmul.mubr.msk.bf16.gmra.mrb[8].mxu0 %vm377_vm1, %v1760_v34 }
 0x181   : > { %2356 = vmatmul.mubr.msk.bf16.vlgmr.msra.gmra.mrb[4].mxu1 %vm377_vm1, %v1449_v30  ;;  %2395 = vmatprep.mubr.msk.bf16.mxu0 %vm377_vm1, %v2903_v35  ;;  %v1546_v35 = vld [vmem:[#allocation2 + $0x20] sm:$0xf] }
 0x182   : > { %2359 = vmatprep.mubr.msk.bf16.mxu1 %vm377_vm1, %v1451_v36  ;;  %2414 = vmatpush3.bf16.msra.mxu1 %v2773_v24  ;;  %v1560_v24 = vsel %vm698_vm3, %v1557_v54, %v1559_v40  ;;  %v1561_v50 = vrot.slane %v1546_v35, 4 }
 0x184   : > { %v1562_v51 = vsel %vm698_vm3, %v1559_v40, %v1561_v50 }
 0x188   : > { %2396 = vmatmul.mubr.msk.bf16.vlgmr.msra.gmra.mrb[4].mxu0 %vm377_vm1, %v2918_v12  ;;  %v1942_v12 = vld [vmem:[#allocation2 + $0x70] sm:$0xff] }
 0x189   : > { %2360 = vmatmul.mubr.msk.bf16.gmra.mrb[8].mxu1 %vm377_vm1, %v1453_v48  ;;  %2404 = vmatpush3.bf16.msra.mxu0 %v1958_v49 }
 0x18a   : > { %2399 = vmatprep.mubr.msk.bf16.mxu0 %vm377_vm1, %v2926_v0  ;;  %2369 = vmatprep.mubr.msk.bf16.mxu1 %vm377_vm1, %v1560_v24 }
 0x190   : > { %2400 = vmatmul.mubr.msk.bf16.gmra.mrb[8].mxu0 %vm377_vm1, %v1851_v39 }
 0x191   : > { %2405 = vmatprep.mubr.msk.bf16.mxu0 %vm377_vm1, %v2965_v11 }
 0x195   : > { %2370 = vmatmul.mubr.msk.bf16.vlgmr.msra.gmra.mrb[8].mxu1 %vm377_vm1, %v1562_v51 }
 0x198   : > { %2406 = vmatmul.mubr.msk.bf16.vlgmr.msra.gmra.mrb[4].mxu0 %vm377_vm1, %v2978_v17 }
 0x199   : > { %2409 = vmatprep.mubr.msk.bf16.mxu0 %vm377_vm1, %v2984_v23 }
 0x1a0   : > { %2410 = vmatmul.mubr.msk.bf16.gmra.mrb[8].mxu0 %vm377_vm1, %v1942_v12 }
 0x254   : > { %v2357_v0 = vpop.f32.mrb[4].mxu1 }
 0x255   : > { %v1503_v52 = vpop.f32.mrb[5].mxu1 }
 0x256   : > { %v2358_v53 = vpop.f32.mrb[6].mxu1 }
 0x257   : > { %v1506_v54 = vpop.f32.mrb[7].mxu1 }
 0x268   : > { %v2371_v37 = vpop.f32.mrb[8].mxu1 }
 0x269   : > { %v1628_v42 = vpop.f32.mrb[9].mxu1 }
 0x26a   : > { %v2372_v47 = vpop.f32.mrb[10].mxu1 }
 0x26b   : > { %v1631_v55 = vpop.f32.mrb[11].mxu1  ;;  %v2407_v56 = vpop.f32.mrb[4].mxu0 }
 0x26c   : > { %v2415_v58 = vadd.f32 %v2407_v56, %v2357_v0  ;;  %v1994_v2 = vpop.f32.mrb[5].mxu0 }
 0x26d   : > { %v2416_v26 = vadd.f32 %v1994_v2, %v1503_v52  ;;  %v2408_v3 = vpop.f32.mrb[6].mxu0 }
 0x26e   : > { %v2042_v38 = vadd.f32 %v2415_v58, %v2242_v57  ;;  %v2417_v25 = vadd.f32 %v2408_v3, %v2358_v53  ;;  %v1997_v61 = vpop.f32.mrb[7].mxu0 }
 0x26f   : > { %v2040_v43 = vadd.f32 %v2416_v26, %v2242_v57  ;;  %v2418_v11 = vadd.f32 %v1997_v61, %v1506_v54 }
 0x270   : > { %v2057_v45 = vadd.f32 %v2243_v60, %v2042_v38  ;;  %v2043_v13 = vadd.f32 %v2417_v25, %v2242_v57 }
 0x271   : > { %v2055_v62 = vadd.f32 %v2243_v60, %v2040_v43  ;;  %v2041_v46 = vadd.f32 %v2418_v11, %v2242_v57 }
 0x272   : > { %v2258_v5 = vpack.c.bf16 %v2057_v45, %v2057_v45  ;;  %v2058_v63 = vadd.f32 %v2243_v60, %v2043_v13 }
 0x273   : > { %v2256_v17 = vpack.c.bf16 %v2055_v62, %v2055_v62  ;;  %v2056_v59 = vadd.f32 %v2243_v60, %v2041_v46  ;;  %v2411_v1 = vpop.f32.mrb[8].mxu0 }
 0x274   : > { %2098 = vst.msk [vmem:[%s2625_s22 + $0x8] sm:$0xf] %vm2095_vm10, %v2258_v5  ;;  %v2259_v23 = vpack.c.bf16 %v2058_v63, %v2058_v63  ;;  %v2419_v4 = vadd.f32 %v2411_v1, %v2371_v37  ;;  %v2010_v18 = vpop.f32.mrb[9].mxu0 }
 0x275   : > { %2096 = vst.msk [vmem:[%s2625_s22] sm:$0xf] %vm2095_vm10, %v2256_v17  ;;  %v2257_v32 = vpack.c.bf16 %v2056_v59, %v2056_v59  ;;  %v2420_v16 = vadd.f32 %v2010_v18, %v1628_v42  ;;  %v2412_v7 = vpop.f32.mrb[10].mxu0 }
 0x276   : > { %2099 = vst.msk [vmem:[%s2625_s22 + $0xc] sm:$0xf] %vm2095_vm10, %v2259_v23  ;;  %v2046_v14 = vadd.f32 %v2419_v4, %v2242_v57  ;;  %v2421_v8 = vadd.f32 %v2412_v7, %v2372_v47  ;;  %v2013_v9 = vpop.f32.mrb[11].mxu0 }
 0x277   : > { %2097 = vst.msk [vmem:[%s2625_s22 + $0x4] sm:$0xf] %vm2095_vm10, %v2257_v32  ;;  %v2044_v6 = vadd.f32 %v2420_v16, %v2242_v57  ;;  %v2422_v10 = vadd.f32 %v2013_v9, %v1631_v55 }
 0x278   : > { %v2061_v19 = vadd.f32 %v2243_v60, %v2046_v14  ;;  %v2047_v15 = vadd.f32 %v2421_v8, %v2242_v57 }
 0x279   : > { %v2059_v20 = vadd.f32 %v2243_v60, %v2044_v6  ;;  %v2045_v21 = vadd.f32 %v2422_v10, %v2242_v57 }
 0x27a   : > { %v2262_v28 = vpack.c.bf16 %v2061_v19, %v2061_v19  ;;  %v2062_v27 = vadd.f32 %v2243_v60, %v2047_v15 }
 0x27b   : > { %v2260_v29 = vpack.c.bf16 %v2059_v20, %v2059_v20  ;;  %v2060_v31 = vadd.f32 %v2243_v60, %v2045_v21 }
 0x27c   : > { %2102 = vst.msk [vmem:[%s2625_s22 + $0x18] sm:$0xf] %vm2095_vm10, %v2262_v28  ;;  %v2263_v22 = vpack.c.bf16 %v2062_v27, %v2062_v27 }
 0x27d   : > { %2100 = vst.msk [vmem:[%s2625_s22 + $0x10] sm:$0xf] %vm2095_vm10, %v2260_v29  ;;  %v2261_v33 = vpack.c.bf16 %v2060_v31, %v2060_v31 }
 0x27e   : > { %2103 = vst.msk [vmem:[%s2625_s22 + $0x1c] sm:$0xf] %vm2095_vm10, %v2263_v22 }
 0x27f   : > { %2101 = vst.msk [vmem:[%s2625_s22 + $0x14] sm:$0xf] %vm2095_vm10, %v2261_v33 }
 0x280 PF: > { %s19_s30 = sadd.s32 1, %s2544_s30  }
 0x281   : > { %p16_p5 = scmp.ge.s32.totalorder %s19_s30, 4  }
 0x283   :  { %18 = sbr.rel (!%p16_p5) target bundleno = 1 (0x1), region = 103 }

// kernel: resnet_block_with_attn.5
= control target key start
LH: loop header
LB: loop body
LE: loop exit
PB: predicated region body
PF: predicated region fallthrough
CT: control target
= control target key end

     0   :  { %s2906_s17 = smov 0   ;;  %s3358_s0 = inlined_call_operand.vmem [shape: bf16[2,64,16], index: 0, kind: input, shape index: {}]   ;;  %s3359_s1 = inlined_call_operand.vmem [shape: f32[1,16], index: 1, kind: input, shape index: {}]   ;;  %s3360_s2 = inlined_call_operand.vmem [shape: f32[1,16], index: 2, kind: input, shape index: {}]   ;;  %s3361_s3 = inlined_call_operand.vmem [shape: f32[16,16], index: 3, kind: input, shape index: {}]   ;;  %s3362_s4 = inlined_call_operand.vmem [shape: bf16[9,16,16], index: 4, kind: input, shape index: {}]   ;;  %s3363_s5 = inlined_call_operand.vmem [shape: f32[1,16], index: 5, kind: input, shape index: {}]   ;;  %s3364_s6 = inlined_call_operand.vmem [shape: bf16[64,1], index: 6, kind: input, shape index: {}]   ;;  %s3365_s7 = inlined_call_operand.vmem [shape: bf16[64,1], index: 7, kind: input, shape index: {}]   ;;  %s3366_s8 = inlined_call_operand.vmem [shape: f32[2,64,8], index: 8, kind: input, shape index: {}]   ;;  %s3367_s9 = inlined_call_operand.vmem [shape: bf16[8,16], index: 9, kind: input, shape index: {}]   ;;  %s3368_s10 = inlined_call_operand.vmem [shape: f32[1,16], index: 10, kind: input, shape index: {}]   ;;  %s3369_s11 = inlined_call_operand.vmem [shape: bf16[2,64,16], index: 11, kind: output, shape index: {}]  }
   0x1 LB: > { %s2377_s18 = sadd.s32 4294967295, %s2838_s17   ;;  %p2381_p0 = scmp.ge.s32.totalorder %s2838_s17, 1  ;;  %s2838_s17 = sphi %s2906_s17, %s21_s17  }
   0x2   : > { %p347_p1 = scmp.lt.s32.totalorder %s2838_s17, 3 }
   0x4   : > { %p348_p2 = pnand %p2381_p0, %p347_p1 }
   0x5   : > { %p392_p3 = scmp.lt.s32.totalorder (!%p348_p2), %s2377_s18, 1  ;;  %p2388_p4 = scmp.ne.s32.totalorder (!%p348_p2), %s2377_s18, 0 }
   0x6   : > { %351 = sbr.rel (%p348_p2) target bundleno = 655 (0x28f), region = 64 }
   0xd   : > { %s393_s19 = scalar_select %p392_p3, %s2377_s18, 1 }
   0xe   : > { %411 = sbr.rel (%p2388_p4) target bundleno = 23 (0x17), region = 68  ;;  %vm412_vm0 = vcmask (!%p2388_p4), 130048   ;;  %v2840_v0 = vmov (!%p2388_p4), 0  }
   0xf   : > { %s2486_s20 = sshll.u32 %s393_s19, 5  ;;  %s2487_s21 = sshll.u32 %s393_s19, 6  ;;  %413 = vst.msk [vmem:[#allocation2] sm:$0xff] (!%p2388_p4), %vm412_vm0, %v2840_v0  ;;  %414 = vst.msk [vmem:[#allocation2 + $0x8] sm:$0xff] (!%p2388_p4), %vm412_vm0, %v2840_v0 }
  0x10   : > { %s2917_s24 = scalar_lea.vmem %s3358_s0, %s2486_s20  ;;  %s2922_s27 = scalar_lea.vmem %s3366_s8, %s2487_s21  ;;  %415 = vst.msk [vmem:[#allocation2 + $0x10] sm:$0xff] (!%p2388_p4), %vm412_vm0, %v2840_v0  ;;  %416 = vst.msk [vmem:[#allocation2 + $0x18] sm:$0xff] (!%p2388_p4), %vm412_vm0, %v2840_v0 }
  0x11   : > { %s2927_s30 = scalar_lea.vmem %s3369_s11, %s2486_s20  ;;  %417 = vst.msk [vmem:[#allocation2 + $0x20] sm:$0xff] (!%p2388_p4), %vm412_vm0, %v2840_v0  ;;  %418 = vst.msk [vmem:[#allocation2 + $0x28] sm:$0xff] (!%p2388_p4), %vm412_vm0, %v2840_v0 }
  0x12   : > { %419 = vst.msk [vmem:[#allocation2 + $0x30] sm:$0xff] (!%p2388_p4), %vm412_vm0, %v2840_v0  ;;  %420 = vst.msk [vmem:[#allocation2 + $0x38] sm:$0xff] (!%p2388_p4), %vm412_vm0, %v2840_v0 }
  0x13   : > { %421 = vst.msk [vmem:[#allocation2 + $0x40] sm:$0xff] (!%p2388_p4), %vm412_vm0, %v2840_v0  ;;  %422 = vst.msk [vmem:[#allocation2 + $0x48] sm:$0xff] (!%p2388_p4), %vm412_vm0, %v2840_v0 }
  0x14   : > { %423 = vst.msk [vmem:[#allocation2 + $0x50] sm:$0xff] (!%p2388_p4), %vm412_vm0, %v2840_v0  ;;  %424 = vst.msk [vmem:[#allocation2 + $0x58] sm:$0xff] (!%p2388_p4), %vm412_vm0, %v2840_v0 }
  0x15   : > { %425 = vst.msk [vmem:[#allocation2 + $0x60] sm:$0xff] %vm412_vm0, %v2840_v0  ;;  %426 = vst.msk [vmem:[#allocation2 + $0x68] sm:$0xff] %vm412_vm0, %v2840_v0 }
  0x16   : > { %427 = vst.msk [vmem:[#allocation2 + $0x70] sm:$0xff] %vm412_vm0, %v2840_v0 }
  0x17 PF: > { %v444_v1 = vld [vmem:[%s3361_s3] sm:$0xff]  ;;  %v445_v2 = vld [vmem:[%s3361_s3 + $0x8] sm:$0xff]  ;;  %v2841_v4 = vmov 0.0|0.0   ;;  %v2514_v9 = vld [vmem:[%s2917_s24 + $0x10] sm:$0xff]   ;;  %vm446_vm1 = vcmask 130048   ;;  %vm2842_vm2 = vmmov 0  }
  0x18   : > { %v2498_v3 = vld [vmem:[%s2917_s24] sm:$0xff]   ;;  %2686 = vmatprep.subr.bf16.mxu0 %v2841_v4  ;;  %v2687_v5 = vpack.c.bf16 %v445_v2, %v444_v1  ;;  %2689 = vmatprep.subr.bf16.mxu1 %v2841_v4  ;;  %v2513_v8 = vld [vmem:[%s2917_s24 + $0x8] sm:$0xff]   ;;  %v2515_v10 = vld [vmem:[%s2917_s24 + $0x18] sm:$0xff]   ;;  %v2843_v11 = vmov 0.0   ;;  %v2962_v14 = vunpack.c.l.bf16 %v2514_v9  ;;  %v2964_v15 = vunpack.c.h.bf16 %v2514_v9 }
  0x19   : > { %v2951_v6 = vunpack.c.l.bf16 %v2498_v3  ;;  %v2953_v7 = vunpack.c.h.bf16 %v2498_v3  ;;  %2576 = vmatprep.mubr.msk.f32.mxu0 %vm2842_vm2, %v2843_v11  ;;  %v2958_v12 = vunpack.c.l.bf16 %v2513_v8  ;;  %v2960_v13 = vunpack.c.h.bf16 %v2513_v8  ;;  %2583 = vmatprep.mubr.msk.f32.mxu1 %vm2842_vm2, %v2843_v11  ;;  %v966_v38 = vld [vmem:[%s3365_s7 + $0x8] sm:$0xf]  ;;  %v964_v43 = vld [vmem:[%s3365_s7] sm:$0xf]  ;;  %v967_v49 = vld [vmem:[%s3365_s7 + $0xc] sm:$0xf] }
  0x1a   : > { %2688 = vmatpush3.bf16.msra.mxu0 %v2687_v5  ;;  %2691 = vmatpush3.bf16.msra.mxu1 %v2687_v5  ;;  %v2966_v16 = vunpack.c.l.bf16 %v2515_v10  ;;  %v2972_v19 = vunpack.c.h.bf16 %v2515_v10  ;;  %v454_v23 = vsel %vm446_vm1, %v2962_v14, 0.0  ;;  %v456_v24 = vsel %vm446_vm1, %v2964_v15, 0.0  ;;  %v965_v50 = vld [vmem:[%s3365_s7 + $0x4] sm:$0xf]  ;;  %v969_v58 = vld [vmem:[%s3365_s7 + $0x14] sm:$0xf] }
  0x1b   : > { %v447_v17 = vsel %vm446_vm1, %v2951_v6, 0.0  ;;  %v448_v18 = vsel %vm446_vm1, %v2953_v7, 0.0  ;;  %v450_v21 = vsel %vm446_vm1, %v2958_v12, 0.0  ;;  %v452_v22 = vsel %vm446_vm1, %v2960_v13, 0.0  ;;  %v968_v59 = vld [vmem:[%s3365_s7 + $0x10] sm:$0xf] }
  0x1c   : > { %v449_v20 = vadd.f32 %v448_v18, %v447_v17  ;;  %v468_v25 = vmul.f32 %v2951_v6, %v2951_v6  ;;  %v469_v27 = vmul.f32 %v2953_v7, %v2953_v7  ;;  %v470_v28 = vmul.f32 %v2958_v12, %v2958_v12  ;;  %v971_v1 = vld [vmem:[%s3365_s7 + $0x1c] sm:$0xf]  ;;  %v970_v2 = vld [vmem:[%s3365_s7 + $0x18] sm:$0xf]  ;;  %v793_v9 = vld [vmem:[%s3364_s6 + $0x4] sm:$0xf] }
  0x1d   : > { %v471_v29 = vmul.f32 %v2960_v13, %v2960_v13  ;;  %v458_v30 = vsel %vm446_vm1, %v2966_v16, 0.0  ;;  %v472_v31 = vmul.f32 %v2962_v14, %v2962_v14  ;;  %v473_v32 = vmul.f32 %v2964_v15, %v2964_v15  ;;  %v792_v10 = vld [vmem:[%s3364_s6] sm:$0xf] }
  0x1e   : > { %v451_v26 = vadd.f32 %v450_v21, %v449_v20  ;;  %v474_v33 = vmul.f32 %v2966_v16, %v2966_v16  ;;  %v476_v35 = vsel %vm446_vm1, %v468_v25, 0.0  ;;  %v477_v36 = vsel %vm446_vm1, %v469_v27, 0.0  ;;  %v795_v21 = vld [vmem:[%s3364_s6 + $0xc] sm:$0xf]  ;;  %v797_v25 = vld [vmem:[%s3364_s6 + $0x14] sm:$0xf] }
  0x1f   : > { %v479_v37 = vsel %vm446_vm1, %v470_v28, 0.0  ;;  %v460_v39 = vsel %vm446_vm1, %v2972_v19, 0.0  ;;  %v478_v40 = vadd.f32 %v477_v36, %v476_v35  ;;  %v481_v41 = vsel %vm446_vm1, %v471_v29, 0.0  ;;  %v799_v27 = vld [vmem:[%s3364_s6 + $0x1c] sm:$0xf]  ;;  %v2789_v29 = vld [vmem:[%s3362_s4 + $0x8] sm:$0xff]  }
  0x20   : > { %v453_v34 = vadd.f32 %v452_v22, %v451_v26  ;;  %v483_v42 = vsel %vm446_vm1, %v472_v31, 0.0  ;;  %v485_v45 = vsel %vm446_vm1, %v473_v32, 0.0  ;;  %v487_v46 = vsel %vm446_vm1, %v474_v33, 0.0  ;;  %v794_v22 = vld [vmem:[%s3364_s6 + $0x8] sm:$0xf]  ;;  %2586 = vmatprep.subr.bf16.mxu1 %v2789_v29  ;;  %v3075_v32 = vld [vmem:[%s3362_s4 + $0x30] sm:$0xff]  }
  0x21   : > { %v480_v47 = vadd.f32 %v479_v37, %v478_v40  ;;  %v2844_v48 = vmov 0   ;;  %v475_v54 = vmul.f32 %v2972_v19, %v2972_v19  ;;  %v796_v26 = vld [vmem:[%s3364_s6 + $0x10] sm:$0xf]  ;;  %v798_v28 = vld [vmem:[%s3364_s6 + $0x18] sm:$0xf]  ;;  %v2791_v31 = vld [vmem:[%s3362_s4 + $0x28] sm:$0xff]  }
  0x22   : > { %v455_v44 = vadd.f32 %v454_v23, %v453_v34  ;;  %2788 = vset.pattern.permute.xlu1 %v2844_v48  ;;  %2787 = vset.pattern.permute.xlu0 %v2844_v48  ;;  %vm767_vm3 = vcmask 1043456   ;;  %vm780_vm4 = vcmask 130052   ;;  %vm785_vm5 = vcmask 125952  }
  0x23   : > { %998 = vperm.xlu1 %2788, %v966_v38   ;;  %974 = vperm.xlu0 %2787, %v964_v43   ;;  %v482_v52 = vadd.f32 %v481_v41, %v480_v47  ;;  %v489_v61 = vsel %vm446_vm1, %v475_v54, 0.0  ;;  %vm1088_vm6 = vsmask.f32 4352  ;;  %vm916_vm7 = vsmask.f32 3328 }
  0x24   : > { %v457_v51 = vadd.f32 %v456_v24, %v455_v44  ;;  %2636 = vmatprep.subr.bf16.mxu0 %v2791_v31  ;;  %vm1185_vm8 = vsmask.f32 7424  ;;  %vm1134_vm9 = vsmask.f32 256  ;;  %vm2165_vm10 = vcmask 64512  }
  0x25   : > { %v484_v55 = vadd.f32 %v483_v42, %v482_v52 }
  0x26   : > { %v459_v53 = vadd.f32 %v458_v30, %v457_v51  ;;  %v3066_v30 = vld [vmem:[%s3362_s4] sm:$0xff]  }
  0x27   : > { %1010 = vperm.xlu1 %2788, %v967_v49   ;;  %986 = vperm.xlu0 %2787, %v965_v50   ;;  %v486_v57 = vadd.f32 %v485_v45, %v484_v55 }
  0x28   : > { %v461_v56 = vadd.f32 %v460_v39, %v459_v53  ;;  %v647_v39 = vlaneseq }
  0x29   : > { %v488_v62 = vadd.f32 %v487_v46, %v486_v57 }
  0x2a   : > { %v462_v60 = vrot.slane %v461_v56, 4  ;;  %v3082_v44 = vshrl.u32 %v647_v39, 7 }
  0x2b   : > { %1034 = vperm.xlu1 %2788, %v969_v58   ;;  %1022 = vperm.xlu0 %2787, %v968_v59   ;;  %v490_v0 = vadd.f32 %v489_v61, %v488_v62  ;;  %v2391_v62 = vld [vmem:[%s3359_s1] ss:$0 sm:$0xff] }
  0x2c   : > { %v463_v63 = vadd.f32 %v462_v60, %v461_v56  ;;  %v649_v46 = vsub.s32 0, %v3082_v44 }
  0x2d   : > { %v491_v4 = vrot.slane %v490_v0, 4 }
  0x2e   : > { %v464_v3 = vrot.slane %v463_v63, 2 }
  0x2f   : > { %1058 = vperm.xlu1 %2788, %v971_v1   ;;  %1046 = vperm.xlu0 %2787, %v970_v2   ;;  %v492_v8 = vadd.f32 %v491_v4, %v490_v0 }
  0x30   : > { %v465_v5 = vadd.f32 %v464_v3, %v463_v63 }
  0x31   : > { %v493_v17 = vrot.slane %v492_v8, 2 }
  0x32   : > { %v466_v11 = vrot.slane %v465_v5, 1 }
  0x33   : > { %814 = vperm.xlu1 %2788, %v793_v9   ;;  %802 = vperm.xlu0 %2787, %v792_v10   ;;  %v494_v20 = vadd.f32 %v493_v17, %v492_v8  ;;  %v2845_v17 = vmov 839922192  }
  0x34   : > { %v467_v18 = vadd.f32 %v466_v11, %v465_v5 }
  0x35   : > { %v495_v23 = vrot.slane %v494_v20, 1 }
  0x36   : > { %2577 = vmatmul.mubr.msk.f32.vlgmr.msra.gmra.mrb[0].mxu0 %vm446_vm1, %v467_v18  ;;  %v806_v18 = vunpack.c.l.s4 %v2845_v17 }
  0x37   : > { %838 = vperm.xlu1 %2788, %v795_v21   ;;  %826 = vperm.xlu0 %2787, %v794_v22   ;;  %v496_v24 = vadd.f32 %v495_v23, %v494_v20 }
  0x38   : > { %2637 = vmatpush3.bf16.msra.mxu0 %v2791_v31 }
  0x39   : > { %2584 = vmatmul.mubr.msk.f32.vlgmr.msra.gmra.mrb[0].mxu1 %vm446_vm1, %v496_v24  ;;  %2646 = vmatprep.subr.bf16.mxu0 %v3075_v32 }
  0x3a   : > { %2587 = vmatpush3.bf16.msra.mxu1 %v2789_v29 }
  0x3b   : > { %862 = vperm.xlu1 %2788, %v797_v25   ;;  %850 = vperm.xlu0 %2787, %v796_v26  }
  0x3c   : > { %2596 = vmatprep.subr.bf16.mxu1 %v3066_v30 }
  0x3f   : > { %886 = vperm.xlu1 %2788, %v799_v27   ;;  %874 = vperm.xlu0 %2787, %v798_v28  }
  0xa2   : > { %v3078_v42 = vpop.permute.xlu1 %998  ;;  %v3080_v43 = vpop.permute.xlu0 %974 }
  0xa6   : > { %v3085_v47 = vpop.permute.xlu1 %1010  ;;  %v3087_v48 = vpop.permute.xlu0 %986 }
  0xaa   : > { %v3089_v50 = vpop.permute.xlu1 %1034  ;;  %v3091_v51 = vpop.permute.xlu0 %1022 }
  0xae   : > { %v3107_v4 = vpop.permute.xlu1 %1058  ;;  %v3109_v5 = vpop.permute.xlu0 %1046 }
 0x109   : > { %v566_v33 = vpop.f32.mrb[0].mxu0 }
 0x10a   : > { %v570_v34 = vmul.f32 0.00390625, %v566_v33  ;;  %v2578_v35 = vpop.f32.mrb[1].mxu0 }
 0x10c   : > { %v645_v36 = vmul.f32 %v570_v34, %v570_v34  ;;  %v640_v37 = vpop.f32.mrb[0].mxu1  ;;  %v650_v49 = vrot.slane %v570_v34, %v649_v46  ;;  %v807_v34 = vunpack.c.0.s8 %v806_v18 }
 0x10d   : > { %v2585_v38 = vpop.f32.mrb[1].mxu1  ;;  %v644_v40 = vmul.f32 0.00390625, %v640_v37  ;;  %v3134_v37 = vpop.permute.xlu0 %802 }
 0x10e   : > { %v655_v53 = vsub.f32 %v2962_v14, %v650_v49  ;;  %v656_v54 = vsub.f32 %v2964_v15, %v650_v49  ;;  %v657_v55 = vsub.f32 %v2966_v16, %v650_v49  ;;  %v658_v56 = vsub.f32 %v2972_v19, %v650_v49 }
 0x10f   : > { %v646_v41 = vsub.f32 %v644_v40, %v645_v36  ;;  %v651_v58 = vsub.f32 %v2951_v6, %v650_v49  ;;  %v652_v59 = vsub.f32 %v2953_v7, %v650_v49  ;;  %v653_v60 = vsub.f32 %v2958_v12, %v650_v49  ;;  %v2392_v6 = vld [vmem:[%s3360_s2] ss:$0 sm:$0xff]  ;;  %v3132_v36 = vpop.permute.xlu1 %814 }
 0x110   : > { %v654_v61 = vsub.f32 %v2960_v13, %v650_v49 }
 0x111   : > { %v659_v45 = vadd.f32 1e-05, %v646_v41  ;;  %v3140_v41 = vsub.s32 %v807_v34, %v3082_v44 }
 0x113   : > { %2798 = vrsqrt.f32 %v659_v45  ;;  %v3142_v45 = vpop.permute.xlu1 %838  ;;  %v1007_v49 = vrot.slane %v3078_v42, %v3140_v41  ;;  %v1031_v42 = vrot.slane %v3091_v51, %v3140_v41 }
 0x11d   : > { %v2799_v52 = vpop.eup %2798 }
 0x11e   : > { %v664_v57 = vrot.slane %v2799_v52, %v649_v46  ;;  %v827_v46 = vpop.permute.xlu0 %826  ;;  %v1019_v52 = vrot.slane %v3085_v47, %v3140_v41 }
 0x11f   : > { %v835_v17 = vrot.slane %v827_v46, %v3140_v41 }
 0x120   : > { %v669_v14 = vmul.f32 %v664_v57, %v655_v53  ;;  %v670_v63 = vmul.f32 %v664_v57, %v656_v54  ;;  %v671_v15 = vmul.f32 %v664_v57, %v657_v55  ;;  %v672_v0 = vmul.f32 %v664_v57, %v658_v56 }
 0x121   : > { %v665_v16 = vmul.f32 %v664_v57, %v651_v58  ;;  %v666_v1 = vmul.f32 %v664_v57, %v652_v59  ;;  %v667_v19 = vmul.f32 %v664_v57, %v653_v60  ;;  %v668_v2 = vmul.f32 %v664_v57, %v654_v61  ;;  %v863_v61 = vpop.permute.xlu1 %862 }
 0x122   : > { %v684_v7 = vmul.f32 %v2391_v62, %v669_v14  ;;  %v685_v12 = vmul.f32 %v2391_v62, %v670_v63  ;;  %v686_v3 = vmul.f32 %v2391_v62, %v671_v15  ;;  %v687_v13 = vmul.f32 %v2391_v62, %v672_v0  ;;  %v851_v47 = vpop.permute.xlu0 %850 }
 0x123   : > { %v680_v8 = vmul.f32 %v2391_v62, %v665_v16  ;;  %v681_v9 = vmul.f32 %v2391_v62, %v666_v1  ;;  %v682_v10 = vmul.f32 %v2391_v62, %v667_v19  ;;  %v683_v11 = vmul.f32 %v2391_v62, %v668_v2 }
 0x124   : > { %v3111_v20 = vadd.f32 %v2392_v6, %v684_v7  ;;  %v3113_v21 = vadd.f32 %v2392_v6, %v685_v12  ;;  %v3124_v27 = vadd.f32 %v2392_v6, %v686_v3  ;;  %v3129_v33 = vadd.f32 %v2392_v6, %v687_v13 }
 0x125   : > { %v3115_v22 = vadd.f32 %v2392_v6, %v680_v8  ;;  %v3117_v23 = vadd.f32 %v2392_v6, %v681_v9  ;;  %v3119_v24 = vadd.f32 %v2392_v6, %v682_v10  ;;  %v3121_v25 = vadd.f32 %v2392_v6, %v683_v11  ;;  %v887_v8 = vpop.permute.xlu1 %886 }
 0x126   : > { %v2397_v26 = vmul.f32 -1.442695, %v3111_v20  ;;  %v2398_v38 = vmul.f32 -1.442695, %v3113_v21  ;;  %v2399_v39 = vmul.f32 -1.442695, %v3124_v27  ;;  %v983_v55 = vrot.slane %v3080_v43, %v3140_v41  ;;  %v875_v9 = vpop.permute.xlu0 %874 }
 0x127   : > { %v2393_v28 = vmul.f32 -1.442695, %v3115_v22  ;;  %v2394_v29 = vmul.f32 -1.442695, %v3117_v23  ;;  %v2395_v31 = vmul.f32 -1.442695, %v3119_v24  ;;  %v995_v56 = vrot.slane %v3087_v48, %v3140_v41 }
 0x128   : > { %v2396_v35 = vmul.f32 -1.442695, %v3121_v25  ;;  %2800 = vpow2.f32 %v2397_v26  ;;  %v2400_v40 = vmul.f32 -1.442695, %v3129_v33  ;;  %v2406_v58 = vcombine.low %v1007_v49, %v1019_v52 }
 0x129   : > { %2802 = vpow2.f32 %v2393_v28  ;;  %v1043_v60 = vrot.slane %v3089_v50, %v3140_v41  ;;  %v1067_v48 = vrot.slane %v3107_v4, %v3140_v41  ;;  %v2405_v16 = vcombine.low %v983_v55, %v995_v56 }
 0x12a   : > { %2804 = vpow2.f32 %v2394_v29  ;;  %v1055_v50 = vrot.slane %v3109_v5, %v3140_v41  ;;  %v1098_v51 = vshrl.u32 %v2406_v58, 16  ;;  %v1101_v7 = vshll.u32 %v2406_v58, 16 }
 0x12b   : > { %2806 = vpow2.f32 %v2395_v31  ;;  %v2407_v2 = vcombine.low %v1031_v42, %v1043_v60  ;;  %v823_v3 = vrot.slane %v3132_v36, %v3140_v41  ;;  %v811_v4 = vrot.slane %v3134_v37, %v3140_v41 }
 0x12c   : > { %2808 = vpow2.f32 %v2396_v35  ;;  %v847_v5 = vrot.slane %v3142_v45, %v3140_v41  ;;  %v1090_v10 = vshrl.u32 %v2405_v16, 16  ;;  %v2408_v11 = vcombine.low %v1055_v50, %v1067_v48 }
 0x12d   : > { %2810 = vpow2.f32 %v2398_v38  ;;  %v1093_v18 = vshll.u32 %v2405_v16, 16  ;;  %v1107_v26 = vshrl.u32 %v2407_v2, 16  ;;  %v1110_v28 = vshll.u32 %v2407_v2, 16 }
 0x12e   : > { %2812 = vpow2.f32 %v2399_v39  ;;  %v871_v29 = vrot.slane %v863_v61, %v3140_v41  ;;  %v859_v31 = vrot.slane %v851_v47, %v3140_v41  ;;  %v895_v34 = vrot.slane %v887_v8, %v3140_v41 }
 0x12f   : > { %2814 = vpow2.f32 %v2400_v40  ;;  %v883_v35 = vrot.slane %v875_v9, %v3140_v41  ;;  %v2401_v36 = vcombine.low %v811_v4, %v823_v3  ;;  %v1100_v38 = vrot.slane %v1098_v51, 3 }
 0x130   : > { %v1103_v39 = vrot.slane %v1101_v7, 4  ;;  %v1116_v40 = vshrl.u32 %v2408_v11, 16  ;;  %v2402_v45 = vcombine.low %v835_v17, %v847_v5  ;;  %v1092_v46 = vrot.slane %v1090_v10, 3 }
 0x131   : > { %v1095_v52 = vrot.slane %v1093_v18, 4  ;;  %v2403_v56 = vcombine.low %v859_v31, %v871_v29  ;;  %v918_v60 = vshrl.u32 %v2401_v36, 16  ;;  %v921_v42 = vshll.u32 %v2401_v36, 16 }
 0x132   : > { %v2801_v53 = vpop.eup %2800 }
 0x133   : > { %v2803_v54 = vpop.eup %2802  ;;  %v731_v44 = vadd.f32 1.0, %v2801_v53  ;;  %v1109_v53 = vrot.slane %v1107_v26, 3  ;;  %v938_v50 = vshll.u32 %v2403_v56, 16  ;;  %v1104_v26 = vor.u32 %v1103_v39, %v1100_v38 }
 0x134   : > { %v2805_v57 = vpop.eup %2804  ;;  %v727_v59 = vadd.f32 1.0, %v2803_v54  ;;  %v1112_v54 = vrot.slane %v1110_v28, 4  ;;  %v1096_v28 = vor.u32 %v1095_v52, %v1092_v46 }
 0x135   : > { %v2807_v62 = vpop.eup %2806  ;;  %v728_v14 = vadd.f32 1.0, %v2805_v57  ;;  %2816 = vrcp.f32 %v731_v44  ;;  %v2404_v57 = vcombine.low %v883_v35, %v895_v34  ;;  %v940_v10 = vrot.slane %v938_v50, 5 }
 0x136   : > { %v2809_v63 = vpop.eup %2808  ;;  %v729_v43 = vadd.f32 1.0, %v2807_v62  ;;  %2818 = vrcp.f32 %v727_v59  ;;  %v1119_v59 = vshll.u32 %v2408_v11, 16  ;;  %v1113_v29 = vor.u32 %v1112_v54, %v1109_v53 }
 0x137   : > { %v2811_v15 = vpop.eup %2810  ;;  %v730_v0 = vadd.f32 1.0, %v2809_v63  ;;  %2820 = vrcp.f32 %v728_v14  ;;  %v1118_v14 = vrot.slane %v1116_v40, 3  ;;  %v926_v63 = vshrl.u32 %v2402_v45, 16 }
 0x138   : > { %v2813_v1 = vpop.eup %2812  ;;  %v732_v19 = vadd.f32 1.0, %v2811_v15  ;;  %2822 = vrcp.f32 %v729_v43  ;;  %v929_v15 = vshll.u32 %v2402_v45, 16  ;;  %v1105_v39 = vsel %vm1088_vm6, %v1096_v28, %v1104_v26 }
 0x139   : > { %v2815_v6 = vpop.eup %2814  ;;  %2824 = vrcp.f32 %v730_v0  ;;  %v733_v12 = vadd.f32 1.0, %v2813_v1  ;;  %v944_v1 = vshrl.u32 %v2404_v57, 16  ;;  %v928_v4 = vrot.slane %v926_v63, 4 }
 0x13a   : > { %2826 = vrcp.f32 %v732_v19  ;;  %v734_v13 = vadd.f32 1.0, %v2815_v6  ;;  %v1114_v53 = vsel %vm1088_vm6, %v1104_v26, %v1113_v29 }
 0x13b   : > { %2828 = vrcp.f32 %v733_v12  ;;  %v1121_v12 = vrot.slane %v1119_v59, 4 }
 0x13c   : > { %2830 = vrcp.f32 %v734_v13  ;;  %v923_v13 = vrot.slane %v921_v42, 5 }
 0x13d   : > { %v1122_v31 = vor.u32 %v1121_v12, %v1118_v14 }
 0x13f   : > { %v2817_v37 = vpop.eup %2816  ;;  %v1123_v54 = vsel %vm1088_vm6, %v1113_v29, %v1122_v31 }
 0x140   : > { %v2819_v49 = vpop.eup %2818  ;;  %v755_v62 = vmul.f32 %v2817_v37, %v3111_v20  ;;  %v947_v20 = vshll.u32 %v2404_v57, 16 }
 0x141   : > { %v2821_v55 = vpop.eup %2820  ;;  %v751_v44 = vmul.f32 %v2819_v49, %v3115_v22 }
 0x142   : > { %v2823_v58 = vpop.eup %2822  ;;  %v752_v41 = vmul.f32 %v2821_v55, %v3117_v23  ;;  %v935_v23 = vshrl.u32 %v2403_v56, 16  ;;  %v949_v17 = vrot.slane %v947_v20, 5  ;;  %v3198_v56 = vld [vmem:[%s3362_s4 + $0x10] sm:$0xff]  }
 0x143   : > { %v2825_v61 = vpop.eup %2824  ;;  %v753_v47 = vmul.f32 %v2823_v58, %v3119_v24 }
 0x144   : > { %v2827_v43 = vpop.eup %2826  ;;  %v754_v48 = vmul.f32 %v2825_v61, %v3121_v25  ;;  %v759_v22 = vpack.c.bf16 %v752_v41, %v751_v44  ;;  %v920_v25 = vrot.slane %v918_v60, 4  ;;  %v937_v9 = vrot.slane %v935_v23, 4 }
 0x145   : > { %v2829_v0 = vpop.eup %2828  ;;  %v756_v16 = vmul.f32 %v2827_v43, %v3113_v21  ;;  %v931_v21 = vrot.slane %v929_v15, 5 }
 0x146   : > { %v2831_v51 = vpop.eup %2830  ;;  %v760_v19 = vpack.c.bf16 %v754_v48, %v753_v47  ;;  %v768_v2 = vrot.slane %v759_v22, 4  ;;  %v757_v24 = vmul.f32 %v2829_v0, %v3124_v27  ;;  %v946_v27 = vrot.slane %v944_v1, 4 }
 0x147   : > { %v761_v6 = vpack.c.bf16 %v756_v16, %v755_v62  ;;  %v758_v7 = vmul.f32 %v2831_v51, %v3129_v33  ;;  %v924_v35 = vor.u32 %v923_v13, %v920_v25  ;;  %v932_v36 = vor.u32 %v931_v21, %v928_v4 }
 0x148   : > { %v769_v3 = vrot.slane %v760_v19, 4  ;;  %781 = vst.msk [vmem:[#allocation2] sm:$0xf0] %vm780_vm4, %v768_v2  ;;  %v941_v37 = vor.u32 %v940_v10, %v937_v9  ;;  %v3187_v40 = vor.u32 %v949_v17, %v946_v27 }
 0x149   : > { %v771_v5 = vrot.slane %v761_v6, 4  ;;  %v762_v8 = vpack.c.bf16 %v758_v7, %v757_v24  ;;  %v933_v55 = vsel %vm916_vm7, %v924_v35, %v932_v36 }
 0x14a   : > { %v770_v11 = vsel %vm767_vm3, %v768_v2, %v769_v3  ;;  %v942_v44 = vsel %vm916_vm7, %v932_v36, %v941_v37  ;;  %v951_v59 = vsel %vm916_vm7, %v941_v37, %v3187_v40 }
 0x14b   : > { %v772_v33 = vsel %vm767_vm3, %v769_v3, %v771_v5  ;;  %782 = vst.msk [vmem:[#allocation2 + $0x8] sm:$0xff] %vm446_vm1, %v770_v11  ;;  %v773_v18 = vrot.slane %v762_v8, 4 }
 0x14c   : > { %783 = vst.msk [vmem:[#allocation2 + $0x10] sm:$0xff] %vm446_vm1, %v772_v33 }
 0x14d   : > { %v774_v34 = vsel %vm767_vm3, %v771_v5, %v773_v18  ;;  %786 = vst.msk [vmem:[#allocation2 + $0x20] sm:$0xf] %vm785_vm5, %v773_v18 }
 0x14e   : > { %784 = vst.msk [vmem:[#allocation2 + $0x18] sm:$0xff] %vm446_vm1, %v774_v34 }
 0x14f   : > { %v962_v45 = vld [vmem:[#allocation2] sm:$0xf0] }
 0x150   : > { %v787_v49 = vld [vmem:[#allocation2] sm:$0xf8]  ;;  %v1129_v46 = vmul.bf16 %v1096_v28, %v962_v45 }
 0x151   : > { %v1242_v38 = vld [vmem:[#allocation2] sm:$0xff]  ;;  %v957_v52 = vmul.bf16 %v924_v35, %v787_v49 }
 0x152   : > { %2588 = vmatprep.mubr.msk.bf16.mxu1 %vm446_vm1, %v1242_v38  ;;  %v3200_v57 = vld [vmem:[#allocation2 + $0x8] sm:$0xff]  ;;  %v1189_v58 = vshll.u32 %v1129_v46, 16  ;;  %v1187_v42 = vshrl.u32 %v1129_v46, 16 }
 0x153   : > { %v1136_v41 = vshrl.u32 %v957_v52, 16  ;;  %v1130_v60 = vmul.bf16 %v1105_v39, %v3200_v57  ;;  %v3205_v61 = vld [vmem:[#allocation2 + $0x10] sm:$0xff]  ;;  %v1139_v47 = vshll.u32 %v957_v52, 16  ;;  %v958_v62 = vmul.bf16 %v933_v55, %v3200_v57  ;;  %2589 = vmatmul.mubr.msk.bf16.vlgmr.msra.gmra.mrb[4].mxu1 %vm446_vm1, %v3200_v57 }
 0x154   : > { %v1191_v14 = vrot.slane %v1189_v58, 1  ;;  %v1131_v63 = vmul.bf16 %v1114_v53, %v3205_v61  ;;  %v963_v43 = vld [vmem:[#allocation2 + $0x20] sm:$0x1f]  ;;  %v959_v22 = vmul.bf16 %v942_v44, %v3205_v61  ;;  %2592 = vmatprep.mubr.msk.bf16.mxu1 %vm446_vm1, %v3205_v61  ;;  %2597 = vmatpush3.bf16.msra.mxu1 %v3066_v30 }
 0x155   : > { %v1138_v48 = vrot.slane %v1136_v41, 7  ;;  %v1194_v15 = vshll.u32 %v1130_v60, 16  ;;  %v1198_v0 = vshrl.u32 %v1130_v60, 16  ;;  %v3215_v16 = vld [vmem:[#allocation2 + $0x18] sm:$0xff]  ;;  %v1133_v23 = vmul.bf16 %v1122_v31, %v963_v43  ;;  %2606 = vmatprep.subr.bf16.mxu1 %v3198_v56  ;;  %v791_v8 = vld [vmem:[#allocation2 + $0x20] sm:$0xf] }
 0x156   : > { %v1143_v50 = vshrl.u32 %v958_v62, 16  ;;  %v1192_v1 = vor.u32 %v1191_v14, %v1187_v42  ;;  %v1202_v51 = vshll.u32 %v1131_v63, 16  ;;  %v1206_v19 = vshrl.u32 %v1131_v63, 16 }
 0x157   : > { %v1132_v2 = vmul.bf16 %v1123_v54, %v3215_v16  ;;  %v1196_v24 = vrot.slane %v1194_v15, 1  ;;  %v1218_v20 = vshll.u32 %v1133_v23, 16  ;;  %v1222_v6 = vshrl.u32 %v1133_v23, 16 }
 0x158   : > { %v1141_v7 = vor.u32 %v1139_v47, %v1138_v48  ;;  %v1204_v12 = vrot.slane %v1202_v51, 1  ;;  %v1145_v3 = vrot.slane %v1143_v50, 7  ;;  %v1146_v5 = vshll.u32 %v958_v62, 16  ;;  %v2795_v62 = vld [vmem:[%s3362_s4 + $0x18] sm:$0xff]  }
 0x159   : > { %v1210_v25 = vshll.u32 %v1132_v2, 16  ;;  %v1214_v30 = vshrl.u32 %v1132_v2, 16  ;;  %v1197_v13 = vsel %vm1185_vm8, %v1192_v1, %v1196_v24  ;;  %v1200_v4 = vor.u32 %v1198_v0, %v1196_v24  ;;  %v2796_v24 = vld [vmem:[%s3362_s4 + $0x40] sm:$0xff]  }
 0x15a   : > { %v1220_v21 = vrot.slane %v1218_v20, 1  ;;  %1180 = vst.msk [vmem:[#allocation2 + $0x28] sm:$0xf0] %vm780_vm4, %v1141_v7  ;;  %1231 = vst.msk [vmem:[#allocation2 + $0x50] sm:$0xf0] %vm780_vm4, %v1197_v13  ;;  %v1208_v9 = vor.u32 %v1206_v19, %v1204_v12  ;;  %v1151_v11 = vshrl.u32 %v959_v22, 16  ;;  %v1148_v18 = vor.u32 %v1146_v5, %v1145_v3 }
 0x15b   : > { %v1212_v10 = vrot.slane %v1210_v25, 1  ;;  %v1154_v27 = vshll.u32 %v959_v22, 16  ;;  %v1205_v17 = vsel %vm1185_vm8, %v1200_v4, %v1204_v12  ;;  %v960_v26 = vmul.bf16 %v951_v59, %v3215_v16  ;;  %2593 = vmatmul.mubr.msk.bf16.gmra.mrb[8].mxu1 %vm446_vm1, %v3215_v16  ;;  %v2794_v22 = vld [vmem:[%s3362_s4 + $0x38] sm:$0xff]   ;;  %v1626_v5 = vld [vmem:[#allocation2] sm:$0xf0] }
 0x15c   : > { %v1224_v33 = vor.u32 %v1222_v6, %v1220_v21  ;;  %1232 = vst.msk [vmem:[#allocation2 + $0x58] sm:$0xff] %vm446_vm1, %v1205_v17  ;;  %v1153_v31 = vrot.slane %v1151_v11, 7  ;;  %v961_v34 = vmul.bf16 %v3187_v40, %v791_v8  ;;  %v1149_v35 = vsel %vm1134_vm9, %v1138_v48, %v1148_v18  ;;  %v2164_v8 = vld [vmem:[%s3367_s9] sm:$0xf] }
 0x15d   : > { %v1213_v28 = vsel %vm1185_vm8, %v1208_v9, %v1212_v10  ;;  %v1216_v29 = vor.u32 %v1214_v30, %v1212_v10  ;;  %v1159_v36 = vshrl.u32 %v960_v26, 16  ;;  %1181 = vst.msk [vmem:[#allocation2 + $0x30] sm:$0xff] %vm446_vm1, %v1149_v35  ;;  %v1162_v39 = vshll.u32 %v960_v26, 16 }
 0x15e   : > { %1233 = vst.msk [vmem:[#allocation2 + $0x60] sm:$0xff] %vm446_vm1, %v1213_v28  ;;  %v1156_v45 = vor.u32 %v1154_v27, %v1153_v31  ;;  %v1167_v49 = vshrl.u32 %v961_v34, 16  ;;  %v1170_v52 = vshll.u32 %v961_v34, 16  ;;  %v1640_v10 = vrot.slane %v3200_v57, 4  ;;  %v2153_v34 = vld [vmem:[%s2922_s27 + $0x8] sm:$0xff] }
 0x15f   : > { %1235 = vst.msk [vmem:[#allocation2 + $0x70] sm:$0xf] %vm785_vm5, %v1224_v33  ;;  %v1221_v37 = vsel %vm1185_vm8, %v1216_v29, %v1220_v21  ;;  %v1161_v38 = vrot.slane %v1159_v36, 7  ;;  %v1639_v11 = vrot.slane %v1626_v5, 4  ;;  %v1947_v33 = vld [vmem:[#allocation2 + $0x20] sm:$0xff]  ;;  %v1642_v18 = vrot.slane %v3205_v61, 4 }
 0x160   : > { %1234 = vst.msk [vmem:[#allocation2 + $0x68] sm:$0xff] %vm446_vm1, %v1221_v37  ;;  %v1157_v46 = vsel %vm1134_vm9, %v1145_v3, %v1156_v45  ;;  %v1169_v40 = vrot.slane %v1167_v49, 7  ;;  %v2180_v29 = vsel %vm767_vm3, %v2164_v8, 0  ;;  %v2154_v45 = vld [vmem:[%s2922_s27 + $0x10] sm:$0xff]  ;;  %v2155_v49 = vld [vmem:[%s2922_s27 + $0x18] sm:$0xff] }
 0x161   : > { %v1236_v53 = vld [vmem:[#allocation2 + $0x28] sm:$0xff]  ;;  %1182 = vst.msk [vmem:[#allocation2 + $0x38] sm:$0xff] %vm446_vm1, %v1157_v46  ;;  %v1164_v54 = vor.u32 %v1162_v39, %v1161_v38  ;;  %v1739_v55 = vld [vmem:[#allocation2 + $0x50] sm:$0xf0]  ;;  %v1641_v17 = vsel %vm767_vm3, %v1639_v11, %v1640_v10  ;;  %v1643_v26 = vsel %vm767_vm3, %v1640_v10, %v1642_v18  ;;  %v2161_v46 = vpack.c.bf16 %v2155_v49, %v2154_v45 }
 0x162   : > { %2598 = vmatprep.mubr.msk.bf16.mxu1 %vm446_vm1, %v1236_v53  ;;  %v1172_v44 = vor.u32 %v1170_v52, %v1169_v40  ;;  %v1752_v58 = vrot.slane %v1739_v55, 4  ;;  %v1415_v2 = vld [vmem:[#allocation2 + $0x50] sm:$0xff]  ;;  %v1513_v20 = vld [vmem:[#allocation2 + $0x28] sm:$0xf0]  ;;  %v2159_v53 = vld [vmem:[%s2922_s27 + $0x38] sm:$0xff] }
 0x163   : > { %v1165_v41 = vsel %vm1134_vm9, %v1153_v31, %v1164_v54  ;;  %v3239_v59 = vld [vmem:[#allocation2 + $0x58] sm:$0xff]  ;;  %v1526_v7 = vrot.slane %v1513_v20, 4  ;;  %v1630_v31 = vld [vmem:[#allocation2 + $0x20] sm:$0xf]  ;;  %v2157_v39 = vld [vmem:[%s2922_s27 + $0x28] sm:$0xff] }
 0x164   : > { %v1173_v60 = vsel %vm1134_vm9, %v1161_v38, %v1172_v44  ;;  %1183 = vst.msk [vmem:[#allocation2 + $0x40] sm:$0xff] %vm446_vm1, %v1165_v41  ;;  %v1753_v42 = vrot.slane %v3239_v59, 4  ;;  %v1237_v14 = vld [vmem:[#allocation2 + $0x30] sm:$0xff]  ;;  %v2156_v38 = vld [vmem:[%s2922_s27 + $0x20] sm:$0xff] }
 0x165   : > { %v3244_v47 = vld [vmem:[#allocation2 + $0x60] sm:$0xff]  ;;  %1184 = vst.msk [vmem:[#allocation2 + $0x48] sm:$0xf] %vm785_vm5, %v1173_v60  ;;  %2599 = vmatmul.mubr.msk.bf16.vlgmr.msra.gmra.mrb[4].mxu1 %vm446_vm1, %v1237_v14  ;;  %v1527_v6 = vrot.slane %v1237_v14, 4  ;;  %v2162_v40 = vpack.c.bf16 %v2157_v39, %v2156_v38  ;;  %v2158_v52 = vld [vmem:[%s2922_s27 + $0x30] sm:$0xff] }
 0x166   : > { %v1755_v63 = vrot.slane %v3244_v47, 4  ;;  %v1754_v43 = vsel %vm767_vm3, %v1752_v58, %v1753_v42  ;;  %2607 = vmatpush3.bf16.msra.mxu1 %v3198_v56  ;;  %v1743_v1 = vld [vmem:[#allocation2 + $0x70] sm:$0xf]  ;;  %v2163_v54 = vpack.c.bf16 %v2159_v53, %v2158_v52 }
 0x167   : > { %v3253_v48 = vld [vmem:[#allocation2 + $0x68] sm:$0xff]  ;;  %2638 = vmatprep.mubr.msk.bf16.mxu0 %vm446_vm1, %v1754_v43  ;;  %2616 = vmatprep.subr.bf16.mxu1 %v2795_v62  ;;  %v1759_v19 = vrot.slane %v1743_v1, 4  ;;  %v1528_v12 = vsel %vm767_vm3, %v1526_v7, %v1527_v6  ;;  %v2042_v37 = vld [vmem:[#allocation2 + $0x70] sm:$0xff] }
 0x168   : > { %v1756_v15 = vsel %vm767_vm3, %v1753_v42, %v1755_v63  ;;  %v1757_v0 = vrot.slane %v3253_v48, 4  ;;  %v1238_v23 = vld [vmem:[#allocation2 + $0x38] sm:$0xff] }
 0x169   : > { %2639 = vmatmul.mubr.msk.bf16.vlgmr.msra.gmra.mrb[4].mxu0 %vm446_vm1, %v1756_v15  ;;  %2602 = vmatprep.mubr.msk.bf16.mxu1 %vm446_vm1, %v1238_v23  ;;  %v1529_v30 = vrot.slane %v1238_v23, 4 }
 0x16a   : > { %2647 = vmatpush3.bf16.msra.mxu0 %v3075_v32  ;;  %v1758_v50 = vsel %vm767_vm3, %v1755_v63, %v1757_v0  ;;  %v1760_v56 = vsel %vm767_vm3, %v1757_v0, %v1759_v19  ;;  %v2797_v32 = vld [vmem:[%s3362_s4 + $0x20] sm:$0xff]  }
 0x16b   : > { %2642 = vmatprep.mubr.msk.bf16.mxu0 %vm446_vm1, %v1758_v50  ;;  %2656 = vmatprep.subr.bf16.mxu0 %v2794_v22  ;;  %v1239_v51 = vld [vmem:[#allocation2 + $0x40] sm:$0xff]  ;;  %v1530_v13 = vsel %vm767_vm3, %v1527_v6, %v1529_v30 }
 0x16c   : > { %v1852_v25 = vld [vmem:[#allocation2 + $0x48] sm:$0xff]  ;;  %v1531_v3 = vrot.slane %v1239_v51, 4 }
 0x16d   : > { %2603 = vmatmul.mubr.msk.bf16.gmra.mrb[8].mxu1 %vm446_vm1, %v1239_v51  ;;  %v1517_v21 = vld [vmem:[#allocation2 + $0x48] sm:$0xf] }
 0x16e   : > { %2608 = vmatprep.mubr.msk.bf16.mxu1 %vm446_vm1, %v1415_v2  ;;  %v1532_v4 = vsel %vm767_vm3, %v1529_v30, %v1531_v3  ;;  %v1533_v9 = vrot.slane %v1517_v21, 4 }
 0x170   : > { %v1534_v27 = vsel %vm767_vm3, %v1531_v3, %v1533_v9 }
 0x171   : > { %2643 = vmatmul.mubr.msk.bf16.gmra.mrb[8].mxu0 %vm446_vm1, %v1760_v56 }
 0x172   : > { %2648 = vmatprep.mubr.msk.bf16.mxu0 %vm446_vm1, %v1237_v14 }
 0x175   : > { %2609 = vmatmul.mubr.msk.bf16.vlgmr.msra.gmra.mrb[4].mxu1 %vm446_vm1, %v3239_v59 }
 0x176   : > { %2612 = vmatprep.mubr.msk.bf16.mxu1 %vm446_vm1, %v3244_v47  ;;  %2617 = vmatpush3.bf16.msra.mxu1 %v2795_v62  ;;  %v2470_v62 = vld [vmem:[%s3363_s5] ss:$0 sm:$0xff] }
 0x177   : > { %2626 = vmatprep.subr.bf16.mxu1 %v2797_v32 }
 0x179   : > { %2649 = vmatmul.mubr.msk.bf16.vlgmr.msra.gmra.mrb[4].mxu0 %vm446_vm1, %v1238_v23 }
 0x17a   : > { %2657 = vmatpush3.bf16.msra.mxu0 %v2794_v22  ;;  %2652 = vmatprep.mubr.msk.bf16.mxu0 %vm446_vm1, %v1239_v51 }
 0x17b   : > { %2666 = vmatprep.subr.bf16.mxu0 %v2796_v24 }
 0x17d   : > { %2613 = vmatmul.mubr.msk.bf16.gmra.mrb[8].mxu1 %vm446_vm1, %v3253_v48 }
 0x17e   : > { %2618 = vmatprep.mubr.msk.bf16.mxu1 %vm446_vm1, %v1528_v12 }
 0x181   : > { %2653 = vmatmul.mubr.msk.bf16.gmra.mrb[8].mxu0 %vm446_vm1, %v1852_v25 }
 0x182   : > { %2658 = vmatprep.mubr.msk.bf16.mxu0 %vm446_vm1, %v3200_v57  ;;  %v1644_v57 = vrot.slane %v3215_v16, 4 }
 0x184   : > { %v1645_v28 = vsel %vm767_vm3, %v1642_v18, %v1644_v57 }
 0x185   : > { %2619 = vmatmul.mubr.msk.bf16.vlgmr.msra.gmra.mrb[4].mxu1 %vm446_vm1, %v1530_v13 }
 0x186   : > { %2622 = vmatprep.mubr.msk.bf16.mxu1 %vm446_vm1, %v1532_v4  ;;  %2627 = vmatpush3.bf16.msra.mxu1 %v2797_v32 }
 0x189   : > { %2659 = vmatmul.mubr.msk.bf16.vlgmr.msra.gmra.mrb[4].mxu0 %vm446_vm1, %v3205_v61  ;;  %v1646_v61 = vrot.slane %v1630_v31, 4 }
 0x18a   : > { %2667 = vmatpush3.bf16.msra.mxu0 %v2796_v24  ;;  %2662 = vmatprep.mubr.msk.bf16.mxu0 %vm446_vm1, %v3215_v16  ;;  %v2152_v16 = vld [vmem:[%s2922_s27] sm:$0xff] }
 0x18b   : > { %2772 = vmatprep.subr.msk.bf16.mxu0 %vm767_vm3, %v2164_v8  ;;  %v1647_v35 = vsel %vm767_vm3, %v1644_v57, %v1646_v61  ;;  %v2160_v36 = vpack.c.bf16 %v2153_v34, %v2152_v16 }
 0x18d   : > { %2623 = vmatmul.mubr.msk.bf16.gmra.mrb[8].mxu1 %vm446_vm1, %v1534_v27 }
 0x18e   : > { %2628 = vmatprep.mubr.msk.bf16.mxu1 %vm446_vm1, %v1641_v17 }
 0x191   : > { %2663 = vmatmul.mubr.msk.bf16.gmra.mrb[8].mxu0 %vm446_vm1, %v1947_v33 }
 0x192   : > { %2668 = vmatprep.mubr.msk.bf16.mxu0 %vm446_vm1, %v3239_v59 }
 0x195   : > { %2629 = vmatmul.mubr.msk.bf16.vlgmr.msra.gmra.mrb[4].mxu1 %vm446_vm1, %v1643_v26 }
 0x196   : > { %2632 = vmatprep.mubr.msk.bf16.mxu1 %vm446_vm1, %v1645_v28 }
 0x199   : > { %2669 = vmatmul.mubr.msk.bf16.vlgmr.msra.gmra.mrb[4].mxu0 %vm446_vm1, %v3244_v47 }
 0x19a   : > { %2677 = vmatpush3.bf16.msra.mxu0 %v2180_v29  ;;  %2672 = vmatprep.mubr.msk.bf16.mxu0 %vm446_vm1, %v3253_v48  ;;  %v2475_v48 = vld [vmem:[%s3368_s10] ss:$0 sm:$0xff] }
 0x19d   : > { %2633 = vmatmul.mubr.msk.bf16.gmra.mrb[8].mxu1 %vm446_vm1, %v1647_v35 }
 0x1a1   : > { %2673 = vmatmul.mubr.msk.bf16.gmra.mrb[8].mxu0 %vm446_vm1, %v2042_v37 }
 0x1a2   : > { %2678 = vmatprep.mubr.msk.bf16.mxu0 %vm2165_vm10, %v2160_v36 }
 0x1a9   : > { %2679 = vmatmul.mubr.msk.bf16.vlgmr.msra.gmra.mrb[4].mxu0 %vm2165_vm10, %v2161_v46 }
 0x1aa   : > { %2682 = vmatprep.mubr.msk.bf16.mxu0 %vm2165_vm10, %v2162_v40 }
 0x1b1   : > { %2683 = vmatmul.mubr.msk.bf16.gmra.mrb[8].mxu0 %vm2165_vm10, %v2163_v54 }
 0x268   : > { %v2630_v55 = vpop.f32.mrb[4].mxu1 }
 0x269   : > { %v1700_v44 = vpop.f32.mrb[5].mxu1  ;;  %v2692_v14 = vadd.f32 %v2630_v55, %v2470_v62 }
 0x26a   : > { %v2631_v58 = vpop.f32.mrb[6].mxu1  ;;  %v2694_v63 = vadd.f32 %v2470_v62, %v1700_v44 }
 0x26b   : > { %v1703_v41 = vpop.f32.mrb[7].mxu1  ;;  %v2696_v22 = vadd.f32 %v2631_v58, %v2470_v62 }
 0x26c   : > { %v2698_v23 = vadd.f32 %v2470_v62, %v1703_v41 }
 0x270   : > { %v2634_v59 = vpop.f32.mrb[8].mxu1 }
 0x271   : > { %v1716_v60 = vpop.f32.mrb[9].mxu1  ;;  %v2700_v12 = vadd.f32 %v2634_v59, %v2470_v62 }
 0x272   : > { %v2635_v42 = vpop.f32.mrb[10].mxu1  ;;  %v2702_v30 = vadd.f32 %v2470_v62, %v1716_v60 }
 0x273   : > { %v1719_v47 = vpop.f32.mrb[11].mxu1  ;;  %v2704_v4 = vadd.f32 %v2635_v42, %v2470_v62 }
 0x274   : > { %v2706_v8 = vadd.f32 %v2470_v62, %v1719_v47 }
 0x27c   : > { %v2680_v43 = vpop.f32.mrb[4].mxu0 }
 0x27d   : > { %v2693_v15 = vadd.f32 %v2692_v14, %v2680_v43  ;;  %v2216_v0 = vpop.f32.mrb[5].mxu0 }
 0x27e   : > { %v2695_v50 = vadd.f32 %v2694_v63, %v2216_v0  ;;  %v2681_v1 = vpop.f32.mrb[6].mxu0 }
 0x27f   : > { %v2264_v51 = vadd.f32 %v2693_v15, %v2475_v48  ;;  %v2697_v19 = vadd.f32 %v2696_v22, %v2681_v1  ;;  %v2219_v2 = vpop.f32.mrb[7].mxu0 }
 0x280   : > { %v2262_v56 = vadd.f32 %v2695_v50, %v2475_v48  ;;  %v2699_v32 = vadd.f32 %v2698_v23, %v2219_v2 }
 0x281   : > { %v2491_v24 = vpack.c.bf16 %v2264_v51, %v2264_v51  ;;  %v2265_v20 = vadd.f32 %v2697_v19, %v2475_v48 }
 0x282   : > { %v2489_v6 = vpack.c.bf16 %v2262_v56, %v2262_v56  ;;  %v2263_v7 = vadd.f32 %v2699_v32, %v2475_v48 }
 0x283   : > { %2304 = vst.msk [vmem:[%s2927_s30 + $0x8] sm:$0xf] %vm785_vm5, %v2491_v24  ;;  %v2492_v25 = vpack.c.bf16 %v2265_v20, %v2265_v20 }
 0x284   : > { %2302 = vst.msk [vmem:[%s2927_s30] sm:$0xf] %vm785_vm5, %v2489_v6  ;;  %v2490_v3 = vpack.c.bf16 %v2263_v7, %v2263_v7  ;;  %v2684_v13 = vpop.f32.mrb[8].mxu0 }
 0x285   : > { %2305 = vst.msk [vmem:[%s2927_s30 + $0xc] sm:$0xf] %vm785_vm5, %v2492_v25  ;;  %v2701_v21 = vadd.f32 %v2700_v12, %v2684_v13  ;;  %v2232_v5 = vpop.f32.mrb[9].mxu0 }
 0x286   : > { %2303 = vst.msk [vmem:[%s2927_s30 + $0x4] sm:$0xf] %vm785_vm5, %v2490_v3  ;;  %v2703_v9 = vadd.f32 %v2702_v30, %v2232_v5  ;;  %v2685_v10 = vpop.f32.mrb[10].mxu0 }
 0x287   : > { %v2268_v11 = vadd.f32 %v2701_v21, %v2475_v48  ;;  %v2705_v27 = vadd.f32 %v2704_v4, %v2685_v10  ;;  %v2235_v17 = vpop.f32.mrb[11].mxu0 }
 0x288   : > { %v2266_v33 = vadd.f32 %v2703_v9, %v2475_v48  ;;  %v2707_v18 = vadd.f32 %v2706_v8, %v2235_v17 }
 0x289   : > { %v2495_v57 = vpack.c.bf16 %v2268_v11, %v2268_v11  ;;  %v2269_v26 = vadd.f32 %v2705_v27, %v2475_v48 }
 0x28a   : > { %v2493_v28 = vpack.c.bf16 %v2266_v33, %v2266_v33  ;;  %v2267_v29 = vadd.f32 %v2707_v18, %v2475_v48 }
 0x28b   : > { %2308 = vst.msk [vmem:[%s2927_s30 + $0x18] sm:$0xf] %vm785_vm5, %v2495_v57  ;;  %v2496_v31 = vpack.c.bf16 %v2269_v26, %v2269_v26 }
 0x28c   : > { %2306 = vst.msk [vmem:[%s2927_s30 + $0x10] sm:$0xf] %vm785_vm5, %v2493_v28  ;;  %v2494_v61 = vpack.c.bf16 %v2267_v29, %v2267_v29 }
 0x28d   : > { %2309 = vst.msk [vmem:[%s2927_s30 + $0x1c] sm:$0xf] %vm785_vm5, %v2496_v31 }
 0x28e   : > { %2307 = vst.msk [vmem:[%s2927_s30 + $0x14] sm:$0xf] %vm785_vm5, %v2494_v61 }
 0x28f PF: > { %s21_s17 = sadd.s32 1, %s2838_s17  }
 0x290   : > { %p18_p5 = scmp.ge.s32.totalorder %s21_s17, 4  }
 0x292   :  { %20 = sbr.rel (!%p18_p5) target bundleno = 1 (0x1), region = 111 }

</bundles_post_ra>
